<compile_context>
chip_gen: v5e
topology: v5e:2x2
jax: 0.10.0
libtpu: 0.0.40
codegen_flags: <defaults>
</compile_context>

<pallas_src>
import functools

import jax
import jax.numpy as jnp
from jax import lax
from jax.experimental import pallas as pl
from jax.experimental.pallas import tpu as pltpu

_NEG = -1e30  # -inf surrogate for max-pool padding (never selected: every window
              # of MaxPool(3,2,1) contains at least one real pixel)


def _round_up(x, m):
    return (x + m - 1) // m * m


# --------------------------------------------------------------------------
# Pallas kernel: whole ResNet12Block for one image per grid step
# --------------------------------------------------------------------------
def _resnet12_block_kernel(H, W, Ho, Wo, Cp,
                           x_ref, mask_ref, wr_ref, br_ref, w1_ref, b1_ref,
                           w2_ref, b2_ref, w3_ref, b3_ref, sel_ref,
                           o_ref, t1_ref, zp_ref):
    Wp = W + 2                    # padded row stride
    L = H * Wp                    # conv working grid (2 junk cols per row)
    L2 = (2 * Ho - 1) * Wp        # dense 3x3-max grid for the pool
    PP = t1_ref.shape[0]          # padded flat grid, rounded up

    def lrelu(v):
        return jnp.where(v >= 0.0, v, 0.2 * v)

    xp = x_ref[0]                 # (PP, Cin) bf16, loaded once
    mask = mask_ref[...]          # (PP, 1) f32: 1 on real pixels, 0 on ring/tail

    # ---- residual path: bn(conv1x1(x)), aligned to the conv grid ----
    res = jnp.dot(xp, wr_ref[...], preferred_element_type=jnp.float32) + br_ref[...]
    res = res[Wp + 1:Wp + 1 + L, :]

    # ---- conv1(1x1) + bn1 + lrelu, zero ring = conv2's zero padding ----
    t1 = jnp.dot(xp, w1_ref[...], preferred_element_type=jnp.float32) + b1_ref[...]
    t1_ref[...] = lrelu(t1) * mask

    # ---- conv2(3x3, pad=1) + bn2 + lrelu: 9 shifted MXU dots (fused im2col) ----
    acc = jnp.dot(t1_ref[pl.ds(0, L), :].astype(jnp.bfloat16), w2_ref[0],
                  preferred_element_type=jnp.float32)
    for k in range(1, 9):
        off = (k // 3) * Wp + (k % 3)
        acc += jnp.dot(t1_ref[pl.ds(off, L), :].astype(jnp.bfloat16), w2_ref[k],
                       preferred_element_type=jnp.float32)
    t2 = lrelu(acc + b2_ref[...]).astype(jnp.bfloat16)

    # ---- conv3(1x1) + bn3, residual add, lrelu ----
    z = jnp.dot(t2, w3_ref[...], preferred_element_type=jnp.float32) + b3_ref[...]
    z = lrelu(z + res)

    # ---- MaxPool2d(3, stride=2, pad=1) fused epilogue ----
    valid = mask[Wp + 1:Wp + 1 + L, :]                       # marks x < W
    zp_ref[...] = jnp.full((PP, Cp), _NEG, jnp.float32)      # -inf ring / junk
    zp_ref[pl.ds(Wp + 1, L), :] = jnp.where(valid > 0.0, z, _NEG)
    m = zp_ref[pl.ds(0, L2), :]
    for k in range(1, 9):
        off = (k // 3) * Wp + (k % 3)
        m = jnp.maximum(m, zp_ref[pl.ds(off, L2), :])
    # stride-2 subsample of the dense max, folded into a small selection matmul
    o_ref[0] = jnp.dot(sel_ref[...], m, preferred_element_type=jnp.float32)


# --------------------------------------------------------------------------
# Wrapper: BN folding, padded flat layout, pallas_call
# --------------------------------------------------------------------------
def _fold_bn_1x1(w_oi11, bn, eps=1e-5):
    gamma, beta, mean, var = bn
    scale = gamma * lax.rsqrt(var + eps)
    w = jnp.transpose(w_oi11[:, :, 0, 0], (1, 0)) * scale[None, :]   # (Cin, Cout)
    shift = (beta - mean * scale)[None, :]
    return w.astype(jnp.bfloat16), shift.astype(jnp.float32)


def _fold_bn_3x3(w_oihw, bn, eps=1e-5):
    gamma, beta, mean, var = bn
    scale = gamma * lax.rsqrt(var + eps)
    cout, cin = w_oihw.shape[0], w_oihw.shape[1]
    w = jnp.transpose(w_oihw, (2, 3, 1, 0)).reshape(9, cin, cout) * scale[None, None, :]
    shift = (beta - mean * scale)[None, :]
    return w.astype(jnp.bfloat16), shift.astype(jnp.float32)


def resnet12_block_forward(x_nchw, params):
    """ResNet12Block forward (eval-mode BN).  NCHW in -> NCHW out."""
    N, Cin, H, W = x_nchw.shape
    Cp = params["conv1"].shape[0]
    Wp = W + 2
    P = (H + 2) * Wp
    L = H * Wp
    Ho = (H - 1) // 2 + 1
    Wo = (W - 1) // 2 + 1
    L2 = (2 * Ho - 1) * Wp
    PP = _round_up(P + 2, 8)     # +2 keeps every 3x3 tap slice in bounds

    # NCHW -> zero-padded NHWC -> row-major flat (N, PP, Cin) bf16 for the MXU
    x = jnp.transpose(x_nchw, (0, 2, 3, 1)).astype(jnp.float32)
    xpad = jnp.pad(x, ((0, 0), (1, 1), (1, 1), (0, 0))).reshape(N, P, Cin)
    xflat = jnp.pad(xpad, ((0, 0), (0, PP - P), (0, 0))).astype(jnp.bfloat16)

    # interior mask on the padded flat grid
    mask = jnp.pad(jnp.ones((H, W), jnp.float32), ((1, 1), (1, 1))).reshape(P, 1)
    mask = jnp.pad(mask, ((0, PP - P), (0, 0)))

    # BN(eval) folded into bf16 weights (scale) + f32 bias rows (shift)
    wr, br = _fold_bn_1x1(params["conv"], params["bn"])
    w1, b1 = _fold_bn_1x1(params["conv1"], params["bn1"])
    w2, b2 = _fold_bn_3x3(params["conv2"], params["bn2"])
    w3, b3 = _fold_bn_1x1(params["conv3"], params["bn3"])

    # stride-2 subsample of the dense 3x3 max, expressed as a selection matmul
    rows = jnp.arange(Ho * Wo, dtype=jnp.int32)
    cols = 2 * (rows // Wo) * Wp + 2 * (rows % Wo)
    sel = jnp.zeros((Ho * Wo, L2), jnp.float32).at[rows, cols].set(1.0)

    kernel = functools.partial(_resnet12_block_kernel, H, W, Ho, Wo, Cp)
    out = pl.pallas_call(
        kernel,
        out_shape=jax.ShapeDtypeStruct((N, Ho * Wo, Cp), jnp.float32),
        grid_spec=pltpu.PrefetchScalarGridSpec(
            num_scalar_prefetch=0,
            grid=(N,),
            in_specs=[
                pl.BlockSpec((1, PP, Cin), lambda n: (n, 0, 0)),    # x (padded, flat)
                pl.BlockSpec((PP, 1), lambda n: (0, 0)),            # interior mask
                pl.BlockSpec((Cin, Cp), lambda n: (0, 0)),          # conv  (residual)
                pl.BlockSpec((1, Cp), lambda n: (0, 0)),
                pl.BlockSpec((Cin, Cp), lambda n: (0, 0)),          # conv1
                pl.BlockSpec((1, Cp), lambda n: (0, 0)),
                pl.BlockSpec((9, Cp, Cp), lambda n: (0, 0, 0)),     # conv2 (tap-major)
                pl.BlockSpec((1, Cp), lambda n: (0, 0)),
                pl.BlockSpec((Cp, Cp), lambda n: (0, 0)),           # conv3
                pl.BlockSpec((1, Cp), lambda n: (0, 0)),
                pl.BlockSpec((Ho * Wo, L2), lambda n: (0, 0)),      # pool selection
            ],
            out_specs=pl.BlockSpec((1, Ho * Wo, Cp), lambda n: (n, 0, 0)),
            scratch_shapes=[
                pltpu.VMEM((PP, Cp), jnp.float32),   # zero-padded t1 (conv2 input)
                pltpu.VMEM((PP, Cp), jnp.float32),   # -inf-padded pre-pool buffer
            ],
        ),
        compiler_params=pltpu.CompilerParams(
            dimension_semantics=("parallel",)),
    )(xflat, mask, wr, br, w1, b1, w2, b2, w3, b3, sel)

    # (N, Ho*Wo, Cp) -> NCHW for PyTorch parity
    return jnp.transpose(out.reshape(N, Ho, Wo, Cp), (0, 3, 1, 2))


# --------------------------------------------------------------------------
# Pure-JAX reference (mirrors the kernel's bf16 operand rounding)
# --------------------------------------------------------------------------
def _bf(v):
    return v.astype(jnp.bfloat16).astype(jnp.float32)


def reference_forward(x_nchw, params, eps=1e-5):
    def fold(bn):
        g, b, m, v = bn
        s = g * lax.rsqrt(v + eps)
        return s, b - m * s

    def conv1x1(inp, w, bn):
        s, sh = fold(bn)
        wm = _bf(jnp.transpose(w[:, :, 0, 0], (1, 0)) * s[None, :])
        return jnp.einsum("nhwc,cd->nhwd", inp, wm) + sh

    def conv3x3(inp, w, bn):
        s, sh = fold(bn)
        wm = _bf(jnp.transpose(w, (2, 3, 1, 0)) * s[None, None, None, :])
        y = lax.conv_general_dilated(
            inp, wm, window_strides=(1, 1), padding=((1, 1), (1, 1)),
            dimension_numbers=("NHWC", "HWIO", "NHWC"))
        return y + sh

    lrelu = lambda v: jnp.where(v >= 0.0, v, 0.2 * v)

    x = _bf(jnp.transpose(x_nchw, (0, 2, 3, 1)).astype(jnp.float32))
    res = conv1x1(x, params["conv"], params["bn"])
    t1 = _bf(lrelu(conv1x1(x, params["conv1"], params["bn1"])))
    t2 = _bf(lrelu(conv3x3(t1, params["conv2"], params["bn2"])))
    z = lrelu(conv1x1(t2, params["conv3"], params["bn3"]) + res)
    zp = lax.reduce_window(z, -jnp.inf, lax.max, (1, 3, 3, 1), (1, 2, 2, 1),
                           [(0, 0), (1, 1), (1, 1), (0, 0)])
    return jnp.transpose(zp, (0, 3, 1, 2))


# --------------------------------------------------------------------------
# Deterministic parameter initialization (shapes from ResNet12Block.__init__)
# --------------------------------------------------------------------------
def init_params(key, inplanes, planes):
    ks = jax.random.split(key, 8)

    def conv_w(k, cout, cin, ksz):
        fan = cin * ksz * ksz
        return (jax.random.normal(k, (cout, cin, ksz, ksz), jnp.float32)
                * (2.0 / fan) ** 0.5)

    def bn_stats(k, c):
        k1, k2, k3, k4 = jax.random.split(k, 4)
        gamma = 1.0 + 0.1 * jax.random.normal(k1, (c,), jnp.float32)
        beta = 0.1 * jax.random.normal(k2, (c,), jnp.float32)
        mean = 0.1 * jax.random.normal(k3, (c,), jnp.float32)
        var = 1.0 + 0.1 * jnp.abs(jax.random.normal(k4, (c,), jnp.float32))
        return (gamma, beta, mean, var)

    return {
        "conv1": conv_w(ks[0], planes, inplanes, 1), "bn1": bn_stats(ks[1], planes),
        "conv2": conv_w(ks[2], planes, planes, 3),   "bn2": bn_stats(ks[3], planes),
        "conv3": conv_w(ks[4], planes, planes, 1),   "bn3": bn_stats(ks[5], planes),
        "conv":  conv_w(ks[6], planes, inplanes, 1), "bn":  bn_stats(ks[7], planes),
    }


if __name__ == "__main__":
    key = jax.random.PRNGKey(0)
    kp, kx = jax.random.split(key)

    # planes=128 keeps every conv output lane-dense (128-lane vregs);
    # batch=2 gives two "parallel" grid steps (feeds both v7x TensorCores).
    N, inplanes, planes, H, W = 2, 64, 128, 16, 16
    params = init_params(kp, inplanes, planes)
    x = jax.random.normal(kx, (N, inplanes, H, W), jnp.float32)

    fwd = jax.jit(resnet12_block_forward)
    out = fwd(x, params)
    jax.block_until_ready(out)

    assert out.shape == (N, planes, H // 2, W // 2), out.shape
    assert bool(jnp.all(jnp.isfinite(out)))

    ref = reference_forward(x, params)
    err = float(jnp.max(jnp.abs(out - ref)))
    scale = float(jnp.max(jnp.abs(ref)))
    assert err <= 1e-2 * scale + 1e-3, (err, scale)
    print("KERNEL_OK")
</pallas_src>

<mosaic_0001>
module attributes {stable_mosaic.version = 11 : i64} {
  func.func @_resnet12_block_kernel(%arg0: i32, %arg1: memref<1x328x64xbf16, #tpu.memory_space<vmem>>, %arg2: memref<328x1xf32, #tpu.memory_space<vmem>>, %arg3: memref<64x128xbf16, #tpu.memory_space<vmem>>, %arg4: memref<1x128xf32, #tpu.memory_space<vmem>>, %arg5: memref<64x128xbf16, #tpu.memory_space<vmem>>, %arg6: memref<1x128xf32, #tpu.memory_space<vmem>>, %arg7: memref<9x128x128xbf16, #tpu.memory_space<vmem>>, %arg8: memref<1x128xf32, #tpu.memory_space<vmem>>, %arg9: memref<128x128xbf16, #tpu.memory_space<vmem>>, %arg10: memref<1x128xf32, #tpu.memory_space<vmem>>, %arg11: memref<64x270xf32, #tpu.memory_space<vmem>>, %arg12: memref<1x64x128xf32, #tpu.memory_space<vmem>>, %arg13: memref<328x128xf32, #tpu.memory_space<vmem>>, %arg14: memref<328x128xf32, #tpu.memory_space<vmem>>) attributes {dimension_semantics = [#tpu.dimension_semantics<parallel>], iteration_bounds = array<i64: 2>, scalar_prefetch = 0 : i64, scratch_operands = 2 : i64, tpu.core_type = #tpu.core_type<tc>, window_params = [{transform_indices = @transform_0, window_bounds = array<i64: 1, 328, 64>}, {pipeline_mode = #tpu.pipeline_mode<synchronous>, transform_indices = @transform_1, window_bounds = array<i64: 328, 1>}, {pipeline_mode = #tpu.pipeline_mode<synchronous>, transform_indices = @transform_2, window_bounds = array<i64: 64, 128>}, {pipeline_mode = #tpu.pipeline_mode<synchronous>, transform_indices = @transform_3, window_bounds = array<i64: 1, 128>}, {pipeline_mode = #tpu.pipeline_mode<synchronous>, transform_indices = @transform_4, window_bounds = array<i64: 64, 128>}, {pipeline_mode = #tpu.pipeline_mode<synchronous>, transform_indices = @transform_5, window_bounds = array<i64: 1, 128>}, {pipeline_mode = #tpu.pipeline_mode<synchronous>, transform_indices = @transform_6, window_bounds = array<i64: 9, 128, 128>}, {pipeline_mode = #tpu.pipeline_mode<synchronous>, transform_indices = @transform_7, window_bounds = array<i64: 1, 128>}, {pipeline_mode = #tpu.pipeline_mode<synchronous>, transform_indices = @transform_8, window_bounds = array<i64: 128, 128>}, {pipeline_mode = #tpu.pipeline_mode<synchronous>, transform_indices = @transform_9, window_bounds = array<i64: 1, 128>}, {pipeline_mode = #tpu.pipeline_mode<synchronous>, transform_indices = @transform_10, window_bounds = array<i64: 64, 270>}, {transform_indices = @transform_11, window_bounds = array<i64: 1, 64, 128>}]} {
    %c0 = arith.constant 0 : index
    %c0_0 = arith.constant 0 : index
    %c0_1 = arith.constant 0 : index
    %0 = vector.load %arg1[%c0, %c0_0, %c0_1] : memref<1x328x64xbf16, #tpu.memory_space<vmem>>, vector<1x328x64xbf16>
    %1 = vector.shape_cast %0 : vector<1x328x64xbf16> to vector<328x64xbf16>
    %c0_2 = arith.constant 0 : index
    %c0_3 = arith.constant 0 : index
    %2 = vector.load %arg2[%c0_2, %c0_3] : memref<328x1xf32, #tpu.memory_space<vmem>>, vector<328x1xf32>
    %c0_4 = arith.constant 0 : index
    %c0_5 = arith.constant 0 : index
    %3 = vector.load %arg3[%c0_4, %c0_5] : memref<64x128xbf16, #tpu.memory_space<vmem>>, vector<64x128xbf16>
    %cst = arith.constant dense<0.000000e+00> : vector<328x128xf32>
    %4 = tpu.matmul %1, %3, %cst {dimension_numbers = #tpu.dot_dimension_numbers<[1], [0], [0], [1], [0, 0, 1, 1], [], []>} : vector<328x64xbf16>, vector<64x128xbf16>, vector<328x128xf32> -> vector<328x128xf32>
    %c0_6 = arith.constant 0 : index
    %c0_7 = arith.constant 0 : index
    %5 = vector.load %arg4[%c0_6, %c0_7] : memref<1x128xf32, #tpu.memory_space<vmem>>, vector<1x128xf32>
    %6 = vector.broadcast %5 : vector<1x128xf32> to vector<328x128xf32>
    %7 = arith.addf %4, %6 : vector<328x128xf32>
    %8 = vector.extract_strided_slice %7 {offsets = [19, 0], sizes = [288, 128], strides = [1, 1]} : vector<328x128xf32> to vector<288x128xf32>
    %c0_8 = arith.constant 0 : index
    %c0_9 = arith.constant 0 : index
    %9 = vector.load %arg5[%c0_8, %c0_9] : memref<64x128xbf16, #tpu.memory_space<vmem>>, vector<64x128xbf16>
    %cst_10 = arith.constant dense<0.000000e+00> : vector<328x128xf32>
    %10 = tpu.matmul %1, %9, %cst_10 {dimension_numbers = #tpu.dot_dimension_numbers<[1], [0], [0], [1], [0, 0, 1, 1], [], []>} : vector<328x64xbf16>, vector<64x128xbf16>, vector<328x128xf32> -> vector<328x128xf32>
    %c0_11 = arith.constant 0 : index
    %c0_12 = arith.constant 0 : index
    %11 = vector.load %arg6[%c0_11, %c0_12] : memref<1x128xf32, #tpu.memory_space<vmem>>, vector<1x128xf32>
    %12 = vector.broadcast %11 : vector<1x128xf32> to vector<328x128xf32>
    %13 = arith.addf %10, %12 : vector<328x128xf32>
    %cst_13 = arith.constant 0.000000e+00 : f32
    %14 = vector.broadcast %cst_13 : f32 to vector<328x128xf32>
    %15 = arith.cmpf oge, %13, %14 : vector<328x128xf32>
    %cst_14 = arith.constant 2.000000e-01 : f32
    %16 = vector.broadcast %cst_14 : f32 to vector<328x128xf32>
    %17 = arith.mulf %16, %13 : vector<328x128xf32>
    %18 = arith.select %15, %13, %17 : vector<328x128xi1>, vector<328x128xf32>
    %19 = vector.broadcast %2 : vector<328x1xf32> to vector<328x128xf32>
    %20 = arith.mulf %18, %19 : vector<328x128xf32>
    %c0_15 = arith.constant 0 : index
    %c0_16 = arith.constant 0 : index
    %21 = vector.load %arg13[%c0_15, %c0_16] : memref<328x128xf32, #tpu.memory_space<vmem>>, vector<328x128xf32>
    tpu.vector_store %arg13[%c0_15, %c0_16], %20 {strides = array<i32>} : memref<328x128xf32, #tpu.memory_space<vmem>>, vector<328x128xf32>,
    %c0_17 = arith.constant 0 : index
    %c0_18 = arith.constant 0 : index
    %22 = vector.load %arg13[%c0_17, %c0_18] : memref<328x128xf32, #tpu.memory_space<vmem>>, vector<288x128xf32>
    %23 = arith.truncf %22 : vector<288x128xf32> to vector<288x128xbf16>
    %c0_19 = arith.constant 0 : index
    %c0_20 = arith.constant 0 : index
    %c0_21 = arith.constant 0 : index
    %24 = vector.load %arg7[%c0_19, %c0_20, %c0_21] : memref<9x128x128xbf16, #tpu.memory_space<vmem>>, vector<1x128x128xbf16>
    %25 = vector.shape_cast %24 : vector<1x128x128xbf16> to vector<128x128xbf16>
    %cst_22 = arith.constant dense<0.000000e+00> : vector<288x128xf32>
    %26 = tpu.matmul %23, %25, %cst_22 {dimension_numbers = #tpu.dot_dimension_numbers<[1], [0], [0], [1], [0, 0, 1, 1], [], []>} : vector<288x128xbf16>, vector<128x128xbf16>, vector<288x128xf32> -> vector<288x128xf32>
    %c1 = arith.constant 1 : index
    %c0_23 = arith.constant 0 : index
    %27 = vector.load %arg13[%c1, %c0_23] : memref<328x128xf32, #tpu.memory_space<vmem>>, vector<288x128xf32>
    %28 = arith.truncf %27 : vector<288x128xf32> to vector<288x128xbf16>
    %c1_24 = arith.constant 1 : index
    %c0_25 = arith.constant 0 : index
    %c0_26 = arith.constant 0 : index
    %29 = vector.load %arg7[%c1_24, %c0_25, %c0_26] : memref<9x128x128xbf16, #tpu.memory_space<vmem>>, vector<1x128x128xbf16>
    %30 = vector.shape_cast %29 : vector<1x128x128xbf16> to vector<128x128xbf16>
    %cst_27 = arith.constant dense<0.000000e+00> : vector<288x128xf32>
    %31 = tpu.matmul %28, %30, %cst_27 {dimension_numbers = #tpu.dot_dimension_numbers<[1], [0], [0], [1], [0, 0, 1, 1], [], []>} : vector<288x128xbf16>, vector<128x128xbf16>, vector<288x128xf32> -> vector<288x128xf32>
    %32 = arith.addf %26, %31 : vector<288x128xf32>
    %c2 = arith.constant 2 : index
    %c0_28 = arith.constant 0 : index
    %33 = vector.load %arg13[%c2, %c0_28] : memref<328x128xf32, #tpu.memory_space<vmem>>, vector<288x128xf32>
    %34 = arith.truncf %33 : vector<288x128xf32> to vector<288x128xbf16>
    %c2_29 = arith.constant 2 : index
    %c0_30 = arith.constant 0 : index
    %c0_31 = arith.constant 0 : index
    %35 = vector.load %arg7[%c2_29, %c0_30, %c0_31] : memref<9x128x128xbf16, #tpu.memory_space<vmem>>, vector<1x128x128xbf16>
    %36 = vector.shape_cast %35 : vector<1x128x128xbf16> to vector<128x128xbf16>
    %cst_32 = arith.constant dense<0.000000e+00> : vector<288x128xf32>
    %37 = tpu.matmul %34, %36, %cst_32 {dimension_numbers = #tpu.dot_dimension_numbers<[1], [0], [0], [1], [0, 0, 1, 1], [], []>} : vector<288x128xbf16>, vector<128x128xbf16>, vector<288x128xf32> -> vector<288x128xf32>
    %38 = arith.addf %32, %37 : vector<288x128xf32>
    %c18 = arith.constant 18 : index
    %c0_33 = arith.constant 0 : index
    %39 = vector.load %arg13[%c18, %c0_33] : memref<328x128xf32, #tpu.memory_space<vmem>>, vector<288x128xf32>
    %40 = arith.truncf %39 : vector<288x128xf32> to vector<288x128xbf16>
    %c3 = arith.constant 3 : index
    %c0_34 = arith.constant 0 : index
    %c0_35 = arith.constant 0 : index
    %41 = vector.load %arg7[%c3, %c0_34, %c0_35] : memref<9x128x128xbf16, #tpu.memory_space<vmem>>, vector<1x128x128xbf16>
    %42 = vector.shape_cast %41 : vector<1x128x128xbf16> to vector<128x128xbf16>
    %cst_36 = arith.constant dense<0.000000e+00> : vector<288x128xf32>
    %43 = tpu.matmul %40, %42, %cst_36 {dimension_numbers = #tpu.dot_dimension_numbers<[1], [0], [0], [1], [0, 0, 1, 1], [], []>} : vector<288x128xbf16>, vector<128x128xbf16>, vector<288x128xf32> -> vector<288x128xf32>
    %44 = arith.addf %38, %43 : vector<288x128xf32>
    %c19 = arith.constant 19 : index
    %c0_37 = arith.constant 0 : index
    %45 = vector.load %arg13[%c19, %c0_37] : memref<328x128xf32, #tpu.memory_space<vmem>>, vector<288x128xf32>
    %46 = arith.truncf %45 : vector<288x128xf32> to vector<288x128xbf16>
    %c4 = arith.constant 4 : index
    %c0_38 = arith.constant 0 : index
    %c0_39 = arith.constant 0 : index
    %47 = vector.load %arg7[%c4, %c0_38, %c0_39] : memref<9x128x128xbf16, #tpu.memory_space<vmem>>, vector<1x128x128xbf16>
    %48 = vector.shape_cast %47 : vector<1x128x128xbf16> to vector<128x128xbf16>
    %cst_40 = arith.constant dense<0.000000e+00> : vector<288x128xf32>
    %49 = tpu.matmul %46, %48, %cst_40 {dimension_numbers = #tpu.dot_dimension_numbers<[1], [0], [0], [1], [0, 0, 1, 1], [], []>} : vector<288x128xbf16>, vector<128x128xbf16>, vector<288x128xf32> -> vector<288x128xf32>
    %50 = arith.addf %44, %49 : vector<288x128xf32>
    %c20 = arith.constant 20 : index
    %c0_41 = arith.constant 0 : index
    %51 = vector.load %arg13[%c20, %c0_41] : memref<328x128xf32, #tpu.memory_space<vmem>>, vector<288x128xf32>
    %52 = arith.truncf %51 : vector<288x128xf32> to vector<288x128xbf16>
    %c5 = arith.constant 5 : index
    %c0_42 = arith.constant 0 : index
    %c0_43 = arith.constant 0 : index
    %53 = vector.load %arg7[%c5, %c0_42, %c0_43] : memref<9x128x128xbf16, #tpu.memory_space<vmem>>, vector<1x128x128xbf16>
    %54 = vector.shape_cast %53 : vector<1x128x128xbf16> to vector<128x128xbf16>
    %cst_44 = arith.constant dense<0.000000e+00> : vector<288x128xf32>
    %55 = tpu.matmul %52, %54, %cst_44 {dimension_numbers = #tpu.dot_dimension_numbers<[1], [0], [0], [1], [0, 0, 1, 1], [], []>} : vector<288x128xbf16>, vector<128x128xbf16>, vector<288x128xf32> -> vector<288x128xf32>
    %56 = arith.addf %50, %55 : vector<288x128xf32>
    %c36 = arith.constant 36 : index
    %c0_45 = arith.constant 0 : index
    %57 = vector.load %arg13[%c36, %c0_45] : memref<328x128xf32, #tpu.memory_space<vmem>>, vector<288x128xf32>
    %58 = arith.truncf %57 : vector<288x128xf32> to vector<288x128xbf16>
    %c6 = arith.constant 6 : index
    %c0_46 = arith.constant 0 : index
    %c0_47 = arith.constant 0 : index
    %59 = vector.load %arg7[%c6, %c0_46, %c0_47] : memref<9x128x128xbf16, #tpu.memory_space<vmem>>, vector<1x128x128xbf16>
    %60 = vector.shape_cast %59 : vector<1x128x128xbf16> to vector<128x128xbf16>
    %cst_48 = arith.constant dense<0.000000e+00> : vector<288x128xf32>
    %61 = tpu.matmul %58, %60, %cst_48 {dimension_numbers = #tpu.dot_dimension_numbers<[1], [0], [0], [1], [0, 0, 1, 1], [], []>} : vector<288x128xbf16>, vector<128x128xbf16>, vector<288x128xf32> -> vector<288x128xf32>
    %62 = arith.addf %56, %61 : vector<288x128xf32>
    %c37 = arith.constant 37 : index
    %c0_49 = arith.constant 0 : index
    %63 = vector.load %arg13[%c37, %c0_49] : memref<328x128xf32, #tpu.memory_space<vmem>>, vector<288x128xf32>
    %64 = arith.truncf %63 : vector<288x128xf32> to vector<288x128xbf16>
    %c7 = arith.constant 7 : index
    %c0_50 = arith.constant 0 : index
    %c0_51 = arith.constant 0 : index
    %65 = vector.load %arg7[%c7, %c0_50, %c0_51] : memref<9x128x128xbf16, #tpu.memory_space<vmem>>, vector<1x128x128xbf16>
    %66 = vector.shape_cast %65 : vector<1x128x128xbf16> to vector<128x128xbf16>
    %cst_52 = arith.constant dense<0.000000e+00> : vector<288x128xf32>
    %67 = tpu.matmul %64, %66, %cst_52 {dimension_numbers = #tpu.dot_dimension_numbers<[1], [0], [0], [1], [0, 0, 1, 1], [], []>} : vector<288x128xbf16>, vector<128x128xbf16>, vector<288x128xf32> -> vector<288x128xf32>
    %68 = arith.addf %62, %67 : vector<288x128xf32>
    %c38 = arith.constant 38 : index
    %c0_53 = arith.constant 0 : index
    %69 = vector.load %arg13[%c38, %c0_53] : memref<328x128xf32, #tpu.memory_space<vmem>>, vector<288x128xf32>
    %70 = arith.truncf %69 : vector<288x128xf32> to vector<288x128xbf16>
    %c8 = arith.constant 8 : index
    %c0_54 = arith.constant 0 : index
    %c0_55 = arith.constant 0 : index
    %71 = vector.load %arg7[%c8, %c0_54, %c0_55] : memref<9x128x128xbf16, #tpu.memory_space<vmem>>, vector<1x128x128xbf16>
    %72 = vector.shape_cast %71 : vector<1x128x128xbf16> to vector<128x128xbf16>
    %cst_56 = arith.constant dense<0.000000e+00> : vector<288x128xf32>
    %73 = tpu.matmul %70, %72, %cst_56 {dimension_numbers = #tpu.dot_dimension_numbers<[1], [0], [0], [1], [0, 0, 1, 1], [], []>} : vector<288x128xbf16>, vector<128x128xbf16>, vector<288x128xf32> -> vector<288x128xf32>
    %74 = arith.addf %68, %73 : vector<288x128xf32>
    %c0_57 = arith.constant 0 : index
    %c0_58 = arith.constant 0 : index
    %75 = vector.load %arg8[%c0_57, %c0_58] : memref<1x128xf32, #tpu.memory_space<vmem>>, vector<1x128xf32>
    %76 = vector.broadcast %75 : vector<1x128xf32> to vector<288x128xf32>
    %77 = arith.addf %74, %76 : vector<288x128xf32>
    %cst_59 = arith.constant 0.000000e+00 : f32
    %78 = vector.broadcast %cst_59 : f32 to vector<288x128xf32>
    %79 = arith.cmpf oge, %77, %78 : vector<288x128xf32>
    %cst_60 = arith.constant 2.000000e-01 : f32
    %80 = vector.broadcast %cst_60 : f32 to vector<288x128xf32>
    %81 = arith.mulf %80, %77 : vector<288x128xf32>
    %82 = arith.select %79, %77, %81 : vector<288x128xi1>, vector<288x128xf32>
    %83 = arith.truncf %82 : vector<288x128xf32> to vector<288x128xbf16>
    %c0_61 = arith.constant 0 : index
    %c0_62 = arith.constant 0 : index
    %84 = vector.load %arg9[%c0_61, %c0_62] : memref<128x128xbf16, #tpu.memory_space<vmem>>, vector<128x128xbf16>
    %cst_63 = arith.constant dense<0.000000e+00> : vector<288x128xf32>
    %85 = tpu.matmul %83, %84, %cst_63 {dimension_numbers = #tpu.dot_dimension_numbers<[1], [0], [0], [1], [0, 0, 1, 1], [], []>} : vector<288x128xbf16>, vector<128x128xbf16>, vector<288x128xf32> -> vector<288x128xf32>
    %c0_64 = arith.constant 0 : index
    %c0_65 = arith.constant 0 : index
    %86 = vector.load %arg10[%c0_64, %c0_65] : memref<1x128xf32, #tpu.memory_space<vmem>>, vector<1x128xf32>
    %87 = vector.broadcast %86 : vector<1x128xf32> to vector<288x128xf32>
    %88 = arith.addf %85, %87 : vector<288x128xf32>
    %89 = arith.addf %88, %8 : vector<288x128xf32>
    %cst_66 = arith.constant 0.000000e+00 : f32
    %90 = vector.broadcast %cst_66 : f32 to vector<288x128xf32>
    %91 = arith.cmpf oge, %89, %90 : vector<288x128xf32>
    %cst_67 = arith.constant 2.000000e-01 : f32
    %92 = vector.broadcast %cst_67 : f32 to vector<288x128xf32>
    %93 = arith.mulf %92, %89 : vector<288x128xf32>
    %94 = arith.select %91, %89, %93 : vector<288x128xi1>, vector<288x128xf32>
    %95 = vector.extract_strided_slice %2 {offsets = [19, 0], sizes = [288, 1], strides = [1, 1]} : vector<328x1xf32> to vector<288x1xf32>
    %cst_68 = arith.constant -1.000000e+30 : f32
    %96 = vector.broadcast %cst_68 : f32 to vector<328x128xf32>
    %c0_69 = arith.constant 0 : index
    %c0_70 = arith.constant 0 : index
    %97 = vector.load %arg14[%c0_69, %c0_70] : memref<328x128xf32, #tpu.memory_space<vmem>>, vector<328x128xf32>
    tpu.vector_store %arg14[%c0_69, %c0_70], %96 {strides = array<i32>} : memref<328x128xf32, #tpu.memory_space<vmem>>, vector<328x128xf32>,
    %cst_71 = arith.constant 0.000000e+00 : f32
    %98 = vector.broadcast %cst_71 : f32 to vector<288x1xf32>
    %99 = arith.cmpf ogt, %95, %98 : vector<288x1xf32>
    %cst_72 = arith.constant -1.000000e+30 : f32
    %100 = vector.shape_cast %99 : vector<288x1xi1> to vector<288x1xi1>
    %101 = vector.broadcast %100 : vector<288x1xi1> to vector<288x128xi1>
    %102 = vector.broadcast %cst_72 : f32 to vector<288x128xf32>
    %103 = arith.select %101, %94, %102 : vector<288x128xi1>, vector<288x128xf32>
    %c19_73 = arith.constant 19 : index
    %c0_74 = arith.constant 0 : index
    %104 = vector.load %arg14[%c19_73, %c0_74] : memref<328x128xf32, #tpu.memory_space<vmem>>, vector<288x128xf32>
    tpu.vector_store %arg14[%c19_73, %c0_74], %103 {strides = array<i32>} : memref<328x128xf32, #tpu.memory_space<vmem>>, vector<288x128xf32>,
    %c0_75 = arith.constant 0 : index
    %c0_76 = arith.constant 0 : index
    %105 = vector.load %arg14[%c0_75, %c0_76] : memref<328x128xf32, #tpu.memory_space<vmem>>, vector<270x128xf32>
    %c1_77 = arith.constant 1 : index
    %c0_78 = arith.constant 0 : index
    %106 = vector.load %arg14[%c1_77, %c0_78] : memref<328x128xf32, #tpu.memory_space<vmem>>, vector<270x128xf32>
    %107 = arith.maximumf %105, %106 : vector<270x128xf32>
    %c2_79 = arith.constant 2 : index
    %c0_80 = arith.constant 0 : index
    %108 = vector.load %arg14[%c2_79, %c0_80] : memref<328x128xf32, #tpu.memory_space<vmem>>, vector<270x128xf32>
    %109 = arith.maximumf %107, %108 : vector<270x128xf32>
    %c18_81 = arith.constant 18 : index
    %c0_82 = arith.constant 0 : index
    %110 = vector.load %arg14[%c18_81, %c0_82] : memref<328x128xf32, #tpu.memory_space<vmem>>, vector<270x128xf32>
    %111 = arith.maximumf %109, %110 : vector<270x128xf32>
    %c19_83 = arith.constant 19 : index
    %c0_84 = arith.constant 0 : index
    %112 = vector.load %arg14[%c19_83, %c0_84] : memref<328x128xf32, #tpu.memory_space<vmem>>, vector<270x128xf32>
    %113 = arith.maximumf %111, %112 : vector<270x128xf32>
    %c20_85 = arith.constant 20 : index
    %c0_86 = arith.constant 0 : index
    %114 = vector.load %arg14[%c20_85, %c0_86] : memref<328x128xf32, #tpu.memory_space<vmem>>, vector<270x128xf32>
    %115 = arith.maximumf %113, %114 : vector<270x128xf32>
    %c36_87 = arith.constant 36 : index
    %c0_88 = arith.constant 0 : index
    %116 = vector.load %arg14[%c36_87, %c0_88] : memref<328x128xf32, #tpu.memory_space<vmem>>, vector<270x128xf32>
    %117 = arith.maximumf %115, %116 : vector<270x128xf32>
    %c37_89 = arith.constant 37 : index
    %c0_90 = arith.constant 0 : index
    %118 = vector.load %arg14[%c37_89, %c0_90] : memref<328x128xf32, #tpu.memory_space<vmem>>, vector<270x128xf32>
    %119 = arith.maximumf %117, %118 : vector<270x128xf32>
    %c38_91 = arith.constant 38 : index
    %c0_92 = arith.constant 0 : index
    %120 = vector.load %arg14[%c38_91, %c0_92] : memref<328x128xf32, #tpu.memory_space<vmem>>, vector<270x128xf32>
    %121 = arith.maximumf %119, %120 : vector<270x128xf32>
    %c0_93 = arith.constant 0 : index
    %c0_94 = arith.constant 0 : index
    %122 = vector.load %arg11[%c0_93, %c0_94] : memref<64x270xf32, #tpu.memory_space<vmem>>, vector<64x270xf32>
    %cst_95 = arith.constant dense<0.000000e+00> : vector<64x128xf32>
    %123 = tpu.matmul %122, %121, %cst_95 {dimension_numbers = #tpu.dot_dimension_numbers<[1], [0], [0], [1], [0, 0, 1, 1], [], []>} : vector<64x270xf32>, vector<270x128xf32>, vector<64x128xf32> -> vector<64x128xf32>
    %c0_96 = arith.constant 0 : index
    %c0_97 = arith.constant 0 : index
    %c0_98 = arith.constant 0 : index
    %124 = vector.load %arg12[%c0_96, %c0_97, %c0_98] : memref<1x64x128xf32, #tpu.memory_space<vmem>>, vector<1x64x128xf32>
    %125 = vector.shape_cast %124 : vector<1x64x128xf32> to vector<64x128xf32>
    %126 = vector.shape_cast %123 : vector<64x128xf32> to vector<1x64x128xf32>
    tpu.vector_store %arg12[%c0_96, %c0_97, %c0_98], %126 {strides = array<i32>} : memref<1x64x128xf32, #tpu.memory_space<vmem>>, vector<1x64x128xf32>,
    return
  }
  func.func @transform_0(%arg0: i32) -> (i32, i32, i32) {
    %c0_i32 = arith.constant 0 : i32
    %c0_i32_0 = arith.constant 0 : i32
    %c0_i32_1 = arith.constant 0 : i32
    return %arg0, %c0_i32, %c0_i32_0 : i32, i32, i32
  }
  func.func @transform_1(%arg0: i32) -> (i32, i32) {
    %c0_i32 = arith.constant 0 : i32
    %c0_i32_0 = arith.constant 0 : i32
    %c0_i32_1 = arith.constant 0 : i32
    return %c0_i32, %c0_i32_0 : i32, i32
  }
  func.func @transform_2(%arg0: i32) -> (i32, i32) {
    %c0_i32 = arith.constant 0 : i32
    %c0_i32_0 = arith.constant 0 : i32
    %c0_i32_1 = arith.constant 0 : i32
    return %c0_i32, %c0_i32_0 : i32, i32
  }
  func.func @transform_3(%arg0: i32) -> (i32, i32) {
    %c0_i32 = arith.constant 0 : i32
    %c0_i32_0 = arith.constant 0 : i32
    %c0_i32_1 = arith.constant 0 : i32
    return %c0_i32, %c0_i32_0 : i32, i32
  }
  func.func @transform_4(%arg0: i32) -> (i32, i32) {
    %c0_i32 = arith.constant 0 : i32
    %c0_i32_0 = arith.constant 0 : i32
    %c0_i32_1 = arith.constant 0 : i32
    return %c0_i32, %c0_i32_0 : i32, i32
  }
  func.func @transform_5(%arg0: i32) -> (i32, i32) {
    %c0_i32 = arith.constant 0 : i32
    %c0_i32_0 = arith.constant 0 : i32
    %c0_i32_1 = arith.constant 0 : i32
    return %c0_i32, %c0_i32_0 : i32, i32
  }
  func.func @transform_6(%arg0: i32) -> (i32, i32, i32) {
    %c0_i32 = arith.constant 0 : i32
    %c0_i32_0 = arith.constant 0 : i32
    %c0_i32_1 = arith.constant 0 : i32
    %c0_i32_2 = arith.constant 0 : i32
    return %c0_i32, %c0_i32_0, %c0_i32_1 : i32, i32, i32
  }
  func.func @transform_7(%arg0: i32) -> (i32, i32) {
    %c0_i32 = arith.constant 0 : i32
    %c0_i32_0 = arith.constant 0 : i32
    %c0_i32_1 = arith.constant 0 : i32
    return %c0_i32, %c0_i32_0 : i32, i32
  }
  func.func @transform_8(%arg0: i32) -> (i32, i32) {
    %c0_i32 = arith.constant 0 : i32
    %c0_i32_0 = arith.constant 0 : i32
    %c0_i32_1 = arith.constant 0 : i32
    return %c0_i32, %c0_i32_0 : i32, i32
  }
  func.func @transform_9(%arg0: i32) -> (i32, i32) {
    %c0_i32 = arith.constant 0 : i32
    %c0_i32_0 = arith.constant 0 : i32
    %c0_i32_1 = arith.constant 0 : i32
    return %c0_i32, %c0_i32_0 : i32, i32
  }
  func.func @transform_10(%arg0: i32) -> (i32, i32) {
    %c0_i32 = arith.constant 0 : i32
    %c0_i32_0 = arith.constant 0 : i32
    %c0_i32_1 = arith.constant 0 : i32
    return %c0_i32, %c0_i32_0 : i32, i32
  }
  func.func @transform_11(%arg0: i32) -> (i32, i32, i32) {
    %c0_i32 = arith.constant 0 : i32
    %c0_i32_0 = arith.constant 0 : i32
    %c0_i32_1 = arith.constant 0 : i32
    return %arg0, %c0_i32, %c0_i32_0 : i32, i32, i32
  }
}

</mosaic_0001>

<bundles_post_ra>
// kernel: resnet12_block_forward.1
= control target key start
LH: loop header
LB: loop body
LE: loop exit
PB: predicated region body
PF: predicated region fallthrough
CT: control target
= control target key end

     0   :  { %16 = vsyncpa [#allocation5], 0  ;;  %s8709_s0 = inlined_call_operand.vmem [shape: bf16[2,328,64], index: 0, kind: input, shape index: {}]   ;;  %s8710_s1 = inlined_call_operand.vmem [shape: f32[328,1], index: 1, kind: input, shape index: {}]   ;;  %s8711_s2 = inlined_call_operand.vmem [shape: bf16[64,128], index: 2, kind: input, shape index: {}]   ;;  %s8712_s3 = inlined_call_operand.vmem [shape: f32[1,128], index: 3, kind: input, shape index: {}]   ;;  %s8713_s4 = inlined_call_operand.vmem [shape: bf16[64,128], index: 4, kind: input, shape index: {}]   ;;  %s8714_s5 = inlined_call_operand.vmem [shape: f32[1,128], index: 5, kind: input, shape index: {}]   ;;  %s8715_s6 = inlined_call_operand.vmem [shape: bf16[9,128,128], index: 6, kind: input, shape index: {}]   ;;  %s8716_s7 = inlined_call_operand.vmem [shape: f32[1,128], index: 7, kind: input, shape index: {}]   ;;  %s8717_s8 = inlined_call_operand.vmem [shape: bf16[128,128], index: 8, kind: input, shape index: {}]   ;;  %s8718_s9 = inlined_call_operand.vmem [shape: f32[1,128], index: 9, kind: input, shape index: {}]   ;;  %s8719_s10 = inlined_call_operand.vmem [shape: f32[64,270], index: 10, kind: input, shape index: {}]   ;;  %s8720_s11 = inlined_call_operand.hbm [shape: f32[2,64,128], index: 11, kind: output, shape index: {}]  }
   0x1   :  { %18 = vsyncpa [#allocation5 + $0x1], 0  ;;  %s6355_s17 = smov 0   ;;  %s6357_s18 = smov 0  }
   0x2   :  { %s6359_s19 = smov 0   ;;  %s6361_s20 = smov 0  }
   0x3 LB: > { %8729 = sst [smem:[#allocation7_spill]] %s6285_s19  ;;  %s6376_s21 = sadd.s32 4294967295, %s6289_s20   ;;  %s6289_s20 = sphi %s6361_s20, %s8963_s20   ;;  %s6285_s19 = sphi %s6359_s19, %s8960_s19   ;;  %s6281_s18 = sphi %s6357_s18, %s8962_s18   ;;  %s6277_s17 = sphi %s6355_s17, %s8961_s17  }
   0x4   : > { %s5436_s22 = sadd.s32 4294967294, %s6289_s20   ;;  %s6380_s23 = sadd.s32 1, %s6289_s20  }
   0x5   : > { %s267_s24 = sadd.s32 1, %s6285_s19  ;;  %s264_s25 = ssub.s32 %s6289_s20, %s6380_s23 }
   0x6   : > { %p277_p0 = scmp.ne.s32.totalorder %s6285_s19, %s6281_s18  ;;  %p265_p1 = scmp.eq.s32.totalorder %s264_s25, 0 }
   0x7   : > { %p278_p2 = scmp.eq.s32.totalorder %s6376_s21, 1  ;;  %p283_p3 = scmp.ne.s32.totalorder %s6281_s18, %s6277_s17 }
   0x8   : > { %p284_p4 = scmp.eq.s32.totalorder %s5436_s22, 1  ;;  %p5439_p7 = scmp.ge.s32.totalorder %s6289_s20, 1 }
   0x9   : > { %s6391_s26 = scalar_select %p265_p1, %s6285_s19, %s267_s24  }
   0xa   : > { %p6393_p5 = por %p278_p2, %p277_p0  ;;  %p6397_p6 = por %p284_p4, %p283_p3 }
   0xb   : > { %8730 = sst [smem:[#allocation8_spill]] %s6391_s26  ;;  %p340_p8 = scmp.lt.s32.totalorder %s6289_s20, 3 }
   0xd   : > { %p341_p9 = pnand %p5439_p7, %p340_p8 }
   0xf   : > { %344 = sbr.rel (%p341_p9) target bundleno = 1611 (0x64b), region = 64 }
  0x14   : > { %v6406_v0 = vld [vmem:[%s8710_s1 + $0x20] sm:$0xff]  ;;  %v6411_v1 = vld [vmem:[%s8710_s1 + $0x10] sm:$0xff]  ;;  %p380_p10 = scmp.lt.s32.totalorder %s6376_s21, 1  ;;  %v6291_v3 = vmov 0   ;;  %v6081_v4 = vld [vmem:[%s8711_s2 + $0x18] sm:$0xff]  ;;  %vm607_vm0 = vcmask 523264  }
  0x15   : > { %v427_v2 = vld [vmem:[%s8710_s1] sm:$0xff]  ;;  %6217 = vset.pattern.permute.xlu2 %v6291_v3  ;;  %6216 = vset.pattern.permute.xlu1 %v6291_v3  ;;  %v6080_v5 = vld [vmem:[%s8711_s2 + $0x10] sm:$0xff]  ;;  %v6432_v6 = vld [vmem:[%s8710_s1 + $0x28] sm:$0xff]  ;;  %s6166_s24 = sshll.u32 %s6376_s21, 6 }
  0x16   : > { %6215 = vset.pattern.permute.xlu0 %v6291_v3  ;;  %1074 = vperm.xlu2 %6217, %v6406_v0   ;;  %s381_s29 = scalar_select %p380_p10, %s6376_s21, 1  ;;  %v6437_v7 = vld [vmem:[%s8710_s1 + $0x18] sm:$0xff]  ;;  %v428_v8 = vld [vmem:[%s8710_s1 + $0x8] sm:$0xff]  ;;  %v6078_v10 = vld [vmem:[%s8711_s2] sm:$0xff] }
  0x17   : > { %1064 = vperm.xlu1 %6216, %v6411_v1   ;;  %1054 = vperm.xlu0 %6215, %v427_v2   ;;  %v6079_v9 = vld [vmem:[%s8711_s2 + $0x8] sm:$0xff]  ;;  %v6085_v11 = vld [vmem:[%s8713_s4 + $0x18] sm:$0xff]  ;;  %v6461_v12 = vld [vmem:[%s8710_s1 + $0x40] sm:$0xff]  ;;  %s5370_s12 = scalar_lea.hbm %s8720_s11, %s6166_s24  ;;  %s6247_s24 = scalar_lea.hbm %s8720_s11, 128 }
  0x18   : > { %675 = vmatpush.bf16.msra.mxu0 %v6081_v4  ;;  %6167 = vmatpush.bf16.msra.mxu1 %v6081_v4  ;;  %s6171_s25 = smul.u32 164, %s381_s29  ;;  %v6466_v13 = vld [vmem:[%s8710_s1 + $0x38] sm:$0xff]  ;;  %v6471_v14 = vld [vmem:[%s8710_s1 + $0x30] sm:$0xff]  ;;  %v6083_v18 = vld [vmem:[%s8713_s4 + $0x8] sm:$0xff]  ;;  %s5373_s19 = sshll.u32 %s5370_s12, 4  ;;  %s5374_s19 = int_to_ptr.hbm [resolvable:$true] %s5373_s19 }
  0x19   : > { %v6084_v17 = vld [vmem:[%s8713_s4 + $0x10] sm:$0xff]  ;;  %v6489_v19 = vld [vmem:[%s8710_s1 + $0x58] sm:$0xff]  ;;  %v6499_v21 = vld [vmem:[%s8710_s1 + $0x48] sm:$0xff]  ;;  %s6241_s21 = sshra.s32 %s5374_s19, 4  ;;  %s6242_s21 = int_to_ptr.hbm [resolvable:$true] %s6241_s21 }
  0x1a   : > { %s6453_s15 = scalar_lea.vmem %s8709_s0, %s6171_s25  ;;  %v6494_v20 = vld [vmem:[%s8710_s1 + $0x50] sm:$0xff]  ;;  %v6082_v23 = vld [vmem:[%s8713_s4] sm:$0xff]  ;;  %v6516_v26 = vld [vmem:[%s8710_s1 + $0x68] sm:$0xff]  ;;  %vm4226_vm15 = vcmp.gt.f32.partialorder %v6489_v19, 0.0  ;;  %s6243_s14 = scalar_lea.hbm %s6242_s21, 64 }
  0x1b   : > { %v6058_v15 = vld [vmem:[%s6453_s15] sm:$0xff]  ;;  %v6077_v16 = vld [vmem:[%s6453_s15 + $0x98] sm:$0xff]  ;;  %v6511_v25 = vld [vmem:[%s8710_s1 + $0x70] sm:$0xff]  ;;  %vm4228_vm5 = vcmp.gt.f32.partialorder %v6516_v26, 0.0  ;;  %p6244_p11 = scmp.ne.s32.totalorder %s6242_s21, %s6243_s14  ;;  %p6248_p0 = scmp.lt.s32.totalorder %s6242_s21, %s8720_s11 }
  0x1c   : > { %676 = vmatpush.bf16.msra.mxu0 %v6080_v5  ;;  %6168 = vmatpush.bf16.msra.mxu1 %v6080_v5  ;;  %v426_v22 = vld [vmem:[%s6453_s15 + $0xa0] sm:$0xf]  ;;  %v6059_v28 = vld [vmem:[%s6453_s15 + $0x8] sm:$0xff]  ;;  %v442_v32 = vld [vmem:[%s8710_s1 + $0x78] sm:$0xff]  ;;  %vm4229_vm7 = vcmp.gt.f32.partialorder %v6511_v25, 0.0  ;;  %v4265_v4 = vsel %vm4228_vm5, 1, %v6291_v3  ;;  %p6249_p1 = scmp.lt.s32.totalorder %s6247_s24, %s6243_s14 }
  0x1d   : > { %v561_v24 = vunpack.c.l.b16 %v426_v22  ;;  %v6521_v27 = vld [vmem:[%s8710_s1 + $0x60] sm:$0xff]  ;;  %v6535_v30 = vld [vmem:[%s8710_s1 + $0x88] sm:$0xff]  ;;  %v6555_v34 = vld [vmem:[%s8710_s1 + $0x98] sm:$0xff]  ;;  %vm4230_vm1 = vcmp.gt.f32.partialorder %v442_v32, 0.0  ;;  %p6245_p12 = pnand %p6244_p11, %p6393_p5 }
  0x1e   : > { %1079 = vperm.xlu2 %6217, %v6432_v6   ;;  %v6540_v31 = vld [vmem:[%s8710_s1 + $0x80] sm:$0xff]  ;;  %v6560_v35 = vld [vmem:[%s8710_s1 + $0x90] sm:$0xff]  ;;  %v6571_v37 = vld [vmem:[%s8710_s1 + $0xb8] sm:$0xff]  ;;  %v4267_v58 = vsel %vm4230_vm1, 1, %v6291_v3  ;;  %vm4232_vm10 = vcmp.gt.f32.partialorder %v6535_v30, 0.0  ;;  %vm4227_vm11 = vcmp.gt.f32.partialorder %v6521_v27, 0.0  ;;  %p6250_p2 = por %p6249_p1, %p6248_p0 }
  0x1f   : > { %1069 = vperm.xlu1 %6216, %v6437_v7   ;;  %1059 = vperm.xlu0 %6215, %v428_v8   ;;  %v6524_v29 = vpack.c.b16 %v561_v24, %v561_v24  ;;  %v6550_v33 = vld [vmem:[%s8710_s1 + $0xa0] sm:$0xff]  ;;  %v6060_v36 = vld [vmem:[%s6453_s15 + $0x10] sm:$0xff]  ;;  %v6581_v39 = vld [vmem:[%s8710_s1 + $0xa8] sm:$0xff]  ;;  %vm4231_vm4 = vcmp.gt.f32.partialorder %v6540_v31, 0.0  ;;  %v4266_v8 = vsel %vm4229_vm7, 1, %v6291_v3  ;;  %vm4233_vm9 = vcmp.gt.f32.partialorder %v6560_v35, 0.0  ;;  %p6246_p13 = pneg %p6245_p12 }
  0x20   : > { %677 = vmatpush.bf16.msra.mxu0 %v6079_v9  ;;  %6169 = vmatpush.bf16.msra.mxu1 %v6079_v9  ;;  %v6576_v38 = vld [vmem:[%s8710_s1 + $0xb0] sm:$0xff]  ;;  %v6594_v41 = vld [vmem:[%s8710_s1 + $0xc8] sm:$0xff]  ;;  %v6599_v42 = vld [vmem:[%s8710_s1 + $0xc0] sm:$0xff]  ;;  %v4268_v63 = vsel %vm4231_vm4, 1, %v6291_v3  ;;  %vm4225_vm4 = vcmp.gt.f32.partialorder %v6494_v20, 0.0 }
  0x21   : > { %v6589_v40 = vld [vmem:[%s8710_s1 + $0xd0] sm:$0xff]  ;;  %v6061_v43 = vld [vmem:[%s6453_s15 + $0x18] sm:$0xff]  ;;  %v456_v44 = vld [vmem:[%s8710_s1 + $0xe8] sm:$0xff]  ;;  %p6251_p3 = pnand %p6250_p2, %p6246_p13 }
  0x22   : > { %v6613_v45 = vld [vmem:[%s8710_s1 + $0xe0] sm:$0xff]  ;;  %v6618_v46 = vld [vmem:[%s8710_s1 + $0xd8] sm:$0xff]  ;;  %v457_v49 = vld [vmem:[%s8710_s1 + $0xf0] sm:$0xff]  ;;  %vm4244_vm8 = vcmp.gt.f32.partialorder %v456_v44, 0.0  ;;  %vm4241_vm7 = vcmp.gt.f32.partialorder %v6589_v40, 0.0 }
  0x23   : > { %v459_v47 = vld [vmem:[%s8710_s1 + $0x100] sm:$0xff]  ;;  %v458_v48 = vld [vmem:[%s8710_s1 + $0xf8] sm:$0xff]  ;;  %v461_v52 = vld [vmem:[%s8710_s1 + $0x110] sm:$0xff]  ;;  %vm4245_vm6 = vcmp.gt.f32.partialorder %v457_v49, 0.0  ;;  %v4281_v9 = vsel %vm4244_vm8, 1, %v6291_v3  ;;  %vm4242_vm14 = vcmp.gt.f32.partialorder %v6618_v46, 0.0 }
  0x24   : > { %678 = vmatpush.bf16.msra.mxu0 %v6078_v10  ;;  %6170 = vmatpush.bf16.msra.mxu1 %v6078_v10  ;;  %v6062_v50 = vld [vmem:[%s6453_s15 + $0x20] sm:$0xff]  ;;  %v6637_v51 = vld [vmem:[%s8710_s1 + $0x118] sm:$0xff]  ;;  %v460_v53 = vld [vmem:[%s8710_s1 + $0x108] sm:$0xff]  ;;  %vm4247_vm2 = vcmp.gt.f32.partialorder %v459_v47, 0.0  ;;  %vm4246_vm3 = vcmp.gt.f32.partialorder %v458_v48, 0.0  ;;  %v4282_v5 = vsel %vm4245_vm6, 1, %v6291_v3 }
  0x25   : > { %v6649_v54 = vld [vmem:[%s8710_s1 + $0x130] sm:$0xff]  ;;  %v6654_v55 = vld [vmem:[%s8710_s1 + $0x128] sm:$0xff]  ;;  %v6659_v56 = vld [vmem:[%s8710_s1 + $0x120] sm:$0xff]  ;;  %v4284_v61 = vsel %vm4247_vm2, 1, %v6291_v3  ;;  %v4283_v62 = vsel %vm4246_vm3, 1, %v6291_v3  ;;  %v4270_v10 = vsel %vm4233_vm9, 1, %v6291_v3 }
  0x26   : > { %1094 = vperm.xlu2 %6217, %v6461_v12   ;;  %v6063_v57 = vld [vmem:[%s6453_s15 + $0x28] sm:$0xff]  ;;  %v467_v59 = vld [vmem:[%s8710_s1 + $0x140] sm:$0xff]  ;;  %v466_v60 = vld [vmem:[%s8710_s1 + $0x138] sm:$0xff]  ;;  %vm4249_vm12 = vcmp.gt.f32.partialorder %v461_v52, 0.0  ;;  %vm4248_vm13 = vcmp.gt.f32.partialorder %v460_v53, 0.0  ;;  %vm4243_vm1 = vcmp.gt.f32.partialorder %v6613_v45, 0.0 }
  0x27   : > { %1089 = vperm.xlu1 %6216, %v6466_v13   ;;  %1084 = vperm.xlu0 %6215, %v6471_v14   ;;  %v6064_v2 = vld [vmem:[%s6453_s15 + $0x30] sm:$0xff]  ;;  %v4286_v22 = vsel %vm4249_vm12, 1, %v6291_v3  ;;  %v6091_v24 = vld [vmem:[%s8715_s6 + $0x28] sm:$0xff]  ;;  %vm4235_vm2 = vcmp.gt.f32.partialorder %v6550_v33, 0.0  ;;  %vm4234_vm3 = vcmp.gt.f32.partialorder %v6555_v34, 0.0  ;;  %vm4251_vm5 = vcmp.gt.f32.partialorder %v6659_v56, 0.0 }
  0x28   : > { %820 = vmatpush.bf16.msrb.mxu1 %v6085_v11  ;;  %5538 = vmatmul.msk.bf16.vlgmr.msra.gmra.mxu0 %vm607_vm0, %v6058_v15  ;;  %v4269_v11 = vsel %vm4232_vm10, 1, %v6291_v3  ;;  %vm4250_vm6 = vcmp.gt.f32.partialorder %v6637_v51, 0.0  ;;  %vm4223_vm8 = vcmp.gt.f32.partialorder %v6461_v12, 0.0  ;;  %vm4240_vm9 = vcmp.gt.f32.partialorder %v6594_v41, 0.0  ;;  %v6095_v12 = vld [vmem:[%s8715_s6 + $0x48] sm:$0xff] }
  0x29   : > { %5557 = vmatmul.msk.bf16.vlgmr.msra.gmra.mxu1 %vm607_vm0, %v6077_v16  ;;  %v6093_v16 = vld [vmem:[%s8715_s6 + $0x38] sm:$0xff]  ;;  %vm4224_vm10 = vcmp.gt.f32.partialorder %v6499_v21, 0.0  ;;  %vm4222_vm12 = vcmp.gt.f32.partialorder %v6466_v13, 0.0  ;;  %v6094_v13 = vld [vmem:[%s8715_s6 + $0x40] sm:$0xff] }
  0x2a   : > { %1675 = vmatpush.bf16.msra.mxu3 %v6093_v16 }
  0x2c   : > { %821 = vmatpush.bf16.msrb.mxu1 %v6084_v17  ;;  %v6092_v17 = vld [vmem:[%s8715_s6 + $0x30] sm:$0xff] }
  0x2e   : > { %1109 = vperm.xlu2 %6217, %v6489_v19   ;;  %1676 = vmatpush.bf16.msra.mxu3 %v6092_v17  ;;  %v6101_v19 = vld [vmem:[%s8715_s6 + $0x78] sm:$0xff] }
  0x2f   : > { %1104 = vperm.xlu1 %6216, %v6494_v20   ;;  %1099 = vperm.xlu0 %6215, %v6499_v21   ;;  %v6099_v20 = vld [vmem:[%s8715_s6 + $0x68] sm:$0xff]  ;;  %v6795_v21 = vld [vmem:[%s8714_s5] ss:$0 sm:$0xff] }
  0x30   : > { %822 = vmatpush.bf16.msrb.mxu1 %v6083_v18  ;;  %v4264_v18 = vsel %vm4227_vm11, 1, %v6291_v3  ;;  %1528 = vmatpush.bf16.msra.mxu2 %v6101_v19  ;;  %vm4238_vm11 = vcmp.gt.f32.partialorder %v6571_v37, 0.0 }
  0x32   : > { %1677 = vmatpush.bf16.msra.mxu3 %v6091_v24 }
  0x34   : > { %823 = vmatpush.bf16.msrb.mxu1 %v6082_v23  ;;  %v4285_v23 = vsel %vm4248_vm13, 1, %v6291_v3  ;;  %vm4239_vm13 = vcmp.gt.f32.partialorder %v6599_v42, 0.0 }
  0x36   : > { %1124 = vperm.xlu2 %6217, %v6511_v25   ;;  %v6090_v25 = vld [vmem:[%s8715_s6 + $0x20] sm:$0xff] }
  0x37   : > { %1119 = vperm.xlu1 %6216, %v6516_v26   ;;  %1114 = vperm.xlu0 %6215, %v6521_v27   ;;  %v4279_v26 = vsel %vm4242_vm14, 1, %v6291_v3  ;;  %v4263_v27 = vsel %vm4226_vm15, 1, %v6291_v3  ;;  %vm4220_vm15 = vcmp.gt.f32.partialorder %v6432_v6, 0.0 }
  0x38   : > { %5539 = vmatmul.msk.bf16.gmra.mxu0 %vm607_vm0, %v6059_v28  ;;  %1678 = vmatpush.bf16.msra.mxu3 %v6090_v25  ;;  %v4257_v16 = vsel %vm4220_vm15, 1, %v6291_v3 }
  0x39   : > { %5558 = vmatmul.msk.bf16.gmra.mxu1 %vm607_vm0, %v6524_v29 }
  0x3e   : > { %1139 = vperm.xlu2 %6217, %v6535_v30   ;;  %v6720_v30 = vld [vmem:[%s6453_s15 + $0x40] sm:$0xff] }
  0x3f   : > { %1134 = vperm.xlu1 %6216, %v6540_v31   ;;  %1129 = vperm.xlu0 %6215, %v442_v32  }
  0x46   : > { %1154 = vperm.xlu2 %6217, %v6550_v33   ;;  %v4262_v33 = vsel %vm4225_vm4, 1, %v6291_v3  ;;  %vm4218_vm4 = vcmp.gt.f32.partialorder %v6437_v7, 0.0 }
  0x47   : > { %1149 = vperm.xlu1 %6216, %v6555_v34   ;;  %1144 = vperm.xlu0 %6215, %v6560_v35   ;;  %v6089_v35 = vld [vmem:[%s8715_s6 + $0x18] sm:$0xff] }
  0x48   : > { %5540 = vmatmul.msk.bf16.gmra.mxu0 %vm607_vm0, %v6060_v36  ;;  %1679 = vmatpush.bf16.msra.mxu3 %v6089_v35 }
  0x49   : > { %5575 = vmatmul.msk.bf16.vlgmr.msrb.gmra.mxu1 %vm607_vm0, %v6058_v15  ;;  %v6692_v15 = vld [vmem:[%s6453_s15 + $0x38] sm:$0xff] }
  0x4e   : > { %1169 = vperm.xlu2 %6217, %v6571_v37   ;;  %v4276_v37 = vsel %vm4239_vm13, 1, %v6291_v3 }
  0x4f   : > { %1164 = vperm.xlu1 %6216, %v6576_v38   ;;  %1159 = vperm.xlu0 %6215, %v6581_v39  }
  0x56   : > { %1184 = vperm.xlu2 %6217, %v6589_v40  }
  0x57   : > { %1179 = vperm.xlu1 %6216, %v6594_v41   ;;  %1174 = vperm.xlu0 %6215, %v6599_v42   ;;  %v4275_v41 = vsel %vm4238_vm11, 1, %v6291_v3 }
  0x58   : > { %5541 = vmatmul.msk.bf16.gmra.mxu0 %vm607_vm0, %v6061_v43 }
  0x59   : > { %5576 = vmatmul.msk.bf16.gmra.mxu1 %vm607_vm0, %v6059_v28  ;;  %v4280_v28 = vsel %vm4243_vm1, 1, %v6291_v3  ;;  %vm4237_vm1 = vcmp.gt.f32.partialorder %v6576_v38, 0.0 }
  0x5a   : > { %v4274_v17 = vsel %vm4237_vm1, 1, %v6291_v3 }
  0x5e   : > { %1199 = vperm.xlu2 %6217, %v456_v44   ;;  %v4272_v44 = vsel %vm4235_vm2, 1, %v6291_v3  ;;  %vm4221_vm2 = vcmp.gt.f32.partialorder %v6471_v14, 0.0 }
  0x5f   : > { %1194 = vperm.xlu1 %6216, %v6613_v45   ;;  %1189 = vperm.xlu0 %6215, %v6618_v46   ;;  %v4271_v45 = vsel %vm4234_vm3, 1, %v6291_v3 }
  0x66   : > { %1214 = vperm.xlu2 %6217, %v459_v47   ;;  %v6087_v47 = vld [vmem:[%s8715_s6 + $0x8] sm:$0xff] }
  0x67   : > { %1209 = vperm.xlu1 %6216, %v458_v48   ;;  %1204 = vperm.xlu0 %6215, %v457_v49   ;;  %v6098_v48 = vld [vmem:[%s8715_s6 + $0x60] sm:$0xff] }
  0x68   : > { %5542 = vmatmul.msk.bf16.gmra.mxu0 %vm607_vm0, %v6062_v50  ;;  %v6086_v49 = vld [vmem:[%s8715_s6] sm:$0xff] }
  0x69   : > { %5577 = vmatmul.msk.bf16.gmra.mxu1 %vm607_vm0, %v6060_v36  ;;  %v6100_v36 = vld [vmem:[%s8715_s6 + $0x70] sm:$0xff] }
  0x6a   : > { %1529 = vmatpush.bf16.msra.mxu2 %v6100_v36 }
  0x6e   : > { %1229 = vperm.xlu2 %6217, %v6637_v51   ;;  %1530 = vmatpush.bf16.msra.mxu2 %v6099_v20 }
  0x6f   : > { %1224 = vperm.xlu1 %6216, %v461_v52   ;;  %1219 = vperm.xlu0 %6215, %v460_v53   ;;  %v4287_v52 = vsel %vm4250_vm6, 1, %v6291_v3  ;;  %v4278_v53 = vsel %vm4241_vm7, 1, %v6291_v3  ;;  %vm4236_vm6 = vcmp.gt.f32.partialorder %v6581_v39, 0.0 }
  0x72   : > { %1531 = vmatpush.bf16.msra.mxu2 %v6098_v48 }
  0x76   : > { %1244 = vperm.xlu2 %6217, %v6649_v54  }
  0x77   : > { %1239 = vperm.xlu1 %6216, %v6654_v55   ;;  %1234 = vperm.xlu0 %6215, %v6659_v56   ;;  %v6764_v56 = vld [vmem:[%s6453_s15 + $0x48] sm:$0xff] }
  0x78   : > { %5543 = vmatmul.msk.bf16.gmra.mxu0 %vm607_vm0, %v6063_v57 }
  0x79   : > { %5578 = vmatmul.msk.bf16.gmra.mxu1 %vm607_vm0, %v6061_v43  ;;  %v6088_v43 = vld [vmem:[%s8715_s6 + $0x10] sm:$0xff] }
  0x7a   : > { %1680 = vmatpush.bf16.msra.mxu3 %v6088_v43 }
  0x7e   : > { %4331 = vperm.xlu2 %6217, %v4267_v58   ;;  %1681 = vmatpush.bf16.msra.mxu3 %v6087_v47  ;;  %v6096_v58 = vld [vmem:[%s8715_s6 + $0x50] sm:$0xff] }
  0x7f   : > { %1254 = vperm.xlu1 %6216, %v467_v59   ;;  %1249 = vperm.xlu0 %6215, %v466_v60   ;;  %v4260_v59 = vsel %vm4223_vm8, 1, %v6291_v3  ;;  %v4277_v60 = vsel %vm4240_vm9, 1, %v6291_v3  ;;  %vm4253_vm8 = vcmp.gt.f32.partialorder %v6649_v54, 0.0  ;;  %vm4217_vm9 = vcmp.gt.f32.partialorder %v6411_v1, 0.0 }
  0x82   : > { %1682 = vmatpush.bf16.msra.mxu3 %v6086_v49 }
  0x86   : > { %4382 = vperm.xlu2 %6217, %v4284_v61   ;;  %v4261_v61 = vsel %vm4224_vm10, 1, %v6291_v3  ;;  %vm4252_vm10 = vcmp.gt.f32.partialorder %v6654_v55, 0.0 }
  0x87   : > { %4379 = vperm.xlu1 %6216, %v4283_v62   ;;  %4334 = vperm.xlu0 %6215, %v4268_v63  }
  0x88   : > { %5544 = vmatmul.msk.bf16.gmra.mxu0 %vm607_vm0, %v6064_v2 }
  0x89   : > { %5579 = vmatmul.msk.bf16.gmra.mxu1 %vm607_vm0, %v6062_v50  ;;  %v4288_v50 = vsel %vm4251_vm5, 1, %v6291_v3  ;;  %vm4219_vm5 = vcmp.gt.f32.partialorder %v6406_v0, 0.0  ;;  %v1065_v39 = vpop.permute.xlu1 %1064 }
  0x8e   : > { %4325 = vperm.xlu2 %6217, %v4265_v4   ;;  %v6801_v4 = vld [vmem:[%s6453_s15 + $0x50] sm:$0xff] }
  0x8f   : > { %4376 = vperm.xlu1 %6216, %v4282_v5   ;;  %4328 = vperm.xlu0 %6215, %v4266_v8  }
  0x91   : > { %v1070_v55 = vpop.permute.xlu1 %1069 }
  0x96   : > { %4373 = vperm.xlu2 %6217, %v4281_v9   ;;  %v1055_v9 = vpop.permute.xlu0 %1054 }
  0x97   : > { %4340 = vperm.xlu1 %6216, %v4270_v10   ;;  %4337 = vperm.xlu0 %6215, %v4269_v11  }
  0x98   : > { %5545 = vmatmul.msk.bf16.gmra.mxu0 %vm607_vm0, %v6692_v15 }
  0x99   : > { %5580 = vmatmul.msk.bf16.gmra.mxu1 %vm607_vm0, %v6063_v57  ;;  %v6097_v57 = vld [vmem:[%s8715_s6 + $0x58] sm:$0xff] }
  0x9a   : > { %1532 = vmatpush.bf16.msra.mxu2 %v6097_v57  ;;  %v1075_v57 = vpop.permute.xlu2 %1074 }
  0x9e   : > { %4322 = vperm.xlu2 %6217, %v4264_v18   ;;  %1533 = vmatpush.bf16.msra.mxu2 %v6096_v58  ;;  %v4258_v18 = vsel %vm4221_vm2, 1, %v6291_v3  ;;  %v1060_v14 = vpop.permute.xlu0 %1059 }
  0x9f   : > { %4388 = vperm.xlu1 %6216, %v4286_v22   ;;  %4385 = vperm.xlu0 %6215, %v4285_v23  }
  0xa2   : > { %1534 = vmatpush.bf16.msra.mxu2 %v6095_v12 }
  0xa5   : > { %v680_v31 = vpop.f32.mrf.mxu0 }
  0xa6   : > { %v6722_v32 = vpop.f32.mrf.mxu1  ;;  %4367 = vperm.xlu2 %6217, %v4279_v26   ;;  %1535 = vmatpush.bf16.msra.mxu2 %v6094_v13  ;;  %v4255_v26 = vsel %vm4218_vm4, 1, %v6291_v3 }
  0xa7   : > { %4319 = vperm.xlu1 %6216, %v4263_v27   ;;  %4370 = vperm.xlu0 %6215, %v4280_v28   ;;  %v4256_v27 = vsel %vm4219_vm5, 1, %v6291_v3  ;;  %v4273_v28 = vsel %vm4236_vm6, 1, %v6291_v3 }
  0xa8   : > { %5546 = vmatmul.msk.bf16.gmra.mxu0 %vm607_vm0, %v6720_v30 }
  0xa9   : > { %5581 = vmatmul.msk.bf16.gmra.mxu1 %vm607_vm0, %v6064_v2  ;;  %v4259_v2 = vsel %vm4222_vm12, 1, %v6291_v3 }
  0xad   : > { %v681_v46 = vpop.f32.mrf.mxu0 }
  0xae   : > { %v775_v34 = vpop.f32.mrf.mxu1  ;;  %4346 = vperm.xlu2 %6217, %v4272_v44   ;;  %v4290_v44 = vsel %vm4253_vm8, 1, %v6291_v3 }
  0xaf   : > { %4343 = vperm.xlu1 %6216, %v4271_v45   ;;  %4316 = vperm.xlu0 %6215, %v4262_v33   ;;  %v4289_v45 = vsel %vm4252_vm10, 1, %v6291_v3  ;;  %v4254_v33 = vsel %vm4217_vm9, 1, %v6291_v3 }
  0xb5   : > { %v6766_v51 = vpop.f32.mrf.mxu0 }
  0xb6   : > { %v777_v40 = vpop.f32.mrf.mxu1  ;;  %4394 = vperm.xlu2 %6217, %v4288_v50   ;;  %v6848_v50 = vld [vmem:[%s6453_s15 + $0x60] sm:$0xff] }
  0xb7   : > { %4391 = vperm.xlu1 %6216, %v4287_v52   ;;  %4364 = vperm.xlu0 %6215, %v4278_v53  }
  0xb8   : > { %5547 = vmatmul.msk.bf16.gmra.mxu0 %vm607_vm0, %v6764_v56 }
  0xb9   : > { %5582 = vmatmul.msk.bf16.gmra.mxu1 %vm607_vm0, %v6692_v15 }
  0xbd   : > { %v6784_v62 = vpop.f32.mrf.mxu0 }
  0xbe   : > { %v778_v63 = vpop.f32.mrf.mxu1  ;;  %4310 = vperm.xlu2 %6217, %v4260_v59  }
  0xbf   : > { %4361 = vperm.xlu1 %6216, %v4277_v60   ;;  %4313 = vperm.xlu0 %6215, %v4261_v61  }
  0xc5   : > { %v6806_v5 = vpop.f32.mrf.mxu0 }
  0xc6   : > { %v825_v42 = vpop.f32.mrf.mxu1  ;;  %4355 = vperm.xlu2 %6217, %v4275_v41  }
  0xc7   : > { %v826_v8 = vadd.f32 %v6795_v21, %v825_v42  ;;  %4307 = vperm.xlu1 %6216, %v4259_v2   ;;  %4358 = vperm.xlu0 %6215, %v4276_v37   ;;  %v1080_v2 = vpop.permute.xlu2 %1079 }
  0xc8   : > { %5548 = vmatmul.msk.bf16.gmra.mxu0 %vm607_vm0, %v6801_v4 }
  0xc9   : > { %vm929_vm14 = vcmp.ge.f32.partialorder %v826_v8, 0.0  ;;  %v970_v10 = vmul.f32 0.2, %v826_v8  ;;  %5583 = vmatmul.msk.bf16.gmra.mxu1 %vm607_vm0, %v6720_v30  ;;  %v6829_v30 = vld [vmem:[%s6453_s15 + $0x58] sm:$0xff] }
  0xcb   : > { %v1011_v11 = vsel %vm929_vm14, %v826_v8, %v970_v10 }
  0xcc   : > { %v1257_v15 = vmul.f32 %v1055_v9, %v1011_v11  ;;  %v6861_v9 = vld [vmem:[%s6453_s15 + $0x68] sm:$0xff] }
  0xcd   : > { %v6819_v22 = vpop.f32.mrf.mxu0 }
  0xce   : > { %1298 = vst [vmem:[#allocation2] sm:$0xff] %v1257_v15  ;;  %v827_v23 = vpop.f32.mrf.mxu1  ;;  %4301 = vperm.xlu2 %6217, %v4257_v16  }
  0xcf   : > { %v828_v24 = vadd.f32 %v6795_v21, %v827_v23  ;;  %4352 = vperm.xlu1 %6216, %v4274_v17   ;;  %4304 = vperm.xlu0 %6215, %v4258_v18   ;;  %v1085_v18 = vpop.permute.xlu0 %1084 }
  0xd1   : > { %vm930_vm3 = vcmp.ge.f32.partialorder %v828_v24, 0.0  ;;  %v971_v6 = vmul.f32 0.2, %v828_v24 }
  0xd3   : > { %v1012_v38 = vsel %vm930_vm3, %v828_v24, %v971_v6 }
  0xd4   : > { %v1258_v25 = vmul.f32 %v1060_v14, %v1012_v38 }
  0xd5   : > { %v6831_v31 = vpop.f32.mrf.mxu0 }
  0xd6   : > { %1299 = vst [vmem:[#allocation2 + $0x8] sm:$0xff] %v1258_v25  ;;  %v830_v19 = vpop.f32.mrf.mxu1  ;;  %v1375_v7 = vpack.c.bf16 %v1258_v25, %v1257_v15  ;;  %4295 = vperm.xlu2 %6217, %v4255_v26   ;;  %v1090_v26 = vpop.permute.xlu1 %1089 }
  0xd7   : > { %v831_v0 = vadd.f32 %v6795_v21, %v830_v19  ;;  %4298 = vperm.xlu1 %6216, %v4256_v27   ;;  %4349 = vperm.xlu0 %6215, %v4273_v28  }
  0xd8   : > { %5549 = vmatmul.msk.bf16.gmra.mxu0 %vm607_vm0, %v6829_v30  ;;  %1683 = vmatmul.bf16.vlgmr.msra.gmra.mxu3 %v1375_v7 }
  0xd9   : > { %vm931_vm7 = vcmp.ge.f32.partialorder %v831_v0, 0.0  ;;  %v972_v35 = vmul.f32 0.2, %v831_v0  ;;  %5584 = vmatmul.msk.bf16.gmra.mxu1 %vm607_vm0, %v6764_v56 }
  0xdb   : > { %v1013_v36 = vsel %vm931_vm7, %v831_v0, %v972_v35  ;;  %v6874_v0 = vld [vmem:[%s6453_s15 + $0x70] sm:$0xff] }
  0xdc   : > { %v1259_v43 = vmul.f32 %v1065_v39, %v1013_v36 }
  0xdd   : > { %v6844_v46 = vpop.f32.mrf.mxu0  ;;  %v1409_v48 = vld [vmem:[#allocation2 + $0x1] sm:$0xff] }
  0xde   : > { %1300 = vst [vmem:[#allocation2 + $0x10] sm:$0xff] %v1259_v43  ;;  %v832_v34 = vpop.f32.mrf.mxu1  ;;  %4400 = vperm.xlu2 %6217, %v4290_v44  }
  0xdf   : > { %v833_v54 = vadd.f32 %v6795_v21, %v832_v34  ;;  %4397 = vperm.xlu1 %6216, %v4289_v45   ;;  %4292 = vperm.xlu0 %6215, %v4254_v33   ;;  %v1095_v45 = vpop.permute.xlu2 %1094 }
  0xe1   : > { %vm932_vm11 = vcmp.ge.f32.partialorder %v833_v54, 0.0  ;;  %v973_v1 = vmul.f32 0.2, %v833_v54 }
  0xe3   : > { %v1014_v20 = vsel %vm932_vm11, %v833_v54, %v973_v1  ;;  %vm3922_vm11 = vcmask 1044480  }
  0xe4   : > { %v1260_v47 = vmul.f32 %v1070_v55, %v1014_v20 }
  0xe5   : > { %v1410_v49 = vld [vmem:[#allocation2 + $0x9] sm:$0xff]  ;;  %v6850_v3 = vpop.f32.mrf.mxu0 }
  0xe6   : > { %1301 = vst [vmem:[#allocation2 + $0x18] sm:$0xff] %v1260_v47  ;;  %v835_v52 = vpop.f32.mrf.mxu1  ;;  %v1445_v53 = vpack.c.bf16 %v1410_v49, %v1409_v48  ;;  %v1376_v56 = vpack.c.bf16 %v1260_v47, %v1259_v43  ;;  %v1100_v47 = vpop.permute.xlu0 %1099 }
  0xe7   : > { %v836_v40 = vadd.f32 %v6795_v21, %v835_v52 }
  0xe8   : > { %1536 = vmatmul.bf16.vlgmr.msra.gmra.mxu2 %v1445_v53  ;;  %5550 = vmatmul.msk.bf16.gmra.mxu0 %vm607_vm0, %v6848_v50 }
  0xe9   : > { %vm933_vm12 = vcmp.ge.f32.partialorder %v836_v40, 0.0  ;;  %v974_v58 = vmul.f32 0.2, %v836_v40  ;;  %5585 = vmatmul.msk.bf16.gmra.mxu1 %vm607_vm0, %v6801_v4  ;;  %1688 = vmatmul.bf16.gmra.mxu3 %v1376_v56  ;;  %v6887_v56 = vld [vmem:[%s6453_s15 + $0x78] sm:$0xff] }
  0xeb   : > { %v1015_v59 = vsel %vm933_vm12, %v836_v40, %v974_v58 }
  0xec   : > { %v1261_v60 = vmul.f32 %v1075_v57, %v1015_v59 }
  0xed   : > { %v6857_v61 = vpop.f32.mrf.mxu0  ;;  %v1411_v42 = vld [vmem:[#allocation2 + $0x11] sm:$0xff] }
  0xee   : > { %1302 = vst [vmem:[#allocation2 + $0x20] sm:$0xff] %v1261_v60  ;;  %v837_v63 = vpop.f32.mrf.mxu1 }
  0xef   : > { %v838_v12 = vadd.f32 %v6795_v21, %v837_v63  ;;  %v6125_v63 = vld [vmem:[%s8715_s6 + $0x138] sm:$0xff] }
  0xf0   : > { %2401 = vmatpush.bf16.msrb.mxu0 %v6125_v63 }
  0xf1   : > { %vm934_vm13 = vcmp.ge.f32.partialorder %v838_v12, 0.0  ;;  %v975_v41 = vmul.f32 0.2, %v838_v12 }
  0xf3   : > { %v1016_v37 = vsel %vm934_vm13, %v838_v12, %v975_v41  ;;  %v1105_v12 = vpop.permute.xlu1 %1104 }
  0xf4   : > { %v1262_v13 = vmul.f32 %v1080_v2, %v1016_v37 }
  0xf5   : > { %v1412_v8 = vld [vmem:[#allocation2 + $0x19] sm:$0xff]  ;;  %v6863_v4 = vpop.f32.mrf.mxu0 }
  0xf6   : > { %1303 = vst [vmem:[#allocation2 + $0x28] sm:$0xff] %v1262_v13  ;;  %v840_v10 = vpop.f32.mrf.mxu1  ;;  %v1446_v11 = vpack.c.bf16 %v1412_v8, %v1411_v42  ;;  %v1377_v15 = vpack.c.bf16 %v1262_v13, %v1261_v60  ;;  %v6124_v42 = vld [vmem:[%s8715_s6 + $0x130] sm:$0xff] }
  0xf7   : > { %v841_v16 = vadd.f32 %v6795_v21, %v840_v10  ;;  %2402 = vmatpush.bf16.msrb.mxu0 %v6124_v42  ;;  %v6123_v10 = vld [vmem:[%s8715_s6 + $0x128] sm:$0xff] }
  0xf8   : > { %1541 = vmatmul.bf16.gmra.mxu2 %v1446_v11  ;;  %5551 = vmatmul.msk.bf16.gmra.mxu0 %vm607_vm0, %v6861_v9  ;;  %v1110_v11 = vpop.permute.xlu2 %1109 }
  0xf9   : > { %vm935_vm14 = vcmp.ge.f32.partialorder %v841_v16, 0.0  ;;  %v976_v17 = vmul.f32 0.2, %v841_v16  ;;  %5586 = vmatmul.msk.bf16.gmra.mxu1 %vm607_vm0, %v6829_v30  ;;  %1693 = vmatmul.bf16.gmra.mxu3 %v1377_v15 }
  0xfb   : > { %v1017_v23 = vsel %vm935_vm14, %v841_v16, %v976_v17  ;;  %2403 = vmatpush.bf16.msrb.mxu0 %v6123_v10 }
  0xfc   : > { %v1263_v24 = vmul.f32 %v1085_v18, %v1017_v23  ;;  %v6909_v23 = vld [vmem:[%s6453_s15 + $0x80] sm:$0xff] }
  0xfd   : > { %v6870_v6 = vpop.f32.mrf.mxu0  ;;  %v1413_v19 = vld [vmem:[#allocation2 + $0x21] sm:$0xff] }
  0xfe   : > { %1304 = vst [vmem:[#allocation2 + $0x30] sm:$0xff] %v1263_v24  ;;  %v842_v14 = vpop.f32.mrf.mxu1 }
  0xff   : > { %v843_v38 = vadd.f32 %v6795_v21, %v842_v14 }
 0x101   : > { %vm936_vm15 = vcmp.ge.f32.partialorder %v843_v38, 0.0  ;;  %v977_v25 = vmul.f32 0.2, %v843_v38 }
 0x103   : > { %v1018_v27 = vsel %vm936_vm15, %v843_v38, %v977_v25 }
 0x104   : > { %v1264_v28 = vmul.f32 %v1090_v26, %v1018_v27  ;;  %v6122_v26 = vld [vmem:[%s8715_s6 + $0x120] sm:$0xff] }
 0x105   : > { %v1414_v7 = vld [vmem:[#allocation2 + $0x29] sm:$0xff]  ;;  %v6876_v30 = vpop.f32.mrf.mxu0  ;;  %2404 = vmatpush.bf16.msrb.mxu0 %v6122_v26 }
 0x106   : > { %1305 = vst [vmem:[#allocation2 + $0x38] sm:$0xff] %v1264_v28  ;;  %v845_v39 = vpop.f32.mrf.mxu1  ;;  %v1447_v35 = vpack.c.bf16 %v1414_v7, %v1413_v19  ;;  %v1378_v36 = vpack.c.bf16 %v1264_v28, %v1263_v24  ;;  %v6121_v19 = vld [vmem:[%s8715_s6 + $0x118] sm:$0xff]  ;;  %v1115_v7 = vpop.permute.xlu0 %1114 }
 0x107   : > { %v846_v43 = vadd.f32 %v6795_v21, %v845_v39 }
 0x108   : > { %1546 = vmatmul.bf16.gmra.mxu2 %v1447_v35  ;;  %5552 = vmatmul.msk.bf16.gmra.mxu0 %vm607_vm0, %v6874_v0 }
 0x109   : > { %vm937_vm1 = vcmp.ge.f32.partialorder %v846_v43, 0.0  ;;  %v978_v44 = vmul.f32 0.2, %v846_v43  ;;  %5587 = vmatmul.msk.bf16.gmra.mxu1 %vm607_vm0, %v6848_v50  ;;  %1698 = vmatmul.bf16.gmra.mxu3 %v1378_v36 }
 0x10a   : > { %2405 = vmatpush.bf16.msrb.mxu0 %v6121_v19  ;;  %v6962_v19 = vld [vmem:[%s8712_s3] ss:$0 sm:$0xff] }
 0x10b   : > { %v1019_v33 = vsel %vm937_vm1, %v846_v43, %v978_v44  ;;  %v6120_v44 = vld [vmem:[%s8715_s6 + $0x110] sm:$0xff] }
 0x10c   : > { %v1265_v34 = vmul.f32 %v1095_v45, %v1019_v33  ;;  %v6119_v33 = vld [vmem:[%s8715_s6 + $0x108] sm:$0xff] }
 0x10d   : > { %v6883_v54 = vpop.f32.mrf.mxu0  ;;  %v1415_v52 = vld [vmem:[#allocation2 + $0x31] sm:$0xff] }
 0x10e   : > { %1306 = vst [vmem:[#allocation2 + $0x40] sm:$0xff] %v1265_v34  ;;  %v847_v1 = vpop.f32.mrf.mxu1  ;;  %2406 = vmatpush.bf16.msrb.mxu0 %v6120_v44  ;;  %v6973_v44 = vadd.f32 %v6962_v19, %v6806_v5  ;;  %v2282_v5 = vld [vmem:[#allocation2 + $0x13] sm:$0xff] }
 0x10f   : > { %v848_v55 = vadd.f32 %v6795_v21, %v847_v1 }
 0x111   : > { %vm938_vm2 = vcmp.ge.f32.partialorder %v848_v55, 0.0  ;;  %v979_v20 = vmul.f32 0.2, %v848_v55 }
 0x112   : > { %2407 = vmatpush.bf16.msrb.mxu0 %v6119_v33 }
 0x113   : > { %v1020_v48 = vsel %vm938_vm2, %v848_v55, %v979_v20 }
 0x114   : > { %v1266_v49 = vmul.f32 %v1100_v47, %v1020_v48  ;;  %v6934_v48 = vld [vmem:[%s6453_s15 + $0x88] sm:$0xff] }
 0x115   : > { %v1416_v53 = vld [vmem:[#allocation2 + $0x39] sm:$0xff]  ;;  %v6889_v50 = vpop.f32.mrf.mxu0 }
 0x116   : > { %1307 = vst [vmem:[#allocation2 + $0x48] sm:$0xff] %v1266_v49  ;;  %v850_v40 = vpop.f32.mrf.mxu1  ;;  %v1448_v57 = vpack.c.bf16 %v1416_v53, %v1415_v52  ;;  %v1379_v58 = vpack.c.bf16 %v1266_v49, %v1265_v34  ;;  %v1120_v34 = vpop.permute.xlu1 %1119 }
 0x117   : > { %v851_v59 = vadd.f32 %v6795_v21, %v850_v40 }
 0x118   : > { %1551 = vmatmul.bf16.gmra.mxu2 %v1448_v57  ;;  %5553 = vmatmul.msk.bf16.gmra.mxu0 %vm607_vm0, %v6887_v56  ;;  %v6118_v57 = vld [vmem:[%s8715_s6 + $0x100] sm:$0xff] }
 0x119   : > { %vm939_vm3 = vcmp.ge.f32.partialorder %v851_v59, 0.0  ;;  %v980_v60 = vmul.f32 0.2, %v851_v59  ;;  %5588 = vmatmul.msk.bf16.gmra.mxu1 %vm607_vm0, %v6861_v9  ;;  %1703 = vmatmul.bf16.gmra.mxu3 %v1379_v58 }
 0x11a   : > { %2408 = vmatpush.bf16.msrb.mxu0 %v6118_v57 }
 0x11b   : > { %v1021_v41 = vsel %vm939_vm3, %v851_v59, %v980_v60  ;;  %v1125_v60 = vpop.permute.xlu2 %1124 }
 0x11c   : > { %v1267_v2 = vmul.f32 %v1105_v12, %v1021_v41 }
 0x11d   : > { %v6899_v37 = vpop.f32.mrf.mxu0  ;;  %v1417_v17 = vld [vmem:[#allocation2 + $0x41] sm:$0xff] }
 0x11e   : > { %1308 = vst [vmem:[#allocation2 + $0x50] sm:$0xff] %v1267_v2  ;;  %v852_v13 = vpop.f32.mrf.mxu1  ;;  %v1135_v26 = vpop.permute.xlu1 %1134 }
 0x11f   : > { %v853_v8 = vadd.f32 %v6795_v21, %v852_v13 }
 0x121   : > { %vm940_vm4 = vcmp.ge.f32.partialorder %v853_v8, 0.0  ;;  %v981_v9 = vmul.f32 0.2, %v853_v8 }
 0x123   : > { %v1022_v15 = vsel %vm940_vm4, %v853_v8, %v981_v9  ;;  %v1130_v8 = vpop.permute.xlu0 %1129 }
 0x124   : > { %v1268_v16 = vmul.f32 %v1110_v11, %v1022_v15 }
 0x125   : > { %v1418_v18 = vld [vmem:[#allocation2 + $0x49] sm:$0xff]  ;;  %v6911_v24 = vpop.f32.mrf.mxu0 }
 0x126   : > { %1309 = vst [vmem:[#allocation2 + $0x58] sm:$0xff] %v1268_v16  ;;  %v855_v14 = vpop.f32.mrf.mxu1  ;;  %v1449_v38 = vpack.c.bf16 %v1418_v18, %v1417_v17  ;;  %v1380_v25 = vpack.c.bf16 %v1268_v16, %v1267_v2  ;;  %v6950_v16 = vld [vmem:[%s6453_s15 + $0x90] sm:$0xff] }
 0x127   : > { %v856_v27 = vadd.f32 %v6795_v21, %v855_v14 }
 0x128   : > { %1556 = vmatmul.bf16.gmra.mxu2 %v1449_v38  ;;  %5554 = vmatmul.msk.bf16.gmra.mxu0 %vm607_vm0, %v6909_v23 }
 0x129   : > { %vm941_vm5 = vcmp.ge.f32.partialorder %v856_v27, 0.0  ;;  %v982_v28 = vmul.f32 0.2, %v856_v27  ;;  %5589 = vmatmul.msk.bf16.gmra.mxu1 %vm607_vm0, %v6874_v0  ;;  %1708 = vmatmul.bf16.gmra.mxu3 %v1380_v25 }
 0x12b   : > { %v1023_v39 = vsel %vm941_vm5, %v856_v27, %v982_v28 }
 0x12c   : > { %v1269_v35 = vmul.f32 %v1115_v7, %v1023_v39 }
 0x12d   : > { %v6924_v36 = vpop.f32.mrf.mxu0  ;;  %v1419_v20 = vld [vmem:[#allocation2 + $0x51] sm:$0xff] }
 0x12e   : > { %1310 = vst [vmem:[#allocation2 + $0x60] sm:$0xff] %v1269_v35  ;;  %v857_v43 = vpop.f32.mrf.mxu1 }
 0x12f   : > { %v858_v0 = vadd.f32 %v6795_v21, %v857_v43  ;;  %v684_v43 = vadd.f32 %v6962_v19, %v6766_v51 }
 0x131   : > { %vm942_vm6 = vcmp.ge.f32.partialorder %v858_v0, 0.0  ;;  %v983_v45 = vmul.f32 0.2, %v858_v0 }
 0x133   : > { %v1024_v1 = vsel %vm942_vm6, %v858_v0, %v983_v45  ;;  %v1140_v45 = vpop.permute.xlu2 %1139 }
 0x134   : > { %v1270_v55 = vmul.f32 %v1120_v34, %v1024_v1  ;;  %v3923_v34 = vrot.slane %v684_v43, 3 }
 0x135   : > { %v1420_v47 = vld [vmem:[#allocation2 + $0x59] sm:$0xff]  ;;  %v6936_v49 = vpop.f32.mrf.mxu0 }
 0x136   : > { %1311 = vst [vmem:[#allocation2 + $0x68] sm:$0xff] %v1270_v55  ;;  %v860_v52 = vpop.f32.mrf.mxu1  ;;  %v1450_v53 = vpack.c.bf16 %v1420_v47, %v1419_v20  ;;  %v1381_v40 = vpack.c.bf16 %v1270_v55, %v1269_v35  ;;  %v3926_v55 = vrot.slane %v6973_v44, 3  ;;  %v2283_v47 = vld [vmem:[#allocation2 + $0x1b] sm:$0xff] }
 0x137   : > { %v861_v58 = vadd.f32 %v6795_v21, %v860_v52 }
 0x138   : > { %1561 = vmatmul.bf16.gmra.mxu2 %v1450_v53  ;;  %5555 = vmatmul.msk.bf16.gmra.mxu0 %vm607_vm0, %v6934_v48 }
 0x139   : > { %vm943_vm7 = vcmp.ge.f32.partialorder %v861_v58, 0.0  ;;  %v984_v59 = vmul.f32 0.2, %v861_v58  ;;  %5590 = vmatmul.msk.bf16.gmra.mxu1 %vm607_vm0, %v6887_v56  ;;  %1713 = vmatmul.bf16.gmra.mxu3 %v1381_v40 }
 0x13b   : > { %v1025_v63 = vsel %vm943_vm7, %v861_v58, %v984_v59  ;;  %v2318_v59 = vpack.c.bf16 %v2283_v47, %v2282_v5 }
 0x13c   : > { %v1271_v12 = vmul.f32 %v1125_v60, %v1025_v63 }
 0x13d   : > { %v6946_v41 = vpop.f32.mrf.mxu0  ;;  %v1421_v11 = vld [vmem:[#allocation2 + $0x61] sm:$0xff] }
 0x13e   : > { %1312 = vst [vmem:[#allocation2 + $0x70] sm:$0xff] %v1271_v12  ;;  %v862_v2 = vpop.f32.mrf.mxu1 }
 0x13f   : > { %v863_v13 = vadd.f32 %v6795_v21, %v862_v2  ;;  %v6133_v2 = vld [vmem:[%s8715_s6 + $0x178] sm:$0xff] }
 0x140   : > { %2655 = vmatpush.bf16.msra.mxu1 %v6133_v2  ;;  %v6128_v2 = vld [vmem:[%s8715_s6 + $0x150] sm:$0xff] }
 0x141   : > { %vm944_vm8 = vcmp.ge.f32.partialorder %v863_v13, 0.0  ;;  %v985_v42 = vmul.f32 0.2, %v863_v13 }
 0x143   : > { %v1026_v9 = vsel %vm944_vm8, %v863_v13, %v985_v42  ;;  %v1145_v13 = vpop.permute.xlu0 %1144 }
 0x144   : > { %v1272_v10 = vmul.f32 %v1130_v8, %v1026_v9 }
 0x145   : > { %v1422_v15 = vld [vmem:[#allocation2 + $0x69] sm:$0xff]  ;;  %v6952_v56 = vpop.f32.mrf.mxu0 }
 0x146   : > { %1313 = vst [vmem:[#allocation2 + $0x78] sm:$0xff] %v1272_v10  ;;  %v865_v17 = vpop.f32.mrf.mxu1  ;;  %v1451_v18 = vpack.c.bf16 %v1422_v15, %v1421_v11  ;;  %v1382_v14 = vpack.c.bf16 %v1272_v10, %v1271_v12  ;;  %v6132_v15 = vld [vmem:[%s8715_s6 + $0x170] sm:$0xff] }
 0x147   : > { %v866_v38 = vadd.f32 %v6795_v21, %v865_v17  ;;  %v691_v17 = vadd.f32 %v6962_v19, %v6819_v22  ;;  %2656 = vmatpush.bf16.msra.mxu1 %v6132_v15 }
 0x148   : > { %1566 = vmatmul.bf16.gmra.mxu2 %v1451_v18  ;;  %5556 = vmatmul.msk.bf16.gmra.mxu0 %vm607_vm0, %v6950_v16  ;;  %v7000_v18 = vadd.f32 %v6962_v19, %v6831_v31 }
 0x149   : > { %vm945_vm9 = vcmp.ge.f32.partialorder %v866_v38, 0.0  ;;  %v986_v25 = vmul.f32 0.2, %v866_v38  ;;  %5591 = vmatmul.msk.bf16.gmra.mxu1 %vm607_vm0, %v6909_v23  ;;  %1718 = vmatmul.bf16.gmra.mxu3 %v1382_v14  ;;  %v686_v23 = vadd.f32 %v6962_v19, %v6784_v62 }
 0x14b   : > { %v1027_v27 = vsel %vm945_vm9, %v866_v38, %v986_v25  ;;  %v3924_v1 = vrot.slane %v686_v23, 3  ;;  %v6131_v38 = vld [vmem:[%s8715_s6 + $0x168] sm:$0xff]  ;;  %v1150_v25 = vpop.permute.xlu1 %1149  ;;  %v1160_v15 = vpop.permute.xlu0 %1159 }
 0x14c   : > { %v1273_v28 = vmul.f32 %v1135_v26, %v1027_v27  ;;  %v3928_v27 = vrot.slane %v691_v17, 3  ;;  %2657 = vmatpush.bf16.msra.mxu1 %v6131_v38 }
 0x14d   : > { %v6964_v7 = vpop.f32.mrf.mxu0  ;;  %v1423_v52 = vld [vmem:[#allocation2 + $0x71] sm:$0xff]  ;;  %v6980_v60 = vsel %vm3922_vm11, %v3923_v34, %v3924_v1  ;;  %v6983_v63 = vsel %vm3922_vm11, %v3924_v1, %v3926_v55  ;;  %v6130_v34 = vld [vmem:[%s8715_s6 + $0x160] sm:$0xff] }
 0x14e   : > { %1314 = vst [vmem:[#allocation2 + $0x80] sm:$0xff] %v1273_v28  ;;  %v867_v39 = vpop.f32.mrf.mxu1  ;;  %v7013_v47 = vsel %vm3922_vm11, %v3926_v55, %v3928_v27 }
 0x14f   : > { %v868_v35 = vadd.f32 %v6795_v21, %v867_v39  ;;  %8733 = vst [vmem:[#allocation9_spill] sm:$0xff] %v6980_v60  ;;  %v2285_v39 = vld [vmem:[#allocation2 + $0x2b] sm:$0xff] }
 0x150   : > { %8734 = vst [vmem:[#allocation10_spill] sm:$0xff] %v6983_v63  ;;  %2658 = vmatpush.bf16.msra.mxu1 %v6130_v34 }
 0x151   : > { %vm946_vm10 = vcmp.ge.f32.partialorder %v868_v35, 0.0  ;;  %v987_v0 = vmul.f32 0.2, %v868_v35  ;;  %8735 = vst [vmem:[#allocation11_spill] sm:$0xff] %v7013_v47 }
 0x153   : > { %v1028_v33 = vsel %vm946_vm10, %v868_v35, %v987_v0  ;;  %v3930_v35 = vrot.slane %v7000_v18, 3 }
 0x154   : > { %v1274_v20 = vmul.f32 %v1140_v45, %v1028_v33  ;;  %v2284_v45 = vld [vmem:[#allocation2 + $0x23] sm:$0xff] }
 0x155   : > { %v1424_v53 = vld [vmem:[#allocation2 + $0x79] sm:$0xff]  ;;  %v6976_v51 = vpop.f32.mrf.mxu0 }
 0x156   : > { %1315 = vst [vmem:[#allocation2 + $0x88] sm:$0xff] %v1274_v20  ;;  %v870_v62 = vpop.f32.mrf.mxu1  ;;  %v1452_v40 = vpack.c.bf16 %v1424_v53, %v1423_v52  ;;  %v1383_v57 = vpack.c.bf16 %v1274_v20, %v1273_v28  ;;  %v2319_v20 = vpack.c.bf16 %v2285_v39, %v2284_v45  ;;  %v7020_v53 = vsel %vm3922_vm11, %v3928_v27, %v3930_v35 }
 0x157   : > { %v871_v58 = vadd.f32 %v6795_v21, %v870_v62  ;;  %8736 = vst [vmem:[#allocation12_spill] sm:$0xff] %v7020_v53  ;;  %v6129_v62 = vld [vmem:[%s8715_s6 + $0x158] sm:$0xff]  ;;  %v2031_v53 = vld [vmem:[#allocation2 + $0x2a] sm:$0xff] }
 0x158   : > { %1571 = vmatmul.bf16.gmra.mxu2 %v1452_v40  ;;  %2409 = vmatmul.bf16.vlgmr.msrb.gmra.mxu0 %v2318_v59  ;;  %v1155_v40 = vpop.permute.xlu2 %1154 }
 0x159   : > { %vm947_vm12 = vcmp.ge.f32.partialorder %v871_v58, 0.0  ;;  %v988_v12 = vmul.f32 0.2, %v871_v58  ;;  %5592 = vmatmul.msk.bf16.gmra.mxu1 %vm607_vm0, %v6934_v48  ;;  %1723 = vmatmul.bf16.gmra.mxu3 %v1383_v57 }
 0x15a   : > { %2659 = vmatpush.bf16.msra.mxu1 %v6129_v62  ;;  %v1165_v62 = vpop.permute.xlu1 %1164 }
 0x15b   : > { %v1029_v42 = vsel %vm947_vm12, %v871_v58, %v988_v12  ;;  %v1684_v9 = vpop.f32.mrf.mxu3 }
 0x15c   : > { %v1275_v8 = vmul.f32 %v1145_v13, %v1029_v42  ;;  %v696_v42 = vadd.f32 %v6962_v19, %v6844_v46 }
 0x15d   : > { %v6990_v10 = vpop.f32.mrf.mxu0  ;;  %v1425_v22 = vld [vmem:[#allocation2 + $0x81] sm:$0xff] }
 0x15e   : > { %1316 = vst [vmem:[#allocation2 + $0x90] sm:$0xff] %v1275_v8  ;;  %v872_v11 = vpop.f32.mrf.mxu1  ;;  %2660 = vmatpush.bf16.msra.mxu1 %v6128_v2 }
 0x15f   : > { %v873_v48 = vadd.f32 %v6795_v21, %v872_v11  ;;  %v6127_v11 = vld [vmem:[%s8715_s6 + $0x148] sm:$0xff] }
 0x161   : > { %vm948_vm13 = vcmp.ge.f32.partialorder %v873_v48, 0.0  ;;  %v989_v14 = vmul.f32 0.2, %v873_v48 }
 0x162   : > { %2661 = vmatpush.bf16.msra.mxu1 %v6127_v11 }
 0x163   : > { %v1030_v26 = vsel %vm948_vm13, %v873_v48, %v989_v14  ;;  %v1686_v23 = vpop.f32.mrf.mxu3  ;;  %v3932_v14 = vrot.slane %v696_v42, 3  ;;  %v7070_v42 = vadd.f32 %v6962_v19, %v6863_v4 }
 0x164   : > { %v1276_v28 = vmul.f32 %v1150_v25, %v1030_v26  ;;  %v2287_v26 = vld [vmem:[#allocation2 + $0x3b] sm:$0xff] }
 0x165   : > { %v1426_v43 = vld [vmem:[#allocation2 + $0x89] sm:$0xff]  ;;  %v7006_v31 = vpop.f32.mrf.mxu0  ;;  %v7054_v34 = vsel %vm3922_vm11, %v3930_v35, %v3932_v14 }
 0x166   : > { %1317 = vst [vmem:[#allocation2 + $0x98] sm:$0xff] %v1276_v28  ;;  %v875_v44 = vpop.f32.mrf.mxu1  ;;  %v1453_v0 = vpack.c.bf16 %v1426_v43, %v1425_v22  ;;  %v1384_v33 = vpack.c.bf16 %v1276_v28, %v1275_v8  ;;  %v7037_v8 = vadd.f32 %v6962_v19, %v6850_v3 }
 0x167   : > { %v876_v1 = vadd.f32 %v6795_v21, %v875_v44  ;;  %v2286_v44 = vld [vmem:[#allocation2 + $0x33] sm:$0xff]  ;;  %8737 = vst [vmem:[#allocation13_spill] sm:$0xff] %v7054_v34 }
 0x168   : > { %1576 = vmatmul.bf16.gmra.mxu2 %v1453_v0  ;;  %2414 = vmatmul.bf16.gmra.mxu0 %v2319_v20  ;;  %v3934_v46 = vrot.slane %v7037_v8, 3  ;;  %v6222_v20 = vld [vmem:[%s6453_s15 + $0x98] sm:$0xff]  ;;  %s377_s15 = sand.u32 1, %s6281_s18  }
 0x169   : > { %vm949_vm14 = vcmp.ge.f32.partialorder %v876_v1, 0.0  ;;  %v990_v52 = vmul.f32 0.2, %v876_v1  ;;  %5593 = vmatmul.msk.bf16.gmra.mxu1 %vm607_vm0, %v6950_v16  ;;  %1728 = vmatmul.bf16.gmra.mxu3 %v1384_v33  ;;  %v2320_v33 = vpack.c.bf16 %v2287_v26, %v2286_v44  ;;  %s5440_s22 = sshll.u32 %s377_s15, 6  ;;  %s5359_s26 = scalar_lea.sflag [#allocation5], %s377_s15 }
 0x16a   : > { %s8665_s29 = scalar_lea.vmem [#allocation4], %s5440_s22 }
 0x16b   : > { %v1031_v5 = vsel %vm949_vm14, %v876_v1, %v990_v52  ;;  %v1537_v55 = vpop.f32.mrf.mxu2  ;;  %v7059_v52 = vsel %vm3922_vm11, %v3932_v14, %v3934_v46  ;;  %s5371_s13 = sshll.u32 %s8665_s29, 4  ;;  %s5372_s13 = int_to_ptr.vmem [resolvable:$true] %s5371_s13 }
 0x16c   : > { %v1277_v57 = vmul.f32 %v1155_v40, %v1031_v5  ;;  %v7025_v58 = vadd.f32 %v1684_v9, %v1537_v55  ;;  %v1689_v59 = vpop.f32.mrf.mxu3  ;;  %8738 = vst [vmem:[#allocation14_spill] sm:$0xff] %v7059_v52 }
 0x16d   : > { %v7027_v16 = vpop.f32.mrf.mxu0  ;;  %v1427_v27 = vld [vmem:[#allocation2 + $0x91] sm:$0xff] }
 0x16e   : > { %1318 = vst [vmem:[#allocation2 + $0xa0] sm:$0xff] %v1277_v57  ;;  %v877_v12 = vpop.f32.mrf.mxu1 }
 0x16f   : > { %v878_v13 = vadd.f32 %v6795_v21, %v877_v12 }
 0x171   : > { %vm950_vm15 = vcmp.ge.f32.partialorder %v878_v13, 0.0  ;;  %v991_v9 = vmul.f32 0.2, %v878_v13 }
 0x173   : > { %v1032_v48 = vsel %vm950_vm15, %v878_v13, %v991_v9  ;;  %v1539_v17 = vpop.f32.mrf.mxu2  ;;  %v701_v13 = vadd.f32 %v6962_v19, %v6857_v61  ;;  %v1170_v9 = vpop.permute.xlu2 %1169 }
 0x174   : > { %v1278_v38 = vmul.f32 %v1160_v15, %v1032_v48  ;;  %v7042_v25 = vadd.f32 %v1686_v23, %v1539_v17  ;;  %v1691_v28 = vpop.f32.mrf.mxu3  ;;  %v6126_v23 = vld [vmem:[%s8715_s6 + $0x140] sm:$0xff]  ;;  %v3938_v48 = vrot.slane %v7070_v42, 3 }
 0x175   : > { %v1428_v3 = vld [vmem:[#allocation2 + $0x99] sm:$0xff]  ;;  %v7045_v39 = vpop.f32.mrf.mxu0  ;;  %2662 = vmatpush.bf16.msra.mxu1 %v6126_v23  ;;  %v3936_v15 = vrot.slane %v701_v13, 3  ;;  %v706_v13 = vadd.f32 %v6962_v19, %v6870_v6 }
 0x176   : > { %1319 = vst [vmem:[#allocation2 + $0xa8] sm:$0xff] %v1278_v38  ;;  %v880_v22 = vpop.f32.mrf.mxu1  ;;  %v1454_v43 = vpack.c.bf16 %v1428_v3, %v1427_v27  ;;  %v1385_v0 = vpack.c.bf16 %v1278_v38, %v1277_v57  ;;  %v2289_v38 = vld [vmem:[#allocation2 + $0x4b] sm:$0xff] }
 0x177   : > { %v881_v45 = vadd.f32 %v6795_v21, %v880_v22 }
 0x178   : > { %1581 = vmatmul.bf16.gmra.mxu2 %v1454_v43  ;;  %2419 = vmatmul.bf16.gmra.mxu0 %v2320_v33  ;;  %v2288_v43 = vld [vmem:[#allocation2 + $0x43] sm:$0xff] }
 0x179   : > { %vm951_vm1 = vcmp.ge.f32.partialorder %v881_v45, 0.0  ;;  %v992_v1 = vmul.f32 0.2, %v881_v45  ;;  %5594 = vmatmul.msk.bf16.gmra.mxu1 %vm607_vm0, %v6222_v20  ;;  %1733 = vmatmul.bf16.gmra.mxu3 %v1385_v0  ;;  %v2321_v23 = vpack.c.bf16 %v2289_v38, %v2288_v43  ;;  %v2291_v38 = vld [vmem:[#allocation2 + $0x5b] sm:$0xff] }
 0x17b   : > { %v1033_v40 = vsel %vm951_vm1, %v881_v45, %v992_v1  ;;  %v1542_v5 = vpop.f32.mrf.mxu2  ;;  %v7079_v45 = vsel %vm3922_vm11, %v3934_v46, %v3936_v15  ;;  %v1175_v1 = vpop.permute.xlu0 %1174 }
 0x17c   : > { %v1279_v55 = vmul.f32 %v1165_v62, %v1033_v40  ;;  %v7061_v57 = vadd.f32 %v1689_v59, %v1542_v5  ;;  %v1694_v18 = vpop.f32.mrf.mxu3  ;;  %8739 = vst [vmem:[#allocation15_spill] sm:$0xff] %v7079_v45 }
 0x17d   : > { %v7063_v35 = vpop.f32.mrf.mxu0  ;;  %v1429_v26 = vld [vmem:[#allocation2 + $0xa1] sm:$0xff] }
 0x17e   : > { %1320 = vst [vmem:[#allocation2 + $0xb0] sm:$0xff] %v1279_v55  ;;  %v882_v12 = vpop.f32.mrf.mxu1 }
 0x17f   : > { %v883_v2 = vadd.f32 %v6795_v21, %v882_v12 }
 0x181   : > { %vm952_vm2 = vcmp.ge.f32.partialorder %v883_v2, 0.0  ;;  %v993_v8 = vmul.f32 0.2, %v883_v2 }
 0x183   : > { %v1034_v11 = vsel %vm952_vm2, %v883_v2, %v993_v8  ;;  %v1544_v59 = vpop.f32.mrf.mxu2  ;;  %v1180_v8 = vpop.permute.xlu1 %1179 }
 0x184   : > { %v1280_v17 = vmul.f32 %v1170_v9, %v1034_v11  ;;  %v7073_v14 = vadd.f32 %v1691_v28, %v1544_v59  ;;  %v1696_v3 = vpop.f32.mrf.mxu3  ;;  %v7082_v28 = vsel %vm3922_vm11, %v3936_v15, %v3938_v48  ;;  %v3940_v11 = vrot.slane %v706_v13, 3 }
 0x185   : > { %v1430_v27 = vld [vmem:[#allocation2 + $0xa9] sm:$0xff]  ;;  %v7075_v61 = vpop.f32.mrf.mxu0  ;;  %8740 = vst [vmem:[#allocation16_spill] sm:$0xff] %v7082_v28 }
 0x186   : > { %1321 = vst [vmem:[#allocation2 + $0xb8] sm:$0xff] %v1280_v17  ;;  %v885_v4 = vpop.f32.mrf.mxu1  ;;  %v1455_v22 = vpack.c.bf16 %v1430_v27, %v1429_v26  ;;  %v1386_v44 = vpack.c.bf16 %v1280_v17, %v1279_v55  ;;  %v2537_v26 = vld [vmem:[#allocation2 + $0x1c] sm:$0xff] }
 0x187   : > { %v886_v0 = vadd.f32 %v6795_v21, %v885_v4 }
 0x188   : > { %1586 = vmatmul.bf16.gmra.mxu2 %v1455_v22  ;;  %2424 = vmatmul.bf16.gmra.mxu0 %v2321_v23 }
 0x189   : > { %vm953_vm3 = vcmp.ge.f32.partialorder %v886_v0, 0.0  ;;  %v994_v33 = vmul.f32 0.2, %v886_v0  ;;  %5595 = vmatmul.msk.bf16.gmra.mxu1 %vm607_vm0, %v6524_v29  ;;  %1738 = vmatmul.bf16.gmra.mxu3 %v1386_v44  ;;  %v7095_v29 = vadd.f32 %v6962_v19, %v6876_v30  ;;  %v2290_v44 = vld [vmem:[#allocation2 + $0x53] sm:$0xff] }
 0x18b   : > { %v1035_v20 = vsel %vm953_vm3, %v886_v0, %v994_v33  ;;  %v1547_v62 = vpop.f32.mrf.mxu2  ;;  %v3942_v59 = vrot.slane %v7095_v29, 3  ;;  %v2536_v0 = vld [vmem:[#allocation2 + $0x14] sm:$0xff] }
 0x18c   : > { %v1281_v40 = vmul.f32 %v1175_v1, %v1035_v20  ;;  %v7086_v5 = vadd.f32 %v1694_v18, %v1547_v62  ;;  %v1699_v55 = vpop.f32.mrf.mxu3  ;;  %v2322_v1 = vpack.c.bf16 %v2291_v38, %v2290_v44  ;;  %v2572_v20 = vpack.c.bf16 %v2537_v26, %v2536_v0 }
 0x18d   : > { %v7088_v46 = vpop.f32.mrf.mxu0  ;;  %v1431_v27 = vld [vmem:[#allocation2 + $0xb1] sm:$0xff]  ;;  %v7109_v62 = vsel %vm3922_vm11, %v3940_v11, %v3942_v59  ;;  %v7120_v38 = vadd.f32 %v6962_v19, %v6889_v50 }
 0x18e   : > { %1322 = vst [vmem:[#allocation2 + $0xc0] sm:$0xff] %v1281_v40  ;;  %v887_v12 = vpop.f32.mrf.mxu1 }
 0x18f   : > { %v888_v2 = vadd.f32 %v6795_v21, %v887_v12  ;;  %8742 = vst [vmem:[#allocation18_spill] sm:$0xff] %v7109_v62 }
 0x191   : > { %vm954_vm0 = vcmp.ge.f32.partialorder %v888_v2, 0.0  ;;  %v995_v42 = vmul.f32 0.2, %v888_v2 }
 0x193   : > { %v1036_v9 = vsel %vm954_vm0, %v888_v2, %v995_v42  ;;  %v1549_v18 = vpop.f32.mrf.mxu2  ;;  %v1185_v2 = vpop.permute.xlu2 %1184 }
 0x194   : > { %v1282_v15 = vmul.f32 %v1180_v8, %v1036_v9  ;;  %v7098_v17 = vadd.f32 %v1696_v3, %v1549_v18  ;;  %v1701_v6 = vpop.f32.mrf.mxu3  ;;  %v7104_v3 = vsel %vm3922_vm11, %v3938_v48, %v3940_v11  ;;  %v711_v11 = vadd.f32 %v6962_v19, %v6883_v54 }
 0x195   : > { %v1432_v4 = vld [vmem:[#allocation2 + $0xb9] sm:$0xff]  ;;  %v7100_v22 = vpop.f32.mrf.mxu0  ;;  %8741 = vst [vmem:[#allocation17_spill] sm:$0xff] %v7104_v3 }
 0x196   : > { %1323 = vst [vmem:[#allocation2 + $0xc8] sm:$0xff] %v1282_v15  ;;  %v890_v30 = vpop.f32.mrf.mxu1  ;;  %v1456_v43 = vpack.c.bf16 %v1432_v4, %v1431_v27  ;;  %v1387_v23 = vpack.c.bf16 %v1282_v15, %v1281_v40  ;;  %v1190_v27 = vpop.permute.xlu0 %1189 }
 0x197   : > { %v891_v33 = vadd.f32 %v6795_v21, %v890_v30  ;;  %v3944_v30 = vrot.slane %v711_v11, 3 }
 0x198   : > { %1591 = vmatmul.bf16.gmra.mxu2 %v1456_v43  ;;  %2429 = vmatmul.bf16.gmra.mxu0 %v2322_v1  ;;  %v8722_v43 = vrot.slane %v7120_v38, 3 }
 0x199   : > { %vm955_vm4 = vcmp.ge.f32.partialorder %v891_v33, 0.0  ;;  %v996_v12 = vmul.f32 0.2, %v891_v33  ;;  %2663 = vmatmul.bf16.vlgmr.msra.gmra.mxu1 %v2572_v20  ;;  %1743 = vmatmul.bf16.gmra.mxu3 %v1387_v23  ;;  %v2293_v23 = vld [vmem:[#allocation2 + $0x6b] sm:$0xff] }
 0x19b   : > { %v1037_v40 = vsel %vm955_vm4, %v891_v33, %v996_v12  ;;  %v1552_v13 = vpop.f32.mrf.mxu2 }
 0x19c   : > { %v1283_v42 = vmul.f32 %v1185_v2, %v1037_v40  ;;  %v7111_v8 = vadd.f32 %v1699_v55, %v1552_v13  ;;  %v1704_v9 = vpop.f32.mrf.mxu3  ;;  %v2292_v2 = vld [vmem:[#allocation2 + $0x63] sm:$0xff] }
 0x19d   : > { %v7113_v48 = vpop.f32.mrf.mxu0  ;;  %v1433_v33 = vld [vmem:[#allocation2 + $0xc1] sm:$0xff] }
 0x19e   : > { %1324 = vst [vmem:[#allocation2 + $0xd0] sm:$0xff] %v1283_v42  ;;  %v892_v18 = vpop.f32.mrf.mxu1  ;;  %v2538_v40 = vld [vmem:[#allocation2 + $0x24] sm:$0xff] }
 0x19f   : > { %v893_v15 = vadd.f32 %v6795_v21, %v892_v18  ;;  %v2539_v21 = vld [vmem:[#allocation2 + $0x2c] sm:$0xff]  ;;  %v7130_v18 = vld [vmem:[%s8714_s5] ss:$0 sm:$0xff]  ;;  %v2304_v63 = vld [vmem:[#allocation2 + $0xc3] sm:$0xff] }
 0x1a0   : > { %v2573_v11 = vpack.c.bf16 %v2539_v21, %v2538_v40 }
 0x1a1   : > { %vm956_vm5 = vcmp.ge.f32.partialorder %v893_v15, 0.0  ;;  %v997_v26 = vmul.f32 0.2, %v893_v15 }
 0x1a3   : > { %v1038_v4 = vsel %vm956_vm5, %v893_v15, %v997_v26  ;;  %v1554_v55 = vpop.f32.mrf.mxu2  ;;  %v2323_v15 = vpack.c.bf16 %v2293_v23, %v2292_v2  ;;  %v7136_v26 = vsel %vm3922_vm11, %v3942_v59, %v3944_v30  ;;  %v1200_v2 = vpop.permute.xlu2 %1199 }
 0x1a4   : > { %v1284_v44 = vmul.f32 %v1190_v27, %v1038_v4  ;;  %v7123_v0 = vadd.f32 %v1701_v6, %v1554_v55  ;;  %v1706_v54 = vpop.f32.mrf.mxu3  ;;  %8743 = vst [vmem:[#allocation19_spill] sm:$0xff] %v7136_v26  ;;  %v7141_v27 = vsel %vm3922_vm11, %v3944_v30, %v8722_v43  ;;  %v1195_v4 = vpop.permute.xlu1 %1194  ;;  %v716_v30 = vadd.f32 %v6962_v19, %v6899_v37  ;;  %v2540_v26 = vld [vmem:[#allocation2 + $0x34] sm:$0xff] }
 0x1a5   : > { %v1434_v1 = vld [vmem:[#allocation2 + $0xc9] sm:$0xff]  ;;  %v7125_v20 = vpop.f32.mrf.mxu0  ;;  %8744 = vst [vmem:[#allocation20_spill] sm:$0xff] %v7141_v27  ;;  %v2294_v27 = vld [vmem:[#allocation2 + $0x73] sm:$0xff] }
 0x1a6   : > { %1325 = vst [vmem:[#allocation2 + $0xd8] sm:$0xff] %v1284_v44  ;;  %v895_v50 = vpop.f32.mrf.mxu1  ;;  %v1457_v12 = vpack.c.bf16 %v1434_v1, %v1433_v33  ;;  %v1388_v13 = vpack.c.bf16 %v1284_v44, %v1283_v42 }
 0x1a7   : > { %v896_v6 = vadd.f32 %v7130_v18, %v895_v50  ;;  %v7152_v50 = vadd.f32 %v6962_v19, %v6911_v24 }
 0x1a8   : > { %1596 = vmatmul.bf16.gmra.mxu2 %v1457_v12  ;;  %2434 = vmatmul.bf16.gmra.mxu0 %v2323_v15 }
 0x1a9   : > { %vm957_vm6 = vcmp.ge.f32.partialorder %v896_v6, 0.0  ;;  %v998_v42 = vmul.f32 0.2, %v896_v6  ;;  %2668 = vmatmul.bf16.gmra.mxu1 %v2573_v11  ;;  %1748 = vmatmul.bf16.gmra.mxu3 %v1388_v13  ;;  %v3948_v13 = vrot.slane %v716_v30, 3 }
 0x1ab   : > { %v1039_v55 = vsel %vm957_vm6, %v896_v6, %v998_v42  ;;  %v1557_v44 = vpop.f32.mrf.mxu2  ;;  %v2295_v42 = vld [vmem:[#allocation2 + $0x7b] sm:$0xff] }
 0x1ac   : > { %v1285_v23 = vmul.f32 %v1195_v4, %v1039_v55  ;;  %v7143_v21 = vadd.f32 %v1704_v9, %v1557_v44  ;;  %v1709_v29 = vpop.f32.mrf.mxu3  ;;  %v2541_v4 = vld [vmem:[#allocation2 + $0x3c] sm:$0xff] }
 0x1ad   : > { %v7145_v59 = vpop.f32.mrf.mxu0  ;;  %v1435_v55 = vld [vmem:[#allocation2 + $0xd1] sm:$0xff]  ;;  %v2574_v6 = vpack.c.bf16 %v2541_v4, %v2540_v26 }
 0x1ae   : > { %1326 = vst [vmem:[#allocation2 + $0xe0] sm:$0xff] %v1285_v23  ;;  %v897_v33 = vpop.f32.mrf.mxu1 }
 0x1af   : > { %v898_v1 = vadd.f32 %v7130_v18, %v897_v33 }
 0x1b1   : > { %vm958_vm7 = vcmp.ge.f32.partialorder %v898_v1, 0.0  ;;  %v999_v12 = vmul.f32 0.2, %v898_v1 }
 0x1b3   : > { %v1040_v40 = vsel %vm958_vm7, %v898_v1, %v999_v12  ;;  %v1559_v9 = vpop.f32.mrf.mxu2  ;;  %v2324_v12 = vpack.c.bf16 %v2295_v42, %v2294_v27  ;;  %v6117_v27 = vld [vmem:[%s8715_s6 + $0xf8] sm:$0xff] }
 0x1b4   : > { %v1286_v15 = vmul.f32 %v1200_v2, %v1040_v40  ;;  %v7155_v11 = vadd.f32 %v1706_v54, %v1559_v9  ;;  %v1711_v37 = vpop.f32.mrf.mxu3  ;;  %v8745_v54 = vrot.slane %v7120_v38, 3  ;;  %v8747_v40 = vrot.slane %v7152_v50, 3  ;;  %2147 = vmatpush.bf16.msrb.mxu3 %v6117_v27 }
 0x1b5   : > { %v1436_v44 = vld [vmem:[#allocation2 + $0xd9] sm:$0xff]  ;;  %v7157_v33 = vpop.f32.mrf.mxu0 }
 0x1b6   : > { %1327 = vst [vmem:[#allocation2 + $0xe8] sm:$0xff] %v1286_v15  ;;  %v900_v24 = vpop.f32.mrf.mxu1  ;;  %v1458_v43 = vpack.c.bf16 %v1436_v44, %v1435_v55  ;;  %v1389_v1 = vpack.c.bf16 %v1286_v15, %v1285_v23  ;;  %v7163_v2 = vsel %vm3922_vm11, %v8745_v54, %v3948_v13  ;;  %v7168_v9 = vsel %vm3922_vm11, %v3948_v13, %v8747_v40  ;;  %v6116_v13 = vld [vmem:[%s8715_s6 + $0xf0] sm:$0xff]  ;;  %v1210_v54 = vpop.permute.xlu1 %1209 }
 0x1b7   : > { %v901_v30 = vadd.f32 %v7130_v18, %v900_v24  ;;  %8746 = vst [vmem:[#allocation21_spill] sm:$0xff] %v7163_v2  ;;  %v2542_v2 = vld [vmem:[#allocation2 + $0x44] sm:$0xff] }
 0x1b8   : > { %1601 = vmatmul.bf16.gmra.mxu2 %v1458_v43  ;;  %8748 = vst [vmem:[#allocation22_spill] sm:$0xff] %v7168_v9  ;;  %2439 = vmatmul.bf16.gmra.mxu0 %v2324_v12  ;;  %v1205_v43 = vpop.permute.xlu0 %1204  ;;  %v6114_v9 = vld [vmem:[%s8715_s6 + $0xe0] sm:$0xff] }
 0x1b9   : > { %vm959_vm8 = vcmp.ge.f32.partialorder %v901_v30, 0.0  ;;  %v1000_v55 = vmul.f32 0.2, %v901_v30  ;;  %2673 = vmatmul.bf16.gmra.mxu1 %v2574_v6  ;;  %1753 = vmatmul.bf16.gmra.mxu3 %v1389_v1  ;;  %v721_v6 = vadd.f32 %v6962_v19, %v6924_v36  ;;  %v7185_v1 = vadd.f32 %v6962_v19, %v6936_v49 }
 0x1ba   : > { %2148 = vmatpush.bf16.msrb.mxu3 %v6116_v13 }
 0x1bb   : > { %v1041_v26 = vsel %vm959_vm8, %v901_v30, %v1000_v55  ;;  %v1562_v38 = vpop.f32.mrf.mxu2  ;;  %v6115_v30 = vld [vmem:[%s8715_s6 + $0xe8] sm:$0xff]  ;;  %v3952_v12 = vrot.slane %v721_v6, 3  ;;  %v8751_v3 = vrot.slane %v7185_v1, 3 }
 0x1bc   : > { %v1287_v23 = vmul.f32 %v1205_v43, %v1041_v26  ;;  %v7173_v15 = vadd.f32 %v1709_v29, %v1562_v38  ;;  %v1714_v42 = vpop.f32.mrf.mxu3  ;;  %v2297_v26 = vld [vmem:[#allocation2 + $0x8b] sm:$0xff] }
 0x1bd   : > { %v7180_v4 = vpop.f32.mrf.mxu0  ;;  %v2543_v38 = vld [vmem:[#allocation2 + $0x4c] sm:$0xff]  ;;  %v1437_v49 = vld [vmem:[#allocation2 + $0xe1] sm:$0xff]  ;;  %v7207_v28 = vsel %vm3922_vm11, %v3952_v12, %v8751_v3  ;;  %v774_v3 = vadd.f32 %v6962_v19, %v6722_v32 }
 0x1be   : > { %1328 = vst [vmem:[#allocation2 + $0xf0] sm:$0xff] %v1287_v23  ;;  %v902_v44 = vpop.f32.mrf.mxu1  ;;  %2149 = vmatpush.bf16.msrb.mxu3 %v6115_v30  ;;  %v2296_v30 = vld [vmem:[#allocation2 + $0x83] sm:$0xff]  ;;  %v2575_v62 = vpack.c.bf16 %v2543_v38, %v2542_v2  ;;  %v1215_v2 = vpop.permute.xlu2 %1214  ;;  %v6108_v38 = vld [vmem:[%s8715_s6 + $0xb0] sm:$0xff] }
 0x1bf   : > { %v903_v24 = vadd.f32 %v7130_v18, %v902_v44  ;;  %8752 = vst [vmem:[#allocation24_spill] sm:$0xff] %v7207_v28 }
 0x1c1   : > { %vm960_vm9 = vcmp.ge.f32.partialorder %v903_v24, 0.0  ;;  %v1001_v29 = vmul.f32 0.2, %v903_v24 }
 0x1c2   : > { %2150 = vmatpush.bf16.msrb.mxu3 %v6114_v9 }
 0x1c3   : > { %v1042_v36 = vsel %vm960_vm9, %v903_v24, %v1001_v29  ;;  %v1564_v40 = vpop.f32.mrf.mxu2 }
 0x1c4   : > { %v1288_v27 = vmul.f32 %v1210_v54, %v1042_v36  ;;  %v7191_v43 = vadd.f32 %v1711_v37, %v1564_v40  ;;  %v1716_v44 = vpop.f32.mrf.mxu3  ;;  %v8749_v37 = vrot.slane %v7152_v50, 3  ;;  %v2325_v40 = vpack.c.bf16 %v2297_v26, %v2296_v30  ;;  %v6109_v50 = vld [vmem:[%s8715_s6 + $0xb8] sm:$0xff] }
 0x1c5   : > { %v1438_v13 = vld [vmem:[#allocation2 + $0xe9] sm:$0xff]  ;;  %v7196_v6 = vpop.f32.mrf.mxu0  ;;  %1893 = vmatpush.bf16.msrb.mxu2 %v6109_v50 }
 0x1c6   : > { %1329 = vst [vmem:[#allocation2 + $0xf8] sm:$0xff] %v1288_v27  ;;  %v905_v24 = vpop.f32.mrf.mxu1  ;;  %v1459_v29 = vpack.c.bf16 %v1438_v13, %v1437_v49  ;;  %v1390_v55 = vpack.c.bf16 %v1288_v27, %v1287_v23  ;;  %v7201_v54 = vsel %vm3922_vm11, %v8749_v37, %v3952_v12  ;;  %v6113_v23 = vld [vmem:[%s8715_s6 + $0xd8] sm:$0xff]  ;;  %v726_v13 = vadd.f32 %v6962_v19, %v6946_v41  ;;  %v6107_v41 = vld [vmem:[%s8715_s6 + $0xa8] sm:$0xff] }
 0x1c7   : > { %8750 = vst [vmem:[#allocation23_spill] sm:$0xff] %v7201_v54  ;;  %v906_v36 = vadd.f32 %v7130_v18, %v905_v24  ;;  %2151 = vmatpush.bf16.msrb.mxu3 %v6113_v23  ;;  %v7229_v24 = vadd.f32 %v6962_v19, %v6952_v56  ;;  %v3994_v37 = vrot.slane %v774_v3, 3  ;;  %v6111_v56 = vld [vmem:[%s8715_s6 + $0xc8] sm:$0xff]  ;;  %v1220_v23 = vpop.permute.xlu0 %1219 }
 0x1c8   : > { %1606 = vmatmul.bf16.gmra.mxu2 %v1459_v29  ;;  %2444 = vmatmul.bf16.gmra.mxu0 %v2325_v40 }
 0x1c9   : > { %vm961_vm10 = vcmp.ge.f32.partialorder %v906_v36, 0.0  ;;  %v1002_v49 = vmul.f32 0.2, %v906_v36  ;;  %2678 = vmatmul.bf16.gmra.mxu1 %v2575_v62  ;;  %1758 = vmatmul.bf16.gmra.mxu3 %v1390_v55  ;;  %v6112_v55 = vld [vmem:[%s8715_s6 + $0xd0] sm:$0xff]  ;;  %v8724_v50 = vrot.slane %v7229_v24, 3 }
 0x1ca   : > { %1894 = vmatpush.bf16.msrb.mxu2 %v6108_v38 }
 0x1cb   : > { %v1043_v9 = vsel %vm961_vm10, %v906_v36, %v1002_v49  ;;  %v1567_v27 = vpop.f32.mrf.mxu2  ;;  %2152 = vmatpush.bf16.msrb.mxu3 %v6112_v55  ;;  %v3956_v49 = vrot.slane %v726_v13, 3 }
 0x1cc   : > { %v1289_v12 = vmul.f32 %v1215_v2, %v1043_v9  ;;  %v7217_v26 = vadd.f32 %v1714_v42, %v1567_v27  ;;  %v1719_v62 = vpop.f32.mrf.mxu3 }
 0x1cd   : > { %v770_v32 = vpop.f32.mrf.mxu0  ;;  %v1439_v55 = vld [vmem:[#allocation2 + $0xf1] sm:$0xff] }
 0x1ce   : > { %1330 = vst [vmem:[#allocation2 + $0x100] sm:$0xff] %v1289_v12  ;;  %v907_v42 = vpop.f32.mrf.mxu1  ;;  %v7232_v29 = vadd.f32 %v6962_v19, %v770_v32  ;;  %1895 = vmatpush.bf16.msrb.mxu2 %v6107_v41  ;;  %v2299_v32 = vld [vmem:[#allocation2 + $0x9b] sm:$0xff] }
 0x1cf   : > { %v908_v30 = vadd.f32 %v7130_v18, %v907_v42  ;;  %2153 = vmatpush.bf16.msrb.mxu3 %v6111_v56  ;;  %v2545_v42 = vld [vmem:[#allocation2 + $0x5c] sm:$0xff] }
 0x1d0   : > { %v8723_v36 = vrot.slane %v7232_v29, 3 }
 0x1d1   : > { %vm962_vm12 = vcmp.ge.f32.partialorder %v908_v30, 0.0  ;;  %v1003_v40 = vmul.f32 0.2, %v908_v30 }
 0x1d2   : > { %v7246_v27 = vsel %vm3922_vm11, %v8723_v36, %v3994_v37 }
 0x1d3   : > { %v1044_v2 = vsel %vm962_vm12, %v908_v30, %v1003_v40  ;;  %v1569_v9 = vpop.f32.mrf.mxu2  ;;  %8753 = vst [vmem:[#allocation25_spill] sm:$0xff] %v7246_v27  ;;  %v6106_v30 = vld [vmem:[%s8715_s6 + $0xa0] sm:$0xff]  ;;  %v7266_v27 = vsel %vm3922_vm11, %v3956_v49, %v8724_v50 }
 0x1d4   : > { %v1290_v3 = vmul.f32 %v1220_v23, %v1044_v2  ;;  %v7248_v38 = vadd.f32 %v1716_v44, %v1569_v9  ;;  %v1721_v13 = vpop.f32.mrf.mxu3  ;;  %v6110_v40 = vld [vmem:[%s8715_s6 + $0xc0] sm:$0xff]  ;;  %v2298_v44 = vld [vmem:[#allocation2 + $0x93] sm:$0xff]  ;;  %v8754_v9 = vrot.slane %v7185_v1, 3  ;;  %8756 = vst [vmem:[#allocation27_spill] sm:$0xff] %v7266_v27  ;;  %1896 = vmatpush.bf16.msrb.mxu2 %v6106_v30 }
 0x1d5   : > { %v1440_v28 = vld [vmem:[#allocation2 + $0xf9] sm:$0xff]  ;;  %v7256_v37 = vpop.f32.mrf.mxu0  ;;  %v2326_v45 = vpack.c.bf16 %v2299_v32, %v2298_v44  ;;  %2154 = vmatpush.bf16.msrb.mxu3 %v6110_v40 }
 0x1d6   : > { %1331 = vst [vmem:[#allocation2 + $0x108] sm:$0xff] %v1290_v3  ;;  %v910_v41 = vpop.f32.mrf.mxu1  ;;  %v1460_v56 = vpack.c.bf16 %v1440_v28, %v1439_v55  ;;  %v2544_v23 = vld [vmem:[#allocation2 + $0x54] sm:$0xff]  ;;  %v1391_v2 = vpack.c.bf16 %v1290_v3, %v1289_v12  ;;  %v7261_v36 = vsel %vm3922_vm11, %v8754_v9, %v3956_v49  ;;  %v1225_v12 = vpop.permute.xlu1 %1224 }
 0x1d7   : > { %8755 = vst [vmem:[#allocation26_spill] sm:$0xff] %v7261_v36  ;;  %v911_v54 = vadd.f32 %v7130_v18, %v910_v41  ;;  %v2576_v52 = vpack.c.bf16 %v2545_v42, %v2544_v23  ;;  %v6105_v1 = vld [vmem:[%s8715_s6 + $0x98] sm:$0xff]  ;;  %v6104_v42 = vld [vmem:[%s8715_s6 + $0x90] sm:$0xff]  ;;  %v1230_v23 = vpop.permute.xlu2 %1229 }
 0x1d8   : > { %1611 = vmatmul.bf16.gmra.mxu2 %v1460_v56  ;;  %2449 = vmatmul.bf16.gmra.mxu0 %v2326_v45  ;;  %v6103_v56 = vld [vmem:[%s8715_s6 + $0x88] sm:$0xff] }
 0x1d9   : > { %vm963_vm13 = vcmp.ge.f32.partialorder %v911_v54, 0.0  ;;  %v1004_v28 = vmul.f32 0.2, %v911_v54  ;;  %2683 = vmatmul.bf16.gmra.mxu1 %v2576_v52  ;;  %1763 = vmatmul.bf16.gmra.mxu3 %v1391_v2  ;;  %v731_v52 = vadd.f32 %v6962_v19, %v6964_v7 }
 0x1da   : > { %1897 = vmatpush.bf16.msrb.mxu2 %v6105_v1 }
 0x1db   : > { %v1045_v3 = vsel %vm963_vm13, %v911_v54, %v1004_v28  ;;  %v1572_v49 = vpop.f32.mrf.mxu2  ;;  %v7284_v54 = vadd.f32 %v6962_v19, %v6976_v51  ;;  %v3960_v44 = vrot.slane %v731_v52, 3 }
 0x1dc   : > { %v1291_v55 = vmul.f32 %v1225_v12, %v1045_v3  ;;  %v7272_v41 = vadd.f32 %v1719_v62, %v1572_v49  ;;  %v1724_v32 = vpop.f32.mrf.mxu3  ;;  %v2301_v12 = vld [vmem:[#allocation2 + $0xab] sm:$0xff] }
 0x1dd   : > { %v7279_v30 = vpop.f32.mrf.mxu0  ;;  %v3962_v9 = vrot.slane %v7284_v54, 3  ;;  %v2547_v3 = vld [vmem:[#allocation2 + $0x6c] sm:$0xff]  ;;  %v1441_v51 = vld [vmem:[#allocation2 + $0x101] sm:$0xff] }
 0x1de   : > { %1332 = vst [vmem:[#allocation2 + $0x110] sm:$0xff] %v1291_v55  ;;  %v912_v45 = vpop.f32.mrf.mxu1  ;;  %1898 = vmatpush.bf16.msrb.mxu2 %v6104_v42 }
 0x1df   : > { %v913_v40 = vadd.f32 %v7130_v18, %v912_v45  ;;  %v6102_v45 = vld [vmem:[%s8715_s6 + $0x80] sm:$0xff]  ;;  %v7304_v36 = vsel %vm3922_vm11, %v3960_v44, %v3962_v9 }
 0x1e0   : > { %8759 = vst [vmem:[#allocation29_spill] sm:$0xff] %v7304_v36  ;;  %v2548_v36 = vld [vmem:[#allocation2 + $0x74] sm:$0xff] }
 0x1e1   : > { %vm964_vm14 = vcmp.ge.f32.partialorder %v913_v40, 0.0  ;;  %v1005_v62 = vmul.f32 0.2, %v913_v40 }
 0x1e2   : > { %1899 = vmatpush.bf16.msrb.mxu2 %v6103_v56  ;;  %v2546_v56 = vld [vmem:[#allocation2 + $0x64] sm:$0xff] }
 0x1e3   : > { %v1046_v7 = vsel %vm964_vm14, %v913_v40, %v1005_v62  ;;  %v1574_v2 = vpop.f32.mrf.mxu2  ;;  %v2300_v62 = vld [vmem:[#allocation2 + $0xa3] sm:$0xff]  ;;  %v2577_v27 = vpack.c.bf16 %v2547_v3, %v2546_v56 }
 0x1e4   : > { %v1292_v28 = vmul.f32 %v1230_v23, %v1046_v7  ;;  %v7290_v1 = vadd.f32 %v1721_v13, %v1574_v2  ;;  %v1726_v42 = vpop.f32.mrf.mxu3  ;;  %v8757_v13 = vrot.slane %v7229_v24, 3  ;;  %v2327_v2 = vpack.c.bf16 %v2301_v12, %v2300_v62 }
 0x1e5   : > { %v1442_v49 = vld [vmem:[#allocation2 + $0x109] sm:$0xff]  ;;  %v7295_v50 = vpop.f32.mrf.mxu0  ;;  %v736_v12 = vadd.f32 %v6962_v19, %v6990_v10 }
 0x1e6   : > { %1333 = vst [vmem:[#allocation2 + $0x118] sm:$0xff] %v1292_v28  ;;  %v915_v52 = vpop.f32.mrf.mxu1  ;;  %v1461_v40 = vpack.c.bf16 %v1442_v49, %v1441_v51  ;;  %v1392_v54 = vpack.c.bf16 %v1292_v28, %v1291_v55  ;;  %v7300_v23 = vsel %vm3922_vm11, %v8757_v13, %v3960_v44  ;;  %1900 = vmatpush.bf16.msrb.mxu2 %v6102_v45  ;;  %v1235_v55 = vpop.permute.xlu0 %1234 }
 0x1e7   : > { %8758 = vst [vmem:[#allocation28_spill] sm:$0xff] %v7300_v23  ;;  %v916_v7 = vadd.f32 %v7130_v18, %v915_v52  ;;  %v3964_v52 = vrot.slane %v736_v12, 3  ;;  %v2302_v12 = vld [vmem:[#allocation2 + $0xb3] sm:$0xff] }
 0x1e8   : > { %1616 = vmatmul.bf16.gmra.mxu2 %v1461_v40  ;;  %2454 = vmatmul.bf16.gmra.mxu0 %v2327_v2  ;;  %v1240_v40 = vpop.permute.xlu1 %1239  ;;  %v2549_v2 = vld [vmem:[#allocation2 + $0x7c] sm:$0xff] }
 0x1e9   : > { %vm965_vm15 = vcmp.ge.f32.partialorder %v916_v7, 0.0  ;;  %v1006_v34 = vmul.f32 0.2, %v916_v7  ;;  %2688 = vmatmul.bf16.gmra.mxu1 %v2577_v27  ;;  %1768 = vmatmul.bf16.gmra.mxu3 %v1392_v54  ;;  %v7315_v27 = vadd.f32 %v6962_v19, %v7006_v31 }
 0x1eb   : > { %v1047_v28 = vsel %vm965_vm15, %v916_v7, %v1006_v34  ;;  %v1577_v24 = vpop.f32.mrf.mxu2  ;;  %v8725_v56 = vrot.slane %v7315_v27, 3  ;;  %v2303_v7 = vld [vmem:[#allocation2 + $0xbb] sm:$0xff] }
 0x1ec   : > { %v1293_v51 = vmul.f32 %v1235_v55, %v1047_v28  ;;  %v7306_v49 = vadd.f32 %v1724_v32, %v1577_v24  ;;  %v1729_v13 = vpop.f32.mrf.mxu3 }
 0x1ed   : > { %v7310_v45 = vpop.f32.mrf.mxu0  ;;  %v1443_v55 = vld [vmem:[#allocation2 + $0x111] sm:$0xff] }
 0x1ee   : > { %1334 = vst [vmem:[#allocation2 + $0x120] sm:$0xff] %v1293_v51  ;;  %v917_v3 = vpop.f32.mrf.mxu1  ;;  %v2029_v51 = vld [vmem:[#allocation2 + $0x1a] sm:$0xff] }
 0x1ef   : > { %v918_v44 = vadd.f32 %v7130_v18, %v917_v3 }
 0x1f1   : > { %vm966_vm1 = vcmp.ge.f32.partialorder %v918_v44, 0.0  ;;  %v1007_v34 = vmul.f32 0.2, %v918_v44 }
 0x1f3   : > { %v1048_v32 = vsel %vm966_vm1, %v918_v44, %v1007_v34  ;;  %v1579_v62 = vpop.f32.mrf.mxu2  ;;  %v7323_v44 = vsel %vm3922_vm11, %v3962_v9, %v3964_v52  ;;  %v1245_v9 = vpop.permute.xlu2 %1244 }
 0x1f4   : > { %v1294_v54 = vmul.f32 %v1240_v40, %v1048_v32  ;;  %v7318_v10 = vadd.f32 %v1726_v42, %v1579_v62  ;;  %v1731_v24 = vpop.f32.mrf.mxu3  ;;  %8761 = vst [vmem:[#allocation31_spill] sm:$0xff] %v7323_v44  ;;  %v2328_v42 = vpack.c.bf16 %v2303_v7, %v2302_v12  ;;  %v2578_v40 = vpack.c.bf16 %v2549_v2, %v2548_v36  ;;  %v2028_v32 = vld [vmem:[#allocation2 + $0x12] sm:$0xff]  ;;  %v1774_v44 = vld [vmem:[#allocation2 + $0x2] sm:$0xff] }
 0x1f5   : > { %v1444_v28 = vld [vmem:[#allocation2 + $0x119] sm:$0xff]  ;;  %v7320_v31 = vpop.f32.mrf.mxu0  ;;  %v7326_v62 = vpack.c.bf16 %v2029_v51, %v2028_v32  ;;  %v1250_v32 = vpop.permute.xlu0 %1249 }
 0x1f6   : > { %1335 = vst [vmem:[#allocation2 + $0x128] sm:$0xff] %v1294_v54  ;;  %v920_v19 = vpop.f32.mrf.mxu1  ;;  %v1462_v3 = vpack.c.bf16 %v1444_v28, %v1443_v55  ;;  %v7331_v54 = vsel %vm3922_vm11, %v3964_v52, %v8725_v56  ;;  %v7339_v51 = vld [vmem:[%s8712_s3] ss:$0 sm:$0xff] }
 0x1f7   : > { %8760 = vst [vmem:[#allocation30_spill] sm:$0xff] %v7320_v31  ;;  %v921_v34 = vadd.f32 %v7130_v18, %v920_v19  ;;  %v741_v52 = vadd.f32 %v7339_v51, %v7027_v16  ;;  %v2305_v16 = vld [vmem:[#allocation2 + $0xcb] sm:$0xff] }
 0x1f8   : > { %1621 = vmatmul.bf16.gmra.mxu2 %v1462_v3  ;;  %8762 = vst [vmem:[#allocation32_spill] sm:$0xff] %v7331_v54  ;;  %2459 = vmatmul.bf16.gmra.mxu0 %v2328_v42 }
 0x1f9   : > { %vm967_vm2 = vcmp.ge.f32.partialorder %v921_v34, 0.0  ;;  %v1008_v55 = vmul.f32 0.2, %v921_v34  ;;  %2693 = vmatmul.bf16.gmra.mxu1 %v2578_v40  ;;  %2155 = vmatmul.bf16.vlgmr.msrb.gmra.mxu3 %v7326_v62  ;;  %v3968_v40 = vrot.slane %v741_v52, 3  ;;  %v2550_v52 = vld [vmem:[#allocation2 + $0x84] sm:$0xff] }
 0x1fb   : > { %v1049_v28 = vsel %vm967_vm2, %v921_v34, %v1008_v55  ;;  %v1582_v19 = vpop.f32.mrf.mxu2  ;;  %v744_v34 = vadd.f32 %v7339_v51, %v7045_v39 }
 0x1fc   : > { %v1295_v7 = vmul.f32 %v1245_v9, %v1049_v28  ;;  %v7334_v36 = vadd.f32 %v1729_v13, %v1582_v19  ;;  %v1734_v2 = vpop.f32.mrf.mxu3  ;;  %v1775_v28 = vld [vmem:[#allocation2 + $0xa] sm:$0xff] }
 0x1fd   : > { %v7343_v12 = vpop.f32.mrf.mxu0  ;;  %v3970_v19 = vrot.slane %v744_v34, 3  ;;  %v1810_v39 = vpack.c.bf16 %v1775_v28, %v1774_v44  ;;  %v2329_v34 = vpack.c.bf16 %v2305_v16, %v2304_v63  ;;  %v1255_v44 = vpop.permute.xlu1 %1254  ;;  %v746_v63 = vadd.f32 %v7339_v51, %v7063_v35  ;;  %v2552_v35 = vld [vmem:[#allocation2 + $0x94] sm:$0xff] }
 0x1fe   : > { %1336 = vst [vmem:[#allocation2 + $0x130] sm:$0xff] %v1295_v7  ;;  %v922_v3 = vpop.f32.mrf.mxu1  ;;  %v2551_v7 = vld [vmem:[#allocation2 + $0x8c] sm:$0xff] }
 0x1ff   : > { %8763 = vst [vmem:[#allocation33_spill] sm:$0xff] %v7343_v12  ;;  %v923_v42 = vadd.f32 %v7130_v18, %v922_v3 }
 0x201   : > { %vm968_vm3 = vcmp.ge.f32.partialorder %v923_v42, 0.0  ;;  %v1009_v13 = vmul.f32 0.2, %v923_v42 }
 0x203   : > { %v1050_v55 = vsel %vm968_vm3, %v923_v42, %v1009_v13  ;;  %v1584_v9 = vpop.f32.mrf.mxu2  ;;  %v8765_v42 = vrot.slane %v7315_v27, 3 }
 0x204   : > { %v1296_v56 = vmul.f32 %v1250_v32, %v1050_v55  ;;  %v7348_v54 = vadd.f32 %v1731_v24, %v1584_v9  ;;  %v1736_v23 = vpop.f32.mrf.mxu3  ;;  %v2579_v32 = vpack.c.bf16 %v2551_v7, %v2550_v52  ;;  %v2030_v55 = vld [vmem:[#allocation2 + $0x22] sm:$0xff]  ;;  %v3972_v7 = vrot.slane %v746_v63, 3 }
 0x205   : > { %v7350_v47 = vpop.f32.mrf.mxu0  ;;  %v7355_v13 = vsel %vm3922_vm11, %v8765_v42, %v3968_v40  ;;  %v2065_v9 = vpack.c.bf16 %v2031_v53, %v2030_v55  ;;  %v2306_v55 = vld [vmem:[#allocation2 + $0xd3] sm:$0xff] }
 0x206   : > { %1337 = vst [vmem:[#allocation2 + $0x138] sm:$0xff] %v1296_v56  ;;  %v925_v3 = vpop.f32.mrf.mxu1  ;;  %v7359_v56 = vsel %vm3922_vm11, %v3968_v40, %v3970_v19  ;;  %v749_v40 = vadd.f32 %v7339_v51, %v7075_v61 }
 0x207   : > { %8764 = vst [vmem:[#allocation34_spill] sm:$0xff] %v7350_v47  ;;  %v926_v24 = vadd.f32 %v7130_v18, %v925_v3 }
 0x208   : > { %8766 = vst [vmem:[#allocation35_spill] sm:$0xff] %v7355_v13  ;;  %1901 = vmatmul.bf16.vlgmr.msrb.gmra.mxu2 %v1810_v39  ;;  %2464 = vmatmul.bf16.gmra.mxu0 %v2329_v34  ;;  %v3974_v3 = vrot.slane %v749_v40, 3  ;;  %v2033_v34 = vld [vmem:[#allocation2 + $0x3a] sm:$0xff] }
 0x209   : > { %8767 = vst [vmem:[#allocation36_spill] sm:$0xff] %v7359_v56  ;;  %vm969_vm0 = vcmp.ge.f32.partialorder %v926_v24, 0.0  ;;  %v1010_v60 = vmul.f32 0.2, %v926_v24  ;;  %2698 = vmatmul.bf16.gmra.mxu1 %v2579_v32  ;;  %2160 = vmatmul.bf16.gmra.mxu3 %v2065_v9 }
 0x20a   : > { %v7377_v61 = vsel %vm3922_vm11, %v3972_v7, %v3974_v3 }
 0x20b   : > { %v1051_v27 = vsel %vm969_vm0, %v926_v24, %v1010_v60  ;;  %v1587_v28 = vpop.f32.mrf.mxu2  ;;  %v2307_v60 = vld [vmem:[#allocation2 + $0xdb] sm:$0xff]  ;;  %8771 = vst [vmem:[#allocation40_spill] sm:$0xff] %v7377_v61 }
 0x20c   : > { %v1297_v42 = vmul.f32 %v1255_v44, %v1051_v27  ;;  %v7361_v13 = vadd.f32 %v1734_v2, %v1587_v28  ;;  %v1739_v18 = vpop.f32.mrf.mxu3  ;;  %v2553_v24 = vld [vmem:[#allocation2 + $0x9c] sm:$0xff]  ;;  %v7374_v44 = vsel %vm3922_vm11, %v3970_v19, %v3972_v7  ;;  %v2330_v27 = vpack.c.bf16 %v2307_v60, %v2306_v55 }
 0x20d   : > { %v7365_v16 = vpop.f32.mrf.mxu0  ;;  %8770 = vst [vmem:[#allocation39_spill] sm:$0xff] %v7374_v44  ;;  %v2580_v28 = vpack.c.bf16 %v2553_v24, %v2552_v35  ;;  %v751_v19 = vadd.f32 %v7339_v51, %v7088_v46  ;;  %v2555_v35 = vld [vmem:[#allocation2 + $0xac] sm:$0xff] }
 0x20e   : > { %1338 = vst [vmem:[#allocation2 + $0x140] sm:$0xff] %v1297_v42  ;;  %v927_v53 = vpop.f32.mrf.mxu1  ;;  %v2032_v42 = vld [vmem:[#allocation2 + $0x32] sm:$0xff] }
 0x20f   : > { %8768 = vst [vmem:[#allocation37_spill] sm:$0xff] %v7365_v16  ;;  %v3976_v7 = vrot.slane %v751_v19, 3 }
 0x211   : > { %v7393_v46 = vsel %vm3922_vm11, %v3974_v3, %v3976_v7  ;;  %v759_v3 = vadd.f32 %v7339_v51, %v7125_v20 }
 0x212   : > { %8774 = vst [vmem:[#allocation43_spill] sm:$0xff] %v7393_v46 }
 0x213   : > { %v1589_v39 = vpop.f32.mrf.mxu2 }
 0x214   : > { %v7369_v52 = vadd.f32 %v1736_v23, %v1589_v39  ;;  %v1741_v2 = vpop.f32.mrf.mxu3  ;;  %v2066_v23 = vpack.c.bf16 %v2033_v34, %v2032_v42  ;;  %v754_v39 = vadd.f32 %v7339_v51, %v7100_v22  ;;  %v2309_v34 = vld [vmem:[#allocation2 + $0xeb] sm:$0xff]  ;;  %v2308_v42 = vld [vmem:[#allocation2 + $0xe3] sm:$0xff] }
 0x215   : > { %v7371_v32 = vpop.f32.mrf.mxu0  ;;  %v2331_v61 = vpack.c.bf16 %v2309_v34, %v2308_v42 }
 0x216   : > { %8769 = vst [vmem:[#allocation38_spill] sm:$0xff] %v7371_v32  ;;  %v3978_v24 = vrot.slane %v754_v39, 3  ;;  %v2034_v39 = vld [vmem:[#allocation2 + $0x42] sm:$0xff]  ;;  %v7422_v46 = vpop.f32.mrf.mxu1 }
 0x218   : > { %1906 = vmatmul.bf16.gmra.mxu2 %v7326_v62  ;;  %2469 = vmatmul.bf16.gmra.mxu0 %v2330_v27  ;;  %v7396_v22 = vsel %vm3922_vm11, %v3976_v7, %v3978_v24 }
 0x219   : > { %2703 = vmatmul.bf16.gmra.mxu1 %v2580_v28  ;;  %2165 = vmatmul.bf16.gmra.mxu3 %v2066_v23  ;;  %v2035_v28 = vld [vmem:[#allocation2 + $0x4a] sm:$0xff]  ;;  %8775 = vst [vmem:[#allocation44_spill] sm:$0xff] %v7396_v22 }
 0x21b   : > { %v1592_v63 = vpop.f32.mrf.mxu2 }
 0x21c   : > { %v7380_v53 = vadd.f32 %v1739_v18, %v1592_v63  ;;  %v1744_v40 = vpop.f32.mrf.mxu3  ;;  %v2554_v63 = vld [vmem:[#allocation2 + $0xa4] sm:$0xff] }
 0x21d   : > { %v7386_v60 = vpop.f32.mrf.mxu0  ;;  %v2581_v19 = vpack.c.bf16 %v2555_v35, %v2554_v63  ;;  %v3982_v35 = vrot.slane %v759_v3, 3  ;;  %v2036_v3 = vld [vmem:[#allocation2 + $0x52] sm:$0xff] }
 0x21e   : > { %8772 = vst [vmem:[#allocation41_spill] sm:$0xff] %v7386_v60 }
 0x223   : > { %v1594_v55 = vpop.f32.mrf.mxu2 }
 0x224   : > { %v7388_v62 = vadd.f32 %v1741_v2, %v1594_v55  ;;  %v1746_v27 = vpop.f32.mrf.mxu3  ;;  %v2067_v2 = vpack.c.bf16 %v2035_v28, %v2034_v39  ;;  %v2557_v28 = vld [vmem:[#allocation2 + $0xbc] sm:$0xff]  ;;  %v2310_v39 = vld [vmem:[#allocation2 + $0xf3] sm:$0xff] }
 0x225   : > { %v7390_v18 = vpop.f32.mrf.mxu0 }
 0x226   : > { %8773 = vst [vmem:[#allocation42_spill] sm:$0xff] %v7390_v18  ;;  %v756_v18 = vadd.f32 %v7339_v51, %v7113_v48 }
 0x228   : > { %1911 = vmatmul.bf16.gmra.mxu2 %v2065_v9  ;;  %2474 = vmatmul.bf16.gmra.mxu0 %v2331_v61  ;;  %v3980_v34 = vrot.slane %v756_v18, 3  ;;  %v2311_v61 = vld [vmem:[#allocation2 + $0xfb] sm:$0xff] }
 0x229   : > { %2708 = vmatmul.bf16.gmra.mxu1 %v2581_v19  ;;  %2170 = vmatmul.bf16.gmra.mxu3 %v2067_v2  ;;  %v2037_v19 = vld [vmem:[#allocation2 + $0x5a] sm:$0xff]  ;;  %v2332_v22 = vpack.c.bf16 %v2311_v61, %v2310_v39  ;;  %v6155_v39 = vld [vmem:[%s8715_s6 + $0x228] sm:$0xff] }
 0x22a   : > { %v7411_v48 = vsel %vm3922_vm11, %v3978_v24, %v3980_v34  ;;  %v7414_v20 = vsel %vm3922_vm11, %v3980_v34, %v3982_v35 }
 0x22b   : > { %v1597_v55 = vpop.f32.mrf.mxu2  ;;  %8778 = vst [vmem:[#allocation47_spill] sm:$0xff] %v7411_v48 }
 0x22c   : > { %v7398_v44 = vadd.f32 %v1744_v40, %v1597_v55  ;;  %v1749_v56 = vpop.f32.mrf.mxu3  ;;  %v2556_v55 = vld [vmem:[#allocation2 + $0xb4] sm:$0xff]  ;;  %8779 = vst [vmem:[#allocation48_spill] sm:$0xff] %v7414_v20  ;;  %v2039_v20 = vld [vmem:[#allocation2 + $0x6a] sm:$0xff] }
 0x22d   : > { %v7404_v7 = vpop.f32.mrf.mxu0  ;;  %v2582_v18 = vpack.c.bf16 %v2557_v28, %v2556_v55 }
 0x22e   : > { %8776 = vst [vmem:[#allocation45_spill] sm:$0xff] %v7404_v7 }
 0x233   : > { %v1599_v42 = vpop.f32.mrf.mxu2 }
 0x234   : > { %v7406_v9 = vadd.f32 %v1746_v27, %v1599_v42  ;;  %v1751_v63 = vpop.f32.mrf.mxu3  ;;  %v7416_v27 = vpack.c.bf16 %v2037_v19, %v2036_v3  ;;  %v6157_v42 = vld [vmem:[%s8715_s6 + $0x238] sm:$0xff]  ;;  %v6156_v19 = vld [vmem:[%s8715_s6 + $0x230] sm:$0xff] }
 0x235   : > { %v7408_v40 = vpop.f32.mrf.mxu0  ;;  %3417 = vmatpush.bf16.msra.mxu0 %v6157_v42  ;;  %v2559_v42 = vld [vmem:[#allocation2 + $0xcc] sm:$0xff] }
 0x236   : > { %8777 = vst [vmem:[#allocation46_spill] sm:$0xff] %v7408_v40  ;;  %v6154_v40 = vld [vmem:[%s8715_s6 + $0x220] sm:$0xff] }
 0x238   : > { %1916 = vmatmul.bf16.gmra.mxu2 %v2066_v23  ;;  %2479 = vmatmul.bf16.gmra.mxu0 %v2332_v22  ;;  %v761_v23 = vadd.f32 %v7339_v51, %v7145_v59  ;;  %v764_v22 = vadd.f32 %v7339_v51, %v7157_v33  ;;  %v2313_v59 = vld [vmem:[#allocation2 + $0x10b] sm:$0xff]  ;;  %v7440_v33 = vpop.f32.mrf.mxu1 }
 0x239   : > { %2713 = vmatmul.bf16.gmra.mxu1 %v2582_v18  ;;  %2175 = vmatmul.bf16.gmra.mxu3 %v7416_v27 }
 0x23a   : > { %3418 = vmatpush.bf16.msra.mxu0 %v6156_v19  ;;  %v3986_v55 = vrot.slane %v764_v22, 3  ;;  %v2558_v19 = vld [vmem:[#allocation2 + $0xc4] sm:$0xff] }
 0x23b   : > { %v1602_v24 = vpop.f32.mrf.mxu2 }
 0x23c   : > { %v7424_v34 = vadd.f32 %v1749_v56, %v1602_v24  ;;  %v1754_v61 = vpop.f32.mrf.mxu3  ;;  %v3984_v56 = vrot.slane %v761_v23, 3 }
 0x23d   : > { %v7430_v28 = vpop.f32.mrf.mxu0 }
 0x23e   : > { %8780 = vst [vmem:[#allocation49_spill] sm:$0xff] %v7430_v28  ;;  %3419 = vmatpush.bf16.msra.mxu0 %v6155_v39  ;;  %v2312_v28 = vld [vmem:[#allocation2 + $0x103] sm:$0xff]  ;;  %v7448_v23 = vsel %vm3922_vm11, %v3982_v35, %v3984_v56  ;;  %v2583_v39 = vpack.c.bf16 %v2559_v42, %v2558_v19  ;;  %v2315_v42 = vld [vmem:[#allocation2 + $0x11b] sm:$0xff] }
 0x23f   : > { %8782 = vst [vmem:[#allocation51_spill] sm:$0xff] %v7448_v23  ;;  %v2333_v22 = vpack.c.bf16 %v2313_v59, %v2312_v28  ;;  %v766_v28 = vadd.f32 %v7339_v51, %v7180_v4  ;;  %v2041_v19 = vld [vmem:[#allocation2 + $0x7a] sm:$0xff] }
 0x242   : > { %3420 = vmatpush.bf16.msra.mxu0 %v6154_v40  ;;  %v6152_v40 = vld [vmem:[%s8715_s6 + $0x210] sm:$0xff] }
 0x243   : > { %v1604_v18 = vpop.f32.mrf.mxu2 }
 0x244   : > { %v7438_v3 = vadd.f32 %v1751_v63, %v1604_v18  ;;  %v1756_v24 = vpop.f32.mrf.mxu3  ;;  %v7451_v63 = vsel %vm3922_vm11, %v3984_v56, %v3986_v55  ;;  %v2038_v18 = vld [vmem:[#allocation2 + $0x62] sm:$0xff]  ;;  %v7467_v56 = vpop.f32.mrf.mxu1 }
 0x245   : > { %v7442_v48 = vpop.f32.mrf.mxu0  ;;  %8783 = vst [vmem:[#allocation52_spill] sm:$0xff] %v7451_v63  ;;  %v2069_v7 = vpack.c.bf16 %v2039_v20, %v2038_v18  ;;  %v2560_v18 = vld [vmem:[#allocation2 + $0xd4] sm:$0xff] }
 0x246   : > { %8781 = vst [vmem:[#allocation50_spill] sm:$0xff] %v7442_v48  ;;  %v6153_v48 = vld [vmem:[%s8715_s6 + $0x218] sm:$0xff] }
 0x247   : > { %3421 = vmatpush.bf16.msra.mxu0 %v6153_v48  ;;  %v3988_v48 = vrot.slane %v766_v28, 3 }
 0x248   : > { %1921 = vmatmul.bf16.gmra.mxu2 %v2067_v2  ;;  %2484 = vmatmul.bf16.gmra.mxu0 %v2333_v22  ;;  %v769_v2 = vadd.f32 %v7339_v51, %v7196_v6  ;;  %v2561_v6 = vld [vmem:[#allocation2 + $0xdc] sm:$0xff] }
 0x249   : > { %2718 = vmatmul.bf16.gmra.mxu1 %v2583_v39  ;;  %2180 = vmatmul.bf16.gmra.mxu3 %v2069_v7  ;;  %v2314_v39 = vld [vmem:[#allocation2 + $0x113] sm:$0xff]  ;;  %v7480_v63 = vsel %vm3922_vm11, %v3986_v55, %v3988_v48 }
 0x24a   : > { %8786 = vst [vmem:[#allocation55_spill] sm:$0xff] %v7480_v63 }
 0x24b   : > { %v1607_v60 = vpop.f32.mrf.mxu2  ;;  %3422 = vmatpush.bf16.msra.mxu0 %v6152_v40  ;;  %v6150_v40 = vld [vmem:[%s8715_s6 + $0x200] sm:$0xff] }
 0x24c   : > { %v7456_v32 = vadd.f32 %v1754_v61, %v1607_v60  ;;  %v1759_v35 = vpop.f32.mrf.mxu3  ;;  %v6151_v60 = vld [vmem:[%s8715_s6 + $0x208] sm:$0xff]  ;;  %v3990_v61 = vrot.slane %v769_v2, 3  ;;  %v2584_v2 = vpack.c.bf16 %v2561_v6, %v2560_v18  ;;  %v7486_v23 = vpop.f32.mrf.mxu1 }
 0x24d   : > { %v7462_v20 = vpop.f32.mrf.mxu0  ;;  %v2043_v18 = vld [vmem:[#allocation2 + $0x8a] sm:$0xff] }
 0x24e   : > { %8784 = vst [vmem:[#allocation53_spill] sm:$0xff] %v7462_v20  ;;  %v7483_v28 = vsel %vm3922_vm11, %v3988_v48, %v3990_v61 }
 0x24f   : > { %3423 = vmatpush.bf16.msra.mxu0 %v6151_v60  ;;  %8787 = vst [vmem:[#allocation56_spill] sm:$0xff] %v7483_v28 }
 0x253   : > { %v1609_v59 = vpop.f32.mrf.mxu2  ;;  %3424 = vmatpush.bf16.msra.mxu0 %v6150_v40  ;;  %v2316_v40 = vld [vmem:[#allocation2 + $0x123] sm:$0xff] }
 0x254   : > { %v7472_v4 = vadd.f32 %v1756_v24, %v1609_v59  ;;  %v1761_v51 = vpop.f32.mrf.mxu3  ;;  %v2334_v24 = vpack.c.bf16 %v2315_v42, %v2314_v39  ;;  %v2040_v59 = vld [vmem:[#allocation2 + $0x72] sm:$0xff]  ;;  %v7492_v48 = vpop.f32.mrf.mxu1 }
 0x255   : > { %v7474_v22 = vpop.f32.mrf.mxu0  ;;  %v2070_v60 = vpack.c.bf16 %v2041_v19, %v2040_v59  ;;  %8789 = vst [vmem:[#allocation58_spill] sm:$0xff] %v7492_v48  ;;  %v2317_v39 = vld [vmem:[#allocation2 + $0x12b] sm:$0xff] }
 0x256   : > { %8785 = vst [vmem:[#allocation54_spill] sm:$0xff] %v7474_v22  ;;  %v2562_v59 = vld [vmem:[#allocation2 + $0xe4] sm:$0xff] }
 0x258   : > { %1926 = vmatmul.bf16.gmra.mxu2 %v7416_v27  ;;  %2489 = vmatmul.bf16.gmra.mxu0 %v2334_v24  ;;  %v2563_v27 = vld [vmem:[#allocation2 + $0xec] sm:$0xff]  ;;  %v8790_v24 = vrot.slane %v7232_v29, 3 }
 0x259   : > { %2723 = vmatmul.bf16.gmra.mxu1 %v2584_v2  ;;  %2185 = vmatmul.bf16.gmra.mxu3 %v2070_v60  ;;  %v2585_v28 = vpack.c.bf16 %v2563_v27, %v2562_v59 }
 0x25a   : > { %v7499_v2 = vsel %vm3922_vm11, %v3990_v61, %v8790_v24 }
 0x25b   : > { %v1612_v22 = vpop.f32.mrf.mxu2  ;;  %8791 = vst [vmem:[#allocation59_spill] sm:$0xff] %v7499_v2  ;;  %v2565_v2 = vld [vmem:[#allocation2 + $0xfc] sm:$0xff] }
 0x25c   : > { %v7488_v20 = vadd.f32 %v1759_v35, %v1612_v22  ;;  %v1764_v55 = vpop.f32.mrf.mxu3  ;;  %v2335_v22 = vpack.c.bf16 %v2317_v39, %v2316_v40  ;;  %v7505_v47 = vpop.f32.mrf.mxu1  ;;  %v3299_v39 = vld [vmem:[#allocation2 + $0x2e] sm:$0xff]  ;;  %v2045_v40 = vld [vmem:[#allocation2 + $0x9a] sm:$0xff] }
 0x25d   : > { %v7490_v63 = vpop.f32.mrf.mxu0  ;;  %8793 = vst [vmem:[#allocation61_spill] sm:$0xff] %v7505_v47 }
 0x25e   : > { %8788 = vst [vmem:[#allocation57_spill] sm:$0xff] %v7490_v63  ;;  %v2042_v63 = vld [vmem:[#allocation2 + $0x82] sm:$0xff] }
 0x25f   : > { %v2071_v16 = vpack.c.bf16 %v2043_v18, %v2042_v63  ;;  %v3298_v63 = vld [vmem:[#allocation2 + $0x26] sm:$0xff] }
 0x260   : > { %v3334_v59 = vpack.c.bf16 %v3299_v39, %v3298_v63  ;;  %v3300_v63 = vld [vmem:[#allocation2 + $0x36] sm:$0xff] }
 0x263   : > { %v1614_v42 = vpop.f32.mrf.mxu2 }
 0x264   : > { %v7494_v6 = vadd.f32 %v1761_v51, %v1614_v42  ;;  %v1766_v19 = vpop.f32.mrf.mxu3  ;;  %v7511_v18 = vpop.f32.mrf.mxu1 }
 0x265   : > { %v7501_v35 = vpop.f32.mrf.mxu0  ;;  %8795 = vst [vmem:[#allocation63_spill] sm:$0xff] %v7511_v18  ;;  %v2567_v18 = vld [vmem:[#allocation2 + $0x10c] sm:$0xff] }
 0x266   : > { %8792 = vst [vmem:[#allocation60_spill] sm:$0xff] %v7501_v35 }
 0x268   : > { %1931 = vmatmul.bf16.gmra.mxu2 %v2069_v7  ;;  %2494 = vmatmul.bf16.gmra.mxu0 %v2335_v22  ;;  %v2564_v7 = vld [vmem:[#allocation2 + $0xf4] sm:$0xff] }
 0x269   : > { %2728 = vmatmul.bf16.gmra.mxu1 %v2585_v28  ;;  %2190 = vmatmul.bf16.gmra.mxu3 %v2071_v16  ;;  %v2586_v28 = vpack.c.bf16 %v2565_v2, %v2564_v7  ;;  %v3301_v2 = vld [vmem:[#allocation2 + $0x3e] sm:$0xff] }
 0x26a   : > { %v2566_v7 = vld [vmem:[#allocation2 + $0x104] sm:$0xff] }
 0x26b   : > { %v1617_v51 = vpop.f32.mrf.mxu2 }
 0x26c   : > { %v7503_v42 = vadd.f32 %v1764_v55, %v1617_v51  ;;  %v1769_v12 = vpop.f32.mrf.mxu3  ;;  %v2044_v55 = vld [vmem:[#allocation2 + $0x92] sm:$0xff]  ;;  %v7517_v35 = vpop.f32.mrf.mxu1 }
 0x26d   : > { %v7507_v29 = vpop.f32.mrf.mxu0  ;;  %v2072_v22 = vpack.c.bf16 %v2045_v40, %v2044_v55  ;;  %8797 = vst [vmem:[#allocation65_spill] sm:$0xff] %v7517_v35  ;;  %v2047_v40 = vld [vmem:[#allocation2 + $0xaa] sm:$0xff]  ;;  %v2046_v55 = vld [vmem:[#allocation2 + $0xa2] sm:$0xff] }
 0x26e   : > { %8794 = vst [vmem:[#allocation62_spill] sm:$0xff] %v7507_v29 }
 0x273   : > { %v1619_v61 = vpop.f32.mrf.mxu2 }
 0x274   : > { %v7509_v24 = vadd.f32 %v1766_v19, %v1619_v61  ;;  %v1771_v27 = vpop.f32.mrf.mxu3 }
 0x275   : > { %v7513_v51 = vpop.f32.mrf.mxu0 }
 0x276   : > { %8796 = vst [vmem:[#allocation64_spill] sm:$0xff] %v7513_v51 }
 0x278   : > { %1936 = vmatmul.bf16.gmra.mxu2 %v2070_v60  ;;  %3425 = vmatmul.bf16.vlgmr.msra.gmra.mxu0 %v3334_v59  ;;  %v3335_v59 = vpack.c.bf16 %v3301_v2, %v3300_v63  ;;  %v2569_v2 = vld [vmem:[#allocation2 + $0x11c] sm:$0xff] }
 0x279   : > { %2733 = vmatmul.bf16.gmra.mxu1 %v2586_v28  ;;  %2195 = vmatmul.bf16.gmra.mxu3 %v2072_v22  ;;  %v2587_v28 = vpack.c.bf16 %v2567_v18, %v2566_v7  ;;  %v3303_v7 = vld [vmem:[#allocation2 + $0x4e] sm:$0xff]  ;;  %v2049_v63 = vld [vmem:[#allocation2 + $0xba] sm:$0xff] }
 0x27b   : > { %v1622_v19 = vpop.f32.mrf.mxu2 }
 0x27c   : > { %v7515_v61 = vadd.f32 %v1769_v12, %v1622_v19  ;;  %v2156_v29 = vpop.f32.mrf.mxu3  ;;  %v2073_v12 = vpack.c.bf16 %v2047_v40, %v2046_v55  ;;  %v7523_v19 = vpop.f32.mrf.mxu1  ;;  %v3302_v55 = vld [vmem:[#allocation2 + $0x46] sm:$0xff] }
 0x27d   : > { %v7521_v39 = vpop.f32.mrf.mxu0  ;;  %8799 = vst [vmem:[#allocation67_spill] sm:$0xff] %v7523_v19 }
 0x27e   : > { %8798 = vst [vmem:[#allocation66_spill] sm:$0xff] %v7521_v39 }
 0x283   : > { %v1624_v47 = vpop.f32.mrf.mxu2 }
 0x284   : > { %v7519_v48 = vadd.f32 %v1771_v27, %v1624_v47  ;;  %v2158_v60 = vpop.f32.mrf.mxu3 }
 0x285   : > { %v7528_v39 = vpop.f32.mrf.mxu0 }
 0x286   : > { %8800 = vst [vmem:[#allocation68_spill] sm:$0xff] %v7528_v39 }
 0x288   : > { %1941 = vmatmul.bf16.gmra.mxu2 %v2071_v16  ;;  %3430 = vmatmul.bf16.gmra.mxu0 %v3335_v59  ;;  %v7531_v16 = vpop.f32.mrf.mxu1  ;;  %v2568_v59 = vld [vmem:[#allocation2 + $0x114] sm:$0xff] }
 0x289   : > { %2738 = vmatmul.bf16.gmra.mxu1 %v2587_v28  ;;  %2200 = vmatmul.bf16.gmra.mxu3 %v2073_v12  ;;  %8801 = vst [vmem:[#allocation69_spill] sm:$0xff] %v7531_v16  ;;  %v2588_v19 = vpack.c.bf16 %v2569_v2, %v2568_v59 }
 0x28b   : > { %v1902_v47 = vpop.f32.mrf.mxu2 }
 0x28c   : > { %v1992_v27 = vadd.f32 %v1902_v47, %v7025_v58  ;;  %v2161_v51 = vpop.f32.mrf.mxu3  ;;  %v3336_v58 = vpack.c.bf16 %v3303_v7, %v3302_v55  ;;  %v2048_v47 = vld [vmem:[#allocation2 + $0xb2] sm:$0xff]  ;;  %v2051_v55 = vld [vmem:[#allocation2 + $0xca] sm:$0xff] }
 0x28e   : > { %v7526_v35 = vadd.f32 %v2156_v29, %v1992_v27  ;;  %v2074_v29 = vpack.c.bf16 %v2049_v63, %v2048_v47  ;;  %v7535_v27 = vpop.f32.mrf.mxu0  ;;  %v3305_v63 = vld [vmem:[#allocation2 + $0x5e] sm:$0xff]  ;;  %v3304_v47 = vld [vmem:[#allocation2 + $0x56] sm:$0xff] }
 0x28f   : > { %8802 = vst [vmem:[#allocation70_spill] sm:$0xff] %v7535_v27 }
 0x293   : > { %v1904_v31 = vpop.f32.mrf.mxu2 }
 0x294   : > { %v1993_v18 = vadd.f32 %v1904_v31, %v7042_v25  ;;  %v2163_v40 = vpop.f32.mrf.mxu3 }
 0x296   : > { %v7533_v28 = vadd.f32 %v2158_v60, %v1993_v18  ;;  %v7540_v60 = vpop.f32.mrf.mxu1  ;;  %v7542_v18 = vpop.f32.mrf.mxu0 }
 0x297   : > { %8803 = vst [vmem:[#allocation71_spill] sm:$0xff] %v7540_v60 }
 0x298   : > { %1946 = vmatmul.bf16.gmra.mxu2 %v2072_v22  ;;  %3435 = vmatmul.bf16.gmra.mxu0 %v3336_v58  ;;  %8804 = vst [vmem:[#allocation72_spill] sm:$0xff] %v7542_v18  ;;  %v2571_v22 = vld [vmem:[#allocation2 + $0x12c] sm:$0xff]  ;;  %v2570_v58 = vld [vmem:[#allocation2 + $0x124] sm:$0xff] }
 0x299   : > { %2743 = vmatmul.bf16.gmra.mxu1 %v2588_v19  ;;  %2205 = vmatmul.bf16.gmra.mxu3 %v2074_v29  ;;  %v2589_v27 = vpack.c.bf16 %v2571_v22, %v2570_v58 }
 0x29b   : > { %v1907_v25 = vpop.f32.mrf.mxu2 }
 0x29c   : > { %v1994_v31 = vadd.f32 %v1907_v25, %v7061_v57  ;;  %v2166_v39 = vpop.f32.mrf.mxu3  ;;  %v3337_v57 = vpack.c.bf16 %v3305_v63, %v3304_v47  ;;  %v2050_v25 = vld [vmem:[#allocation2 + $0xc2] sm:$0xff]  ;;  %v3307_v63 = vld [vmem:[#allocation2 + $0x6e] sm:$0xff] }
 0x29d   : > { %v3306_v47 = vld [vmem:[#allocation2 + $0x66] sm:$0xff] }
 0x29e   : > { %v7538_v16 = vadd.f32 %v2161_v51, %v1994_v31  ;;  %v2075_v51 = vpack.c.bf16 %v2051_v55, %v2050_v25  ;;  %v7547_v31 = vpop.f32.mrf.mxu1  ;;  %v2052_v25 = vld [vmem:[#allocation2 + $0xd2] sm:$0xff] }
 0x29f   : > { %8805 = vst [vmem:[#allocation73_spill] sm:$0xff] %v7547_v31 }
 0x2a3   : > { %v1909_v2 = vpop.f32.mrf.mxu2 }
 0x2a4   : > { %v1995_v7 = vadd.f32 %v1909_v2, %v7073_v14  ;;  %v2168_v59 = vpop.f32.mrf.mxu3  ;;  %v7550_v2 = vpop.f32.mrf.mxu0 }
 0x2a5   : > { %8806 = vst [vmem:[#allocation74_spill] sm:$0xff] %v7550_v2 }
 0x2a6   : > { %v7545_v19 = vadd.f32 %v2163_v40, %v1995_v7 }
 0x2a8   : > { %1951 = vmatmul.bf16.gmra.mxu2 %v2073_v12  ;;  %3440 = vmatmul.bf16.gmra.mxu0 %v3337_v57  ;;  %v2053_v12 = vld [vmem:[#allocation2 + $0xda] sm:$0xff]  ;;  %v3338_v57 = vpack.c.bf16 %v3307_v63, %v3306_v47  ;;  %v2054_v47 = vld [vmem:[#allocation2 + $0xe2] sm:$0xff] }
 0x2a9   : > { %2748 = vmatmul.bf16.gmra.mxu1 %v2589_v27  ;;  %2210 = vmatmul.bf16.gmra.mxu3 %v2075_v51 }
 0x2ab   : > { %v1912_v18 = vpop.f32.mrf.mxu2 }
 0x2ac   : > { %v1996_v14 = vadd.f32 %v1912_v18, %v7086_v5  ;;  %v2171_v60 = vpop.f32.mrf.mxu3  ;;  %v7557_v27 = vpop.f32.mrf.mxu0  ;;  %v2076_v5 = vpack.c.bf16 %v2053_v12, %v2052_v25 }
 0x2ad   : > { %8807 = vst [vmem:[#allocation75_spill] sm:$0xff] %v7557_v27  ;;  %v2055_v27 = vld [vmem:[#allocation2 + $0xea] sm:$0xff] }
 0x2ae   : > { %v7552_v40 = vadd.f32 %v2166_v39, %v1996_v14 }
 0x2b3   : > { %v1914_v7 = vpop.f32.mrf.mxu2 }
 0x2b4   : > { %v1997_v22 = vadd.f32 %v1914_v7, %v7098_v17  ;;  %v2173_v58 = vpop.f32.mrf.mxu3  ;;  %v7562_v17 = vpop.f32.mrf.mxu0 }
 0x2b5   : > { %8808 = vst [vmem:[#allocation76_spill] sm:$0xff] %v7562_v17  ;;  %v3319_v17 = vld [vmem:[#allocation2 + $0xce] sm:$0xff] }
 0x2b6   : > { %v7555_v55 = vadd.f32 %v2168_v59, %v1997_v22  ;;  %v3309_v22 = vld [vmem:[#allocation2 + $0x7e] sm:$0xff] }
 0x2b8   : > { %1956 = vmatmul.bf16.gmra.mxu2 %v2074_v29  ;;  %3445 = vmatmul.bf16.gmra.mxu0 %v3338_v57  ;;  %v3308_v29 = vld [vmem:[#allocation2 + $0x76] sm:$0xff]  ;;  %v2077_v57 = vpack.c.bf16 %v2055_v27, %v2054_v47  ;;  %v3310_v27 = vld [vmem:[#allocation2 + $0x86] sm:$0xff] }
 0x2b9   : > { %2215 = vmatmul.bf16.gmra.mxu3 %v2076_v5  ;;  %v3339_v12 = vpack.c.bf16 %v3309_v22, %v3308_v29  ;;  %v2057_v29 = vld [vmem:[#allocation2 + $0xfa] sm:$0xff]  ;;  %v2056_v47 = vld [vmem:[#allocation2 + $0xf2] sm:$0xff] }
 0x2bb   : > { %v1917_v18 = vpop.f32.mrf.mxu2 }
 0x2bc   : > { %v1998_v39 = vadd.f32 %v1917_v18, %v7111_v8  ;;  %v2176_v14 = vpop.f32.mrf.mxu3  ;;  %v7567_v8 = vpop.f32.mrf.mxu0 }
 0x2bd   : > { %8809 = vst [vmem:[#allocation77_spill] sm:$0xff] %v7567_v8  ;;  %v2078_v8 = vpack.c.bf16 %v2057_v29, %v2056_v47  ;;  %v3313_v29 = vld [vmem:[#allocation2 + $0x9e] sm:$0xff]  ;;  %v3312_v47 = vld [vmem:[#allocation2 + $0x96] sm:$0xff] }
 0x2be   : > { %v7560_v2 = vadd.f32 %v2171_v60, %v1998_v39 }
 0x2c3   : > { %v1919_v7 = vpop.f32.mrf.mxu2 }
 0x2c4   : > { %v1999_v59 = vadd.f32 %v1919_v7, %v7123_v0  ;;  %v2178_v31 = vpop.f32.mrf.mxu3 }
 0x2c6   : > { %v7565_v63 = vadd.f32 %v2173_v58, %v1999_v59  ;;  %v3311_v58 = vld [vmem:[#allocation2 + $0x8e] sm:$0xff]  ;;  %v7573_v59 = vpop.f32.mrf.mxu0 }
 0x2c7   : > { %8810 = vst [vmem:[#allocation78_spill] sm:$0xff] %v7573_v59 }
 0x2c8   : > { %1961 = vmatmul.bf16.gmra.mxu2 %v2075_v51  ;;  %3450 = vmatmul.bf16.gmra.mxu0 %v3339_v12  ;;  %v3340_v12 = vpack.c.bf16 %v3311_v58, %v3310_v27  ;;  %v2059_v27 = vld [vmem:[#allocation2 + $0x10a] sm:$0xff] }
 0x2c9   : > { %2220 = vmatmul.bf16.gmra.mxu3 %v2077_v57 }
 0x2cb   : > { %v1922_v60 = vpop.f32.mrf.mxu2 }
 0x2cc   : > { %v2000_v25 = vadd.f32 %v1922_v60, %v7143_v21  ;;  %v2181_v18 = vpop.f32.mrf.mxu3  ;;  %v6149_v21 = vld [vmem:[%s8715_s6 + $0x1f8] sm:$0xff] }
 0x2cd   : > { %3163 = vmatpush.bf16.msra.mxu3 %v6149_v21  ;;  %v3341_v21 = vpack.c.bf16 %v3313_v29, %v3312_v47  ;;  %v6144_v29 = vld [vmem:[%s8715_s6 + $0x1d0] sm:$0xff] }
 0x2ce   : > { %v7570_v39 = vadd.f32 %v2176_v14, %v2000_v25 }
 0x2d3   : > { %v1924_v0 = vpop.f32.mrf.mxu2 }
 0x2d4   : > { %v2001_v7 = vadd.f32 %v1924_v0, %v7155_v11  ;;  %v2183_v22 = vpop.f32.mrf.mxu3  ;;  %v7586_v0 = vpop.f32.mrf.mxu0 }
 0x2d5   : > { %8811 = vst [vmem:[#allocation79_spill] sm:$0xff] %v7586_v0 }
 0x2d6   : > { %v7575_v51 = vadd.f32 %v2178_v31, %v2001_v7  ;;  %v6148_v31 = vld [vmem:[%s8715_s6 + $0x1f0] sm:$0xff] }
 0x2d7   : > { %3164 = vmatpush.bf16.msra.mxu3 %v6148_v31  ;;  %v6141_v31 = vld [vmem:[%s8715_s6 + $0x1b8] sm:$0xff] }
 0x2d8   : > { %1966 = vmatmul.bf16.gmra.mxu2 %v2076_v5  ;;  %3455 = vmatmul.bf16.gmra.mxu0 %v3340_v12  ;;  %v6147_v5 = vld [vmem:[%s8715_s6 + $0x1e8] sm:$0xff]  ;;  %v6146_v12 = vld [vmem:[%s8715_s6 + $0x1e0] sm:$0xff] }
 0x2d9   : > { %2225 = vmatmul.bf16.gmra.mxu3 %v2078_v8  ;;  %2909 = vmatpush.bf16.msra.mxu2 %v6141_v31  ;;  %v3315_v31 = vld [vmem:[#allocation2 + $0xae] sm:$0xff] }
 0x2db   : > { %v1927_v14 = vpop.f32.mrf.mxu2  ;;  %3165 = vmatpush.bf16.msra.mxu3 %v6147_v5  ;;  %v6145_v5 = vld [vmem:[%s8715_s6 + $0x1d8] sm:$0xff] }
 0x2dc   : > { %v2002_v11 = vadd.f32 %v1927_v14, %v7173_v15  ;;  %v2186_v60 = vpop.f32.mrf.mxu3  ;;  %v2058_v14 = vld [vmem:[#allocation2 + $0x102] sm:$0xff] }
 0x2de   : > { %v7584_v25 = vadd.f32 %v2181_v18, %v2002_v11  ;;  %v2079_v11 = vpack.c.bf16 %v2059_v27, %v2058_v14 }
 0x2df   : > { %3166 = vmatpush.bf16.msra.mxu3 %v6146_v12  ;;  %v6139_v12 = vld [vmem:[%s8715_s6 + $0x1a8] sm:$0xff] }
 0x2e3   : > { %v1929_v7 = vpop.f32.mrf.mxu2  ;;  %3167 = vmatpush.bf16.msra.mxu3 %v6145_v5  ;;  %v2061_v5 = vld [vmem:[#allocation2 + $0x11a] sm:$0xff] }
 0x2e4   : > { %v2003_v58 = vadd.f32 %v1929_v7, %v7191_v43  ;;  %v2188_v15 = vpop.f32.mrf.mxu3  ;;  %v7600_v43 = vpop.f32.mrf.mxu0 }
 0x2e5   : > { %8812 = vst [vmem:[#allocation80_spill] sm:$0xff] %v7600_v43  ;;  %v2060_v43 = vld [vmem:[#allocation2 + $0x112] sm:$0xff] }
 0x2e6   : > { %v7595_v18 = vadd.f32 %v2183_v22, %v2003_v58 }
 0x2e7   : > { %3168 = vmatpush.bf16.msra.mxu3 %v6144_v29  ;;  %v3314_v29 = vld [vmem:[#allocation2 + $0xa6] sm:$0xff] }
 0x2e8   : > { %1971 = vmatmul.bf16.gmra.mxu2 %v2077_v57  ;;  %3460 = vmatmul.bf16.gmra.mxu0 %v3341_v21  ;;  %v6140_v57 = vld [vmem:[%s8715_s6 + $0x1b0] sm:$0xff] }
 0x2e9   : > { %2230 = vmatmul.bf16.gmra.mxu3 %v2079_v11  ;;  %2910 = vmatpush.bf16.msra.mxu2 %v6140_v57 }
 0x2eb   : > { %v1932_v22 = vpop.f32.mrf.mxu2 }
 0x2ec   : > { %v2004_v7 = vadd.f32 %v1932_v22, %v7217_v26  ;;  %v2191_v58 = vpop.f32.mrf.mxu3  ;;  %v6143_v26 = vld [vmem:[%s8715_s6 + $0x1c8] sm:$0xff]  ;;  %v7620_v47 = vpop.f32.mrf.mxu0  ;;  %v6138_v22 = vld [vmem:[%s8715_s6 + $0x1a0] sm:$0xff] }
 0x2ed   : > { %8813 = vst [vmem:[#allocation81_spill] sm:$0xff] %v7620_v47  ;;  %2911 = vmatpush.bf16.msra.mxu2 %v6139_v12  ;;  %3169 = vmatpush.bf16.msra.mxu3 %v6143_v26  ;;  %v3342_v47 = vpack.c.bf16 %v3315_v31, %v3314_v29  ;;  %v6137_v12 = vld [vmem:[%s8715_s6 + $0x198] sm:$0xff] }
 0x2ee   : > { %v7612_v27 = vadd.f32 %v2186_v60, %v2004_v7  ;;  %v6142_v7 = vld [vmem:[%s8715_s6 + $0x1c0] sm:$0xff] }
 0x2f1   : > { %2912 = vmatpush.bf16.msra.mxu2 %v6138_v22  ;;  %3170 = vmatpush.bf16.msra.mxu3 %v6142_v7  ;;  %v2063_v22 = vld [vmem:[#allocation2 + $0x12a] sm:$0xff]  ;;  %v6134_v7 = vld [vmem:[%s8715_s6 + $0x180] sm:$0xff] }
 0x2f3   : > { %v1934_v21 = vpop.f32.mrf.mxu2 }
 0x2f4   : > { %v2005_v14 = vadd.f32 %v1934_v21, %v7248_v38  ;;  %v2193_v60 = vpop.f32.mrf.mxu3  ;;  %v2080_v38 = vpack.c.bf16 %v2061_v5, %v2060_v43  ;;  %v7635_v0 = vpop.f32.mrf.mxu0  ;;  %v3317_v5 = vld [vmem:[#allocation2 + $0xbe] sm:$0xff] }
 0x2f5   : > { %2913 = vmatpush.bf16.msra.mxu2 %v6137_v12  ;;  %8814 = vst [vmem:[#allocation82_spill] sm:$0xff] %v7635_v0 }
 0x2f6   : > { %v7629_v57 = vadd.f32 %v2188_v15, %v2005_v14  ;;  %v6136_v14 = vld [vmem:[%s8715_s6 + $0x190] sm:$0xff] }
 0x2f8   : > { %1976 = vmatmul.bf16.gmra.mxu2 %v2078_v8  ;;  %3465 = vmatmul.bf16.gmra.mxu0 %v3342_v47  ;;  %v6135_v8 = vld [vmem:[%s8715_s6 + $0x188] sm:$0xff] }
 0x2f9   : > { %2235 = vmatmul.bf16.gmra.mxu3 %v2080_v38  ;;  %2914 = vmatpush.bf16.msra.mxu2 %v6136_v14 }
 0x2fb   : > { %v1937_v26 = vpop.f32.mrf.mxu2 }
 0x2fc   : > { %v2006_v21 = vadd.f32 %v1937_v26, %v7272_v41  ;;  %v2196_v15 = vpop.f32.mrf.mxu3  ;;  %v7651_v12 = vpop.f32.mrf.mxu0 }
 0x2fd   : > { %2915 = vmatpush.bf16.msra.mxu2 %v6135_v8  ;;  %8815 = vst [vmem:[#allocation83_spill] sm:$0xff] %v7651_v12 }
 0x2fe   : > { %v7640_v31 = vadd.f32 %v2191_v58, %v2006_v21  ;;  %v3316_v58 = vld [vmem:[#allocation2 + $0xb6] sm:$0xff]  ;;  %v2062_v21 = vld [vmem:[#allocation2 + $0x122] sm:$0xff] }
 0x2ff   : > { %v3343_v26 = vpack.c.bf16 %v3317_v5, %v3316_v58  ;;  %v2081_v14 = vpack.c.bf16 %v2063_v22, %v2062_v21  ;;  %v3045_v5 = vld [vmem:[#allocation2 + $0x2d] sm:$0xff] }
 0x301   : > { %2916 = vmatpush.bf16.msra.mxu2 %v6134_v7  ;;  %v3044_v7 = vld [vmem:[#allocation2 + $0x25] sm:$0xff] }
 0x303   : > { %v1939_v43 = vpop.f32.mrf.mxu2 }
 0x304   : > { %v2007_v47 = vadd.f32 %v1939_v43, %v7290_v1  ;;  %v2198_v41 = vpop.f32.mrf.mxu3  ;;  %v7656_v59 = vpop.f32.mrf.mxu0 }
 0x305   : > { %8816 = vst [vmem:[#allocation84_spill] sm:$0xff] %v7656_v59  ;;  %v3046_v59 = vld [vmem:[#allocation2 + $0x35] sm:$0xff] }
 0x306   : > { %v7649_v29 = vadd.f32 %v2193_v60, %v2007_v47 }
 0x308   : > { %1981 = vmatmul.bf16.gmra.mxu2 %v2079_v11  ;;  %3470 = vmatmul.bf16.gmra.mxu0 %v3343_v26  ;;  %v3318_v11 = vld [vmem:[#allocation2 + $0xc6] sm:$0xff]  ;;  %v3080_v26 = vpack.c.bf16 %v3045_v5, %v3044_v7  ;;  %v3047_v5 = vld [vmem:[#allocation2 + $0x3d] sm:$0xff] }
 0x309   : > { %2240 = vmatmul.bf16.gmra.mxu3 %v2081_v14  ;;  %v3344_v22 = vpack.c.bf16 %v3319_v17, %v3318_v11  ;;  %v2790_v17 = vld [vmem:[#allocation2 + $0x24] sm:$0xff]  ;;  %v3320_v7 = vld [vmem:[#allocation2 + $0xd6] sm:$0xff] }
 0x30b   : > { %v1942_v1 = vpop.f32.mrf.mxu2 }
 0x30c   : > { %v2008_v8 = vadd.f32 %v1942_v1, %v7306_v49  ;;  %v2201_v43 = vpop.f32.mrf.mxu3  ;;  %v7661_v49 = vpop.f32.mrf.mxu0 }
 0x30e   : > { %v7654_v0 = vadd.f32 %v2196_v15, %v2008_v8  ;;  %v2791_v8 = vld [vmem:[#allocation2 + $0x2c] sm:$0xff] }
 0x313   : > { %v1944_v60 = vpop.f32.mrf.mxu2 }
 0x314   : > { %v2009_v47 = vadd.f32 %v1944_v60, %v7318_v10  ;;  %v2203_v12 = vpop.f32.mrf.mxu3  ;;  %v3321_v60 = vld [vmem:[#allocation2 + $0xde] sm:$0xff] }
 0x316   : > { %v7659_v58 = vadd.f32 %v2198_v41, %v2009_v47  ;;  %v7667_v47 = vpop.f32.mrf.mxu0 }
 0x318   : > { %8817 = vst [vmem:[#allocation85_spill] sm:$0xff] %v7659_v58  ;;  %1986 = vmatmul.bf16.gmra.mxu2 %v2080_v38  ;;  %3475 = vmatmul.bf16.gmra.mxu0 %v3344_v22  ;;  %v2826_v22 = vpack.c.bf16 %v2791_v8, %v2790_v17  ;;  %v2793_v58 = vld [vmem:[#allocation2 + $0x3c] sm:$0xff]  ;;  %v3323_v8 = vld [vmem:[#allocation2 + $0xee] sm:$0xff] }
 0x319   : > { %3171 = vmatmul.bf16.vlgmr.msra.gmra.mxu3 %v3080_v26  ;;  %v3345_v26 = vpack.c.bf16 %v3321_v60, %v3320_v7  ;;  %v3049_v17 = vld [vmem:[#allocation2 + $0x4d] sm:$0xff] }
 0x31b   : > { %v1947_v15 = vpop.f32.mrf.mxu2 }
 0x31c   : > { %v2010_v21 = vadd.f32 %v1947_v15, %v7334_v36  ;;  %v2206_v14 = vpop.f32.mrf.mxu3  ;;  %v3081_v36 = vpack.c.bf16 %v3047_v5, %v3046_v59  ;;  %v3322_v5 = vld [vmem:[#allocation2 + $0xe6] sm:$0xff] }
 0x31d   : > { %v3346_v7 = vpack.c.bf16 %v3323_v8, %v3322_v5  ;;  %v3325_v8 = vld [vmem:[#allocation2 + $0xfe] sm:$0xff] }
 0x31e   : > { %v7664_v1 = vadd.f32 %v2201_v43, %v2010_v21 }
 0x320   : > { %8818 = vst [vmem:[#allocation86_spill] sm:$0xff] %v7664_v1 }
 0x323   : > { %v1949_v10 = vpop.f32.mrf.mxu2 }
 0x324   : > { %v2011_v41 = vadd.f32 %v1949_v10, %v7348_v54  ;;  %v2208_v38 = vpop.f32.mrf.mxu3  ;;  %v7674_v10 = vpop.f32.mrf.mxu0 }
 0x326   : > { %v7669_v11 = vadd.f32 %v2203_v12, %v2011_v41  ;;  %v2792_v41 = vld [vmem:[#allocation2 + $0x34] sm:$0xff] }
 0x327   : > { %v2827_v59 = vpack.c.bf16 %v2793_v58, %v2792_v41  ;;  %v2794_v41 = vld [vmem:[#allocation2 + $0x44] sm:$0xff] }
 0x328   : > { %8819 = vst [vmem:[#allocation87_spill] sm:$0xff] %v7669_v11  ;;  %2917 = vmatmul.bf16.vlgmr.msra.gmra.mxu2 %v2826_v22  ;;  %3480 = vmatmul.bf16.gmra.mxu0 %v3345_v26  ;;  %v3048_v26 = vld [vmem:[#allocation2 + $0x45] sm:$0xff] }
 0x329   : > { %3176 = vmatmul.bf16.gmra.mxu3 %v3081_v36 }
 0x32b   : > { %v1952_v43 = vpop.f32.mrf.mxu2 }
 0x32c   : > { %v2012_v15 = vadd.f32 %v1952_v43, %v7361_v13  ;;  %v2211_v54 = vpop.f32.mrf.mxu3  ;;  %v3082_v13 = vpack.c.bf16 %v3049_v17, %v3048_v26  ;;  %v3051_v17 = vld [vmem:[#allocation2 + $0x5d] sm:$0xff] }
 0x32d   : > { %v3324_v26 = vld [vmem:[#allocation2 + $0xf6] sm:$0xff] }
 0x32e   : > { %v7672_v21 = vadd.f32 %v2206_v14, %v2012_v15  ;;  %v7679_v14 = vpop.f32.mrf.mxu0 }
 0x330   : > { %8820 = vst [vmem:[#allocation88_spill] sm:$0xff] %v7672_v21 }
 0x333   : > { %v1954_v1 = vpop.f32.mrf.mxu2 }
 0x334   : > { %v2013_v12 = vadd.f32 %v1954_v1, %v7369_v52  ;;  %v2213_v60 = vpop.f32.mrf.mxu3 }
 0x336   : > { %v7677_v22 = vadd.f32 %v2208_v38, %v2013_v12  ;;  %v7684_v15 = vpop.f32.mrf.mxu0  ;;  %v2795_v12 = vld [vmem:[#allocation2 + $0x4c] sm:$0xff] }
 0x338   : > { %8821 = vst [vmem:[#allocation89_spill] sm:$0xff] %v7677_v22  ;;  %2922 = vmatmul.bf16.gmra.mxu2 %v2827_v59  ;;  %3485 = vmatmul.bf16.gmra.mxu0 %v3346_v7  ;;  %v2828_v7 = vpack.c.bf16 %v2795_v12, %v2794_v41  ;;  %v3050_v22 = vld [vmem:[#allocation2 + $0x55] sm:$0xff] }
 0x339   : > { %3181 = vmatmul.bf16.gmra.mxu3 %v3082_v13  ;;  %v3347_v13 = vpack.c.bf16 %v3325_v8, %v3324_v26  ;;  %v3327_v8 = vld [vmem:[#allocation2 + $0x10e] sm:$0xff] }
 0x33a   : > { %v2796_v41 = vld [vmem:[#allocation2 + $0x54] sm:$0xff] }
 0x33b   : > { %v1957_v36 = vpop.f32.mrf.mxu2 }
 0x33c   : > { %v2014_v43 = vadd.f32 %v1957_v36, %v7380_v53  ;;  %v2216_v52 = vpop.f32.mrf.mxu3  ;;  %v3083_v53 = vpack.c.bf16 %v3051_v17, %v3050_v22  ;;  %v3053_v22 = vld [vmem:[#allocation2 + $0x6d] sm:$0xff] }
 0x33e   : > { %v7682_v1 = vadd.f32 %v2211_v54, %v2014_v43  ;;  %v7690_v43 = vpop.f32.mrf.mxu0 }
 0x340   : > { %8822 = vst [vmem:[#allocation90_spill] sm:$0xff] %v7682_v1  ;;  %v7694_v1 = vpop.f32.mrf.mxu1 }
 0x343   : > { %v1959_v38 = vpop.f32.mrf.mxu2 }
 0x344   : > { %v2015_v58 = vadd.f32 %v1959_v38, %v7388_v62  ;;  %v2218_v59 = vpop.f32.mrf.mxu3 }
 0x346   : > { %v7687_v5 = vadd.f32 %v2213_v60, %v2015_v58  ;;  %v2797_v58 = vld [vmem:[#allocation2 + $0x5c] sm:$0xff] }
 0x347   : > { %v2829_v26 = vpack.c.bf16 %v2797_v58, %v2796_v41 }
 0x348   : > { %8823 = vst [vmem:[#allocation91_spill] sm:$0xff] %v7687_v5  ;;  %2927 = vmatmul.bf16.gmra.mxu2 %v2828_v7  ;;  %3490 = vmatmul.bf16.gmra.mxu0 %v3347_v13  ;;  %v3326_v13 = vld [vmem:[#allocation2 + $0x106] sm:$0xff] }
 0x349   : > { %3186 = vmatmul.bf16.gmra.mxu3 %v3083_v53  ;;  %v3348_v53 = vpack.c.bf16 %v3327_v8, %v3326_v13 }
 0x34b   : > { %v1962_v54 = vpop.f32.mrf.mxu2 }
 0x34c   : > { %v2016_v36 = vadd.f32 %v1962_v54, %v7398_v44  ;;  %v2221_v62 = vpop.f32.mrf.mxu3  ;;  %v7699_v44 = vpop.f32.mrf.mxu0  ;;  %v3052_v54 = vld [vmem:[#allocation2 + $0x65] sm:$0xff] }
 0x34e   : > { %v7692_v38 = vadd.f32 %v2216_v52, %v2016_v36  ;;  %v3084_v52 = vpack.c.bf16 %v3053_v22, %v3052_v54  ;;  %v7701_v36 = vpop.f32.mrf.mxu1  ;;  %v2798_v22 = vld [vmem:[#allocation2 + $0x64] sm:$0xff] }
 0x350   : > { %8824 = vst [vmem:[#allocation92_spill] sm:$0xff] %v7692_v38 }
 0x353   : > { %v1964_v60 = vpop.f32.mrf.mxu2 }
 0x354   : > { %v2017_v12 = vadd.f32 %v1964_v60, %v7406_v9  ;;  %v2223_v7 = vpop.f32.mrf.mxu3 }
 0x356   : > { %v7697_v17 = vadd.f32 %v2218_v59, %v2017_v12  ;;  %v7706_v59 = vpop.f32.mrf.mxu0  ;;  %v2799_v12 = vld [vmem:[#allocation2 + $0x6c] sm:$0xff]  ;;  %v7708_v41 = vpop.f32.mrf.mxu1 }
 0x358   : > { %8825 = vst [vmem:[#allocation93_spill] sm:$0xff] %v7697_v17  ;;  %2932 = vmatmul.bf16.gmra.mxu2 %v2829_v26  ;;  %3495 = vmatmul.bf16.gmra.mxu0 %v3348_v53  ;;  %v3329_v26 = vld [vmem:[#allocation2 + $0x11e] sm:$0xff]  ;;  %v3328_v17 = vld [vmem:[#allocation2 + $0x116] sm:$0xff] }
 0x359   : > { %3191 = vmatmul.bf16.gmra.mxu3 %v3084_v52  ;;  %v3055_v53 = vld [vmem:[#allocation2 + $0x7d] sm:$0xff]  ;;  %v2830_v52 = vpack.c.bf16 %v2799_v12, %v2798_v22  ;;  %v2800_v22 = vld [vmem:[#allocation2 + $0x74] sm:$0xff] }
 0x35b   : > { %v1967_v38 = vpop.f32.mrf.mxu2 }
 0x35c   : > { %v2018_v9 = vadd.f32 %v1967_v38, %v7424_v34  ;;  %v2226_v60 = vpop.f32.mrf.mxu3  ;;  %v3349_v34 = vpack.c.bf16 %v3329_v26, %v3328_v17  ;;  %v3054_v38 = vld [vmem:[#allocation2 + $0x75] sm:$0xff] }
 0x35d   : > { %v3331_v17 = vld [vmem:[#allocation2 + $0x12e] sm:$0xff] }
 0x35e   : > { %v7704_v5 = vadd.f32 %v2221_v62, %v2018_v9  ;;  %v3085_v62 = vpack.c.bf16 %v3055_v53, %v3054_v38  ;;  %v7713_v9 = vpop.f32.mrf.mxu0 }
 0x360   : > { %8826 = vst [vmem:[#allocation94_spill] sm:$0xff] %v7704_v5 }
 0x363   : > { %v1969_v58 = vpop.f32.mrf.mxu2 }
 0x364   : > { %v2019_v8 = vadd.f32 %v1969_v58, %v7438_v3  ;;  %v2228_v13 = vpop.f32.mrf.mxu3  ;;  %v7716_v58 = vpop.f32.mrf.mxu1 }
 0x366   : > { %v7711_v54 = vadd.f32 %v2223_v7, %v2019_v8  ;;  %v2801_v8 = vld [vmem:[#allocation2 + $0x7c] sm:$0xff]  ;;  %v7721_v26 = vpop.f32.mrf.mxu0 }
 0x367   : > { %v2831_v38 = vpack.c.bf16 %v2801_v8, %v2800_v22  ;;  %v2803_v22 = vld [vmem:[#allocation2 + $0x8c] sm:$0xff] }
 0x368   : > { %8827 = vst [vmem:[#allocation95_spill] sm:$0xff] %v7711_v54  ;;  %2937 = vmatmul.bf16.gmra.mxu2 %v2830_v52  ;;  %3500 = vmatmul.bf16.gmra.mxu0 %v3349_v34  ;;  %v3057_v52 = vld [vmem:[#allocation2 + $0x8d] sm:$0xff] }
 0x369   : > { %3196 = vmatmul.bf16.gmra.mxu3 %v3085_v62  ;;  %v3330_v62 = vld [vmem:[#allocation2 + $0x126] sm:$0xff] }
 0x36b   : > { %v1972_v5 = vpop.f32.mrf.mxu2 }
 0x36c   : > { %v2020_v21 = vadd.f32 %v1972_v5, %v7456_v32  ;;  %v2231_v3 = vpop.f32.mrf.mxu3  ;;  %v3350_v32 = vpack.c.bf16 %v3331_v17, %v3330_v62  ;;  %v3056_v5 = vld [vmem:[#allocation2 + $0x85] sm:$0xff]  ;;  %v7725_v54 = vpop.f32.mrf.mxu1 }
 0x36d   : > { %v2802_v62 = vld [vmem:[#allocation2 + $0x84] sm:$0xff] }
 0x36e   : > { %v7718_v11 = vadd.f32 %v2226_v60, %v2020_v21  ;;  %v3086_v21 = vpack.c.bf16 %v3057_v52, %v3056_v5  ;;  %v7733_v8 = vpop.f32.mrf.mxu0 }
 0x370   : > { %8828 = vst [vmem:[#allocation96_spill] sm:$0xff] %v7718_v11 }
 0x373   : > { %v1974_v7 = vpop.f32.mrf.mxu2 }
 0x374   : > { %v2021_v12 = vadd.f32 %v1974_v7, %v7472_v4  ;;  %v2233_v53 = vpop.f32.mrf.mxu3 }
 0x376   : > { %v7723_v34 = vadd.f32 %v2228_v13, %v2021_v12  ;;  %v6165_v13 = vld [vmem:[%s8717_s8 + $0x38] sm:$0xff]  ;;  %v7735_v12 = vpop.f32.mrf.mxu1 }
 0x377   : > { %3786 = vmatpush.bf16.msrb.mxu1 %v6165_v13  ;;  %v3058_v13 = vld [vmem:[#allocation2 + $0x95] sm:$0xff] }
 0x378   : > { %8829 = vst [vmem:[#allocation97_spill] sm:$0xff] %v7723_v34  ;;  %2942 = vmatmul.bf16.gmra.mxu2 %v2831_v38  ;;  %3505 = vmatmul.bf16.gmra.mxu0 %v3350_v32  ;;  %v3333_v38 = vld [vmem:[#allocation2 + $0x13e] sm:$0xff] }
 0x379   : > { %3201 = vmatmul.bf16.gmra.mxu3 %v3086_v21  ;;  %v3332_v21 = vld [vmem:[#allocation2 + $0x136] sm:$0xff] }
 0x37b   : > { %v1977_v60 = vpop.f32.mrf.mxu2 }
 0x37c   : > { %v2022_v4 = vadd.f32 %v1977_v60, %v7488_v20  ;;  %v2236_v7 = vpop.f32.mrf.mxu3  ;;  %v3059_v20 = vld [vmem:[#allocation2 + $0x9d] sm:$0xff]  ;;  %v6164_v60 = vld [vmem:[%s8717_s8 + $0x30] sm:$0xff] }
 0x37d   : > { %3787 = vmatpush.bf16.msrb.mxu1 %v6164_v60 }
 0x37e   : > { %v7728_v11 = vadd.f32 %v2231_v3, %v2022_v4  ;;  %v2832_v3 = vpack.c.bf16 %v2803_v22, %v2802_v62  ;;  %v3351_v4 = vpack.c.bf16 %v3333_v38, %v3332_v21  ;;  %v7748_v22 = vpop.f32.mrf.mxu1 }
 0x380   : > { %8830 = vst [vmem:[#allocation98_spill] sm:$0xff] %v7728_v11  ;;  %v3087_v11 = vpack.c.bf16 %v3059_v20, %v3058_v13  ;;  %v6162_v20 = vld [vmem:[%s8717_s8 + $0x20] sm:$0xff]  ;;  %v3061_v13 = vld [vmem:[#allocation2 + $0xad] sm:$0xff] }
 0x383   : > { %v1979_v17 = vpop.f32.mrf.mxu2 }
 0x384   : > { %v2023_v52 = vadd.f32 %v1979_v17, %v7494_v6  ;;  %v2238_v32 = vpop.f32.mrf.mxu3  ;;  %v6163_v6 = vld [vmem:[%s8717_s8 + $0x28] sm:$0xff]  ;;  %v7746_v17 = vpop.f32.mrf.mxu0 }
 0x385   : > { %3788 = vmatpush.bf16.msrb.mxu1 %v6163_v6 }
 0x386   : > { %v7738_v5 = vadd.f32 %v2233_v53, %v2023_v52  ;;  %v7760_v6 = vpop.f32.mrf.mxu1 }
 0x388   : > { %8831 = vst [vmem:[#allocation99_spill] sm:$0xff] %v7738_v5  ;;  %2947 = vmatmul.bf16.gmra.mxu2 %v2832_v3  ;;  %3510 = vmatmul.bf16.gmra.mxu0 %v3351_v4  ;;  %v6161_v3 = vld [vmem:[%s8717_s8 + $0x18] sm:$0xff] }
 0x389   : > { %3206 = vmatmul.bf16.gmra.mxu3 %v3087_v11  ;;  %3789 = vmatpush.bf16.msrb.mxu1 %v6162_v20  ;;  %v2805_v11 = vld [vmem:[#allocation2 + $0x9c] sm:$0xff]  ;;  %v2804_v4 = vld [vmem:[#allocation2 + $0x94] sm:$0xff]  ;;  %v3060_v20 = vld [vmem:[#allocation2 + $0xa5] sm:$0xff] }
 0x38b   : > { %v1982_v53 = vpop.f32.mrf.mxu2 }
 0x38c   : > { %v2024_v52 = vadd.f32 %v1982_v53, %v7503_v42  ;;  %v2241_v62 = vpop.f32.mrf.mxu3  ;;  %v2833_v53 = vpack.c.bf16 %v2805_v11, %v2804_v4  ;;  %v6158_v11 = vld [vmem:[%s8717_s8] sm:$0xff] }
 0x38d   : > { %3790 = vmatpush.bf16.msrb.mxu1 %v6161_v3 }
 0x38e   : > { %v7751_v38 = vadd.f32 %v2236_v7, %v2024_v52  ;;  %v6160_v52 = vld [vmem:[%s8717_s8 + $0x10] sm:$0xff]  ;;  %v7776_v4 = vpop.f32.mrf.mxu1 }
 0x390   : > { %8832 = vst [vmem:[#allocation100_spill] sm:$0xff] %v7751_v38  ;;  %v3088_v38 = vpack.c.bf16 %v3061_v13, %v3060_v20 }
 0x391   : > { %3791 = vmatpush.bf16.msrb.mxu1 %v6160_v52  ;;  %v2806_v52 = vld [vmem:[#allocation2 + $0xa4] sm:$0xff] }
 0x393   : > { %v1984_v21 = vpop.f32.mrf.mxu2 }
 0x394   : > { %v2025_v60 = vadd.f32 %v1984_v21, %v7509_v24  ;;  %v2243_v42 = vpop.f32.mrf.mxu3  ;;  %v6159_v24 = vld [vmem:[%s8717_s8 + $0x8] sm:$0xff] }
 0x395   : > { %3792 = vmatpush.bf16.msrb.mxu1 %v6159_v24  ;;  %v3062_v24 = vld [vmem:[#allocation2 + $0xb5] sm:$0xff] }
 0x396   : > { %v7762_v7 = vadd.f32 %v2238_v32, %v2025_v60 }
 0x398   : > { %8833 = vst [vmem:[#allocation101_spill] sm:$0xff] %v7762_v7  ;;  %2952 = vmatmul.bf16.gmra.mxu2 %v2833_v53  ;;  %v3063_v7 = vld [vmem:[#allocation2 + $0xbd] sm:$0xff] }
 0x399   : > { %3211 = vmatmul.bf16.gmra.mxu3 %v3088_v38  ;;  %3793 = vmatpush.bf16.msrb.mxu1 %v6158_v11  ;;  %v2807_v38 = vld [vmem:[#allocation2 + $0xac] sm:$0xff] }
 0x39b   : > { %v1987_v3 = vpop.f32.mrf.mxu2 }
 0x39c   : > { %v2026_v21 = vadd.f32 %v1987_v3, %v7515_v61  ;;  %v3172_v32 = vpop.f32.mrf.mxu3  ;;  %v2834_v61 = vpack.c.bf16 %v2807_v38, %v2806_v52  ;;  %v3089_v3 = vpack.c.bf16 %v3063_v7, %v3062_v24 }
 0x39e   : > { %v7771_v60 = vadd.f32 %v2241_v62, %v2026_v21  ;;  %v2500_v62 = vadd.f32 %v7256_v37, %v7526_v35  ;;  %v7783_v21 = vpop.f32.mrf.mxu1  ;;  %v7792_v37 = vld [vmem:[%s8716_s7] ss:$0 sm:$0xff] }
 0x3a0   : > { %8834 = vst [vmem:[#allocation102_spill] sm:$0xff] %v7771_v60  ;;  %v2754_v11 = vadd.f32 %v7422_v46, %v2500_v62  ;;  %v3064_v62 = vld [vmem:[#allocation2 + $0xc5] sm:$0xff] }
 0x3a3   : > { %v1989_v13 = vpop.f32.mrf.mxu2 }
 0x3a4   : > { %v2027_v53 = vadd.f32 %v1989_v13, %v7519_v48  ;;  %v3174_v20 = vpop.f32.mrf.mxu3 }
 0x3a6   : > { %v7779_v5 = vadd.f32 %v2243_v42, %v2027_v53  ;;  %v2501_v42 = vadd.f32 %v7279_v30, %v7533_v28  ;;  %v2809_v53 = vld [vmem:[#allocation2 + $0xbc] sm:$0xff]  ;;  %v7795_v46 = vpop.f32.mrf.mxu1 }
 0x3a8   : > { %2957 = vmatmul.bf16.gmra.mxu2 %v2834_v61  ;;  %v2755_v35 = vadd.f32 %v7440_v33, %v2501_v42 }
 0x3a9   : > { %3216 = vmatmul.bf16.gmra.mxu3 %v3089_v3 }
 0x3ab   : > { %v2918_v60 = vpop.f32.mrf.mxu2 }
 0x3ac   : > { %v3008_v34 = vadd.f32 %v2918_v60, %v2754_v11  ;;  %v3177_v48 = vpop.f32.mrf.mxu3  ;;  %v2808_v60 = vld [vmem:[#allocation2 + $0xb4] sm:$0xff] }
 0x3ad   : > { %v2835_v28 = vpack.c.bf16 %v2809_v53, %v2808_v60 }
 0x3ae   : > { %v3262_v13 = vadd.f32 %v3172_v32, %v3008_v34  ;;  %v3065_v34 = vld [vmem:[#allocation2 + $0xcd] sm:$0xff] }
 0x3af   : > { %v3090_v33 = vpack.c.bf16 %v3065_v34, %v3064_v62 }
 0x3b0   : > { %v3516_v38 = vadd.f32 %v7661_v49, %v3262_v13  ;;  %v2502_v49 = vadd.f32 %v7295_v50, %v7538_v16 }
 0x3b2   : > { %v3556_v32 = vadd.f32 %v7792_v37, %v3516_v38  ;;  %v2756_v13 = vadd.f32 %v7467_v56, %v2502_v49  ;;  %v2810_v49 = vld [vmem:[#allocation2 + $0xc4] sm:$0xff] }
 0x3b3   : > { %v2920_v7 = vpop.f32.mrf.mxu2 }
 0x3b4   : > { %v3009_v52 = vadd.f32 %v2920_v7, %v2755_v35  ;;  %v3179_v61 = vpop.f32.mrf.mxu3  ;;  %v3628_v3 = vmul.f32 0.2, %v3556_v32  ;;  %vm3592_vm11 = vcmp.ge.f32.partialorder %v3556_v32, 0.0  ;;  %v7803_v7 = vpop.f32.mrf.mxu1 }
 0x3b6   : > { %v3263_v30 = vadd.f32 %v3174_v20, %v3009_v52  ;;  %v3664_v50 = vsel %vm3592_vm11, %v3556_v32, %v3628_v3 }
 0x3b8   : > { %v3517_v24 = vadd.f32 %v7667_v47, %v3263_v30  ;;  %2962 = vmatmul.bf16.gmra.mxu2 %v2835_v28  ;;  %v2503_v47 = vadd.f32 %v7310_v45, %v7545_v19  ;;  %v2811_v30 = vld [vmem:[#allocation2 + $0xcc] sm:$0xff]  ;;  %v3066_v45 = vld [vmem:[#allocation2 + $0xd5] sm:$0xff] }
 0x3b9   : > { %3221 = vmatmul.bf16.gmra.mxu3 %v3090_v33  ;;  %v2836_v3 = vpack.c.bf16 %v2811_v30, %v2810_v49 }
 0x3ba   : > { %v3557_v11 = vadd.f32 %v7792_v37, %v3517_v24  ;;  %v2757_v56 = vadd.f32 %v7486_v23, %v2503_v47  ;;  %v3067_v24 = vld [vmem:[#allocation2 + $0xdd] sm:$0xff] }
 0x3bb   : > { %v2923_v42 = vpop.f32.mrf.mxu2  ;;  %v3091_v23 = vpack.c.bf16 %v3067_v24, %v3066_v45  ;;  %v3069_v45 = vld [vmem:[#allocation2 + $0xed] sm:$0xff] }
 0x3bc   : > { %vm3593_vm4 = vcmp.ge.f32.partialorder %v3557_v11, 0.0  ;;  %v3629_v38 = vmul.f32 0.2, %v3557_v11  ;;  %v3010_v20 = vadd.f32 %v2923_v42, %v2756_v13  ;;  %v3182_v35 = vpop.f32.mrf.mxu3  ;;  %v7812_v19 = vpop.f32.mrf.mxu1  ;;  %v8836_v42 = vld [vmem:[#allocation58_spill] sm:$0xff] }
 0x3be   : > { %v3665_v16 = vsel %vm3593_vm4, %v3557_v11, %v3629_v38  ;;  %v3264_v53 = vadd.f32 %v3177_v48, %v3010_v20  ;;  %v8835_v48 = vld [vmem:[#allocation30_spill] sm:$0xff] }
 0x3bf   : > { %v3700_v52 = vpack.c.bf16 %v3665_v16, %v3664_v50  ;;  %v2504_v11 = vadd.f32 %v8835_v48, %v7552_v40  ;;  %v2812_v48 = vld [vmem:[#allocation2 + $0xd4] sm:$0xff] }
 0x3c0   : > { %v3518_v60 = vadd.f32 %v7674_v10, %v3264_v53 }
 0x3c1   : > { %3794 = vmatmul.bf16.vlgmr.msrb.gmra.mxu1 %v3700_v52  ;;  %v2758_v38 = vadd.f32 %v8836_v42, %v2504_v11  ;;  %v3068_v42 = vld [vmem:[#allocation2 + $0xe5] sm:$0xff] }
 0x3c2   : > { %v3558_v33 = vadd.f32 %v7792_v37, %v3518_v60  ;;  %v8837_v60 = vld [vmem:[#allocation33_spill] sm:$0xff] }
 0x3c3   : > { %v2925_v34 = vpop.f32.mrf.mxu2 }
 0x3c4   : > { %v3011_v28 = vadd.f32 %v2925_v34, %v2757_v56  ;;  %v3184_v62 = vpop.f32.mrf.mxu3  ;;  %v3630_v20 = vmul.f32 0.2, %v3558_v33  ;;  %vm3594_vm5 = vcmp.ge.f32.partialorder %v3558_v33, 0.0  ;;  %v7819_v34 = vpop.f32.mrf.mxu1 }
 0x3c6   : > { %v3265_v32 = vadd.f32 %v3179_v61, %v3011_v28  ;;  %v3666_v47 = vsel %vm3594_vm5, %v3558_v33, %v3630_v20  ;;  %v8838_v28 = vld [vmem:[#allocation61_spill] sm:$0xff] }
 0x3c8   : > { %v3519_v10 = vadd.f32 %v7679_v14, %v3265_v32  ;;  %2967 = vmatmul.bf16.gmra.mxu2 %v2836_v3  ;;  %v2505_v14 = vadd.f32 %v8837_v60, %v7555_v55  ;;  %v2813_v32 = vld [vmem:[#allocation2 + $0xdc] sm:$0xff] }
 0x3c9   : > { %3226 = vmatmul.bf16.gmra.mxu3 %v3091_v23  ;;  %v2837_v55 = vpack.c.bf16 %v2813_v32, %v2812_v48  ;;  %v8839_v23 = vld [vmem:[#allocation34_spill] sm:$0xff]  ;;  %v7839_v32 = vpop.f32.mrf.mxu0  ;;  %v8842_v48 = vld [vmem:[#allocation65_spill] sm:$0xff] }
 0x3ca   : > { %v3559_v13 = vadd.f32 %v7792_v37, %v3519_v10  ;;  %v2759_v49 = vadd.f32 %v8838_v28, %v2505_v14  ;;  %v7835_v28 = vpop.permute.xlu2 %4331 }
 0x3cb   : > { %v2928_v50 = vpop.f32.mrf.mxu2 }
 0x3cc   : > { %v3012_v61 = vadd.f32 %v2928_v50, %v2758_v38  ;;  %vm3595_vm6 = vcmp.ge.f32.partialorder %v3559_v13, 0.0  ;;  %v3631_v16 = vmul.f32 0.2, %v3559_v13  ;;  %v3187_v53 = vpop.f32.mrf.mxu3  ;;  %v3092_v38 = vpack.c.bf16 %v3069_v45, %v3068_v42  ;;  %v8840_v50 = vld [vmem:[#allocation63_spill] sm:$0xff] }
 0x3ce   : > { %v3266_v40 = vadd.f32 %v3182_v35, %v3012_v61  ;;  %v3667_v52 = vsel %vm3595_vm6, %v3559_v13, %v3631_v16  ;;  %v7823_v35 = vpop.permute.xlu0 %4334  ;;  %v2506_v13 = vadd.f32 %v8839_v23, %v7560_v2 }
 0x3cf   : > { %v3701_v56 = vpack.c.bf16 %v3667_v52, %v3666_v47  ;;  %v7831_v47 = vpop.f32.mrf.mxu1 }
 0x3d0   : > { %v3520_v30 = vadd.f32 %v7684_v15, %v3266_v40  ;;  %v2760_v61 = vadd.f32 %v8840_v50, %v2506_v13  ;;  %v3071_v13 = vld [vmem:[#allocation2 + $0xfd] sm:$0xff] }
 0x3d1   : > { %3799 = vmatmul.bf16.gmra.mxu1 %v3701_v56 }
 0x3d2   : > { %v3560_v33 = vadd.f32 %v7792_v37, %v3520_v30 }
 0x3d3   : > { %v2930_v24 = vpop.f32.mrf.mxu2 }
 0x3d4   : > { %v3013_v3 = vadd.f32 %v2930_v24, %v2759_v49  ;;  %v3189_v11 = vpop.f32.mrf.mxu3  ;;  %v3632_v16 = vmul.f32 0.2, %v3560_v33  ;;  %vm3596_vm7 = vcmp.ge.f32.partialorder %v3560_v33, 0.0 }
 0x3d6   : > { %v3267_v10 = vadd.f32 %v3184_v62, %v3013_v3  ;;  %v3668_v14 = vsel %vm3596_vm7, %v3560_v33, %v3632_v16  ;;  %v7837_v24 = vpop.permute.xlu0 %4328  ;;  %v2814_v33 = vld [vmem:[#allocation2 + $0xe4] sm:$0xff] }
 0x3d7   : > { %v7843_v42 = vpop.f32.mrf.mxu1 }
 0x3d8   : > { %v3521_v15 = vadd.f32 %v7690_v43, %v3267_v10  ;;  %2972 = vmatmul.bf16.gmra.mxu2 %v2837_v55  ;;  %v8841_v43 = vld [vmem:[#allocation37_spill] sm:$0xff] }
 0x3d9   : > { %3231 = vmatmul.bf16.gmra.mxu3 %v3092_v38  ;;  %v2507_v30 = vadd.f32 %v8841_v43, %v7565_v63  ;;  %v2815_v55 = vld [vmem:[#allocation2 + $0xec] sm:$0xff] }
 0x3da   : > { %v3561_v20 = vadd.f32 %v7792_v37, %v3521_v15  ;;  %v2838_v38 = vpack.c.bf16 %v2815_v55, %v2814_v33  ;;  %v7861_v33 = vpop.permute.xlu1 %4379 }
 0x3db   : > { %v2933_v40 = vpop.f32.mrf.mxu2  ;;  %v2761_v45 = vadd.f32 %v8842_v48, %v2507_v30  ;;  %8847 = vst [vmem:[#allocation58_spill] sm:$0xff] %v7861_v33 }
 0x3dc   : > { %v3014_v62 = vadd.f32 %v2933_v40, %v2760_v61  ;;  %vm3597_vm8 = vcmp.ge.f32.partialorder %v3561_v20, 0.0  ;;  %v3633_v52 = vmul.f32 0.2, %v3561_v20  ;;  %v3192_v60 = vpop.f32.mrf.mxu3  ;;  %v3070_v61 = vld [vmem:[#allocation2 + $0xf5] sm:$0xff]  ;;  %v7849_v40 = vpop.permute.xlu2 %4382 }
 0x3dd   : > { %v3093_v16 = vpack.c.bf16 %v3071_v13, %v3070_v61  ;;  %8844 = vst [vmem:[#allocation30_spill] sm:$0xff] %v7849_v40  ;;  %v2817_v61 = vld [vmem:[#allocation2 + $0xfc] sm:$0xff]  ;;  %v2823_v40 = vld [vmem:[#allocation2 + $0x12c] sm:$0xff] }
 0x3de   : > { %v3268_v2 = vadd.f32 %v3187_v53, %v3014_v62  ;;  %v3669_v56 = vsel %vm3597_vm8, %v3561_v20, %v3633_v52  ;;  %v8843_v20 = vld [vmem:[#allocation38_spill] sm:$0xff]  ;;  %v7851_v62 = vpop.permute.xlu0 %4337 }
 0x3df   : > { %v3702_v49 = vpack.c.bf16 %v3669_v56, %v3668_v14  ;;  %v2508_v50 = vadd.f32 %v8843_v20, %v7570_v39 }
 0x3e0   : > { %v3522_v3 = vadd.f32 %v7699_v44, %v3268_v2  ;;  %v8845_v2 = vld [vmem:[#allocation67_spill] sm:$0xff] }
 0x3e1   : > { %3804 = vmatmul.bf16.gmra.mxu1 %v3702_v49  ;;  %v2762_v14 = vadd.f32 %v8845_v2, %v2508_v50 }
 0x3e2   : > { %v3562_v63 = vadd.f32 %v7792_v37, %v3522_v3 }
 0x3e3   : > { %v2935_v10 = vpop.f32.mrf.mxu2 }
 0x3e4   : > { %v3015_v53 = vadd.f32 %v2935_v10, %v2761_v45  ;;  %v3194_v23 = vpop.f32.mrf.mxu3  ;;  %v3634_v56 = vmul.f32 0.2, %v3562_v63  ;;  %vm3598_vm9 = vcmp.ge.f32.partialorder %v3562_v63, 0.0  ;;  %v8846_v45 = vld [vmem:[#allocation41_spill] sm:$0xff]  ;;  %v7865_v20 = vpop.permute.xlu2 %4325 }
 0x3e5   : > { %v2509_v10 = vadd.f32 %v8846_v45, %v7575_v51  ;;  %v2816_v51 = vld [vmem:[#allocation2 + $0xf4] sm:$0xff]  ;;  %v8851_v45 = vld [vmem:[#allocation71_spill] sm:$0xff] }
 0x3e6   : > { %v3269_v15 = vadd.f32 %v3189_v11, %v3015_v53  ;;  %v7855_v11 = vpop.f32.mrf.mxu0  ;;  %v3670_v3 = vsel %vm3598_vm9, %v3562_v63, %v3634_v56  ;;  %v7859_v53 = vpop.f32.mrf.mxu1  ;;  %v2839_v56 = vpack.c.bf16 %v2817_v61, %v2816_v51 }
 0x3e8   : > { %v3523_v44 = vadd.f32 %v7706_v59, %v3269_v15  ;;  %2977 = vmatmul.bf16.gmra.mxu2 %v2838_v38  ;;  %v8848_v15 = vld [vmem:[#allocation69_spill] sm:$0xff] }
 0x3e9   : > { %3236 = vmatmul.bf16.gmra.mxu3 %v3093_v16  ;;  %v2763_v38 = vadd.f32 %v8848_v15, %v2509_v10  ;;  %v7879_v15 = vpop.permute.xlu1 %4376 }
 0x3ea   : > { %v3563_v52 = vadd.f32 %v7792_v37, %v3523_v44  ;;  %8852 = vst [vmem:[#allocation61_spill] sm:$0xff] %v7879_v15 }
 0x3eb   : > { %v2938_v43 = vpop.f32.mrf.mxu2 }
 0x3ec   : > { %v3016_v39 = vadd.f32 %v2938_v43, %v2762_v14  ;;  %vm3599_vm10 = vcmp.ge.f32.partialorder %v3563_v52, 0.0  ;;  %v3635_v30 = vmul.f32 0.2, %v3563_v52  ;;  %v3197_v59 = vpop.f32.mrf.mxu3 }
 0x3ee   : > { %v3270_v49 = vadd.f32 %v3192_v60, %v3016_v39  ;;  %v3671_v48 = vsel %vm3599_vm10, %v3563_v52, %v3635_v30  ;;  %v7867_v60 = vpop.permute.xlu0 %4385  ;;  %v7869_v44 = vpop.f32.mrf.mxu0  ;;  %v3073_v52 = vld [vmem:[#allocation2 + $0x10d] sm:$0xff]  ;;  %v3072_v39 = vld [vmem:[#allocation2 + $0x105] sm:$0xff]  ;;  %vm4475_vm10 = vcmask 1042432  }
 0x3ef   : > { %v3703_v55 = vpack.c.bf16 %v3671_v48, %v3670_v3  ;;  %8849 = vst [vmem:[#allocation33_spill] sm:$0xff] %v7867_v60  ;;  %v7875_v3 = vpop.f32.mrf.mxu1 }
 0x3f0   : > { %v3524_v13 = vadd.f32 %v7713_v9, %v3270_v49  ;;  %v8850_v9 = vld [vmem:[#allocation42_spill] sm:$0xff]  ;;  %v3094_v49 = vpack.c.bf16 %v3073_v52, %v3072_v39  ;;  %v8855_v52 = vld [vmem:[#allocation45_spill] sm:$0xff] }
 0x3f1   : > { %3809 = vmatmul.bf16.gmra.mxu1 %v3703_v55  ;;  %v2510_v43 = vadd.f32 %v8850_v9, %v7584_v25  ;;  %v8856_v39 = vld [vmem:[#allocation73_spill] sm:$0xff]  ;;  %v7893_v60 = vpop.permute.xlu1 %4340 }
 0x3f2   : > { %v3564_v2 = vadd.f32 %v7792_v37, %v3524_v13 }
 0x3f3   : > { %v2940_v50 = vpop.f32.mrf.mxu2  ;;  %v2764_v10 = vadd.f32 %v8851_v45, %v2510_v43  ;;  %v2819_v45 = vld [vmem:[#allocation2 + $0x10c] sm:$0xff] }
 0x3f4   : > { %v3017_v63 = vadd.f32 %v2940_v50, %v2763_v38  ;;  %v3199_v16 = vpop.f32.mrf.mxu3  ;;  %v3636_v55 = vmul.f32 0.2, %v3564_v2  ;;  %vm3600_vm12 = vcmp.ge.f32.partialorder %v3564_v2, 0.0  ;;  %v7881_v38 = vpop.permute.xlu2 %4373 }
 0x3f5   : > { %8853 = vst [vmem:[#allocation34_spill] sm:$0xff] %v7881_v38 }
 0x3f6   : > { %v3271_v14 = vadd.f32 %v3194_v23, %v3017_v63  ;;  %v7883_v50 = vpop.permute.xlu0 %4370  ;;  %v3672_v63 = vsel %vm3600_vm12, %v3564_v2, %v3636_v55 }
 0x3f7   : > { %8854 = vst [vmem:[#allocation63_spill] sm:$0xff] %v7883_v50 }
 0x3f8   : > { %v3525_v30 = vadd.f32 %v7721_v26, %v3271_v14  ;;  %2982 = vmatmul.bf16.gmra.mxu2 %v2839_v56  ;;  %v2511_v14 = vadd.f32 %v8855_v52, %v7595_v18  ;;  %v7887_v56 = vpop.f32.mrf.mxu0  ;;  %v8857_v18 = vld [vmem:[#allocation46_spill] sm:$0xff] }
 0x3f9   : > { %3241 = vmatmul.bf16.gmra.mxu3 %v3094_v49  ;;  %v2512_v55 = vadd.f32 %v8857_v18, %v7612_v27 }
 0x3fa   : > { %v3565_v48 = vadd.f32 %v7792_v37, %v3525_v30  ;;  %v2765_v30 = vadd.f32 %v8856_v39, %v2511_v14 }
 0x3fb   : > { %v2943_v23 = vpop.f32.mrf.mxu2 }
 0x3fc   : > { %v3018_v13 = vadd.f32 %v2943_v23, %v2764_v10  ;;  %vm3601_vm13 = vcmp.ge.f32.partialorder %v3565_v48, 0.0  ;;  %v3637_v25 = vmul.f32 0.2, %v3565_v48  ;;  %v3202_v26 = vpop.f32.mrf.mxu3  ;;  %v7891_v10 = vpop.f32.mrf.mxu1 }
 0x3fe   : > { %v3272_v61 = vadd.f32 %v3197_v59, %v3018_v13  ;;  %v3673_v51 = vsel %vm3601_vm13, %v3565_v48, %v3637_v25  ;;  %v2818_v59 = vld [vmem:[#allocation2 + $0x104] sm:$0xff] }
 0x3ff   : > { %v3704_v9 = vpack.c.bf16 %v3673_v51, %v3672_v63  ;;  %v3075_v48 = vld [vmem:[#allocation2 + $0x11d] sm:$0xff]  ;;  %v2840_v63 = vpack.c.bf16 %v2819_v45, %v2818_v59  ;;  %v7900_v51 = vpop.permute.xlu0 %4316 }
 0x400   : > { %v3526_v43 = vadd.f32 %v7733_v8, %v3272_v61  ;;  %v7898_v8 = vpop.permute.xlu2 %4322  ;;  %v3074_v61 = vld [vmem:[#allocation2 + $0x115] sm:$0xff] }
 0x401   : > { %3814 = vmatmul.bf16.gmra.mxu1 %v3704_v9  ;;  %v3095_v14 = vpack.c.bf16 %v3075_v48, %v3074_v61  ;;  %v7903_v9 = vpop.f32.mrf.mxu0  ;;  %v8858_v48 = vld [vmem:[#allocation49_spill] sm:$0xff] }
 0x402   : > { %v3566_v13 = vadd.f32 %v7792_v37, %v3526_v43 }
 0x403   : > { %v2945_v49 = vpop.f32.mrf.mxu2 }
 0x404   : > { %v3019_v23 = vadd.f32 %v2945_v49, %v2765_v30  ;;  %v3204_v2 = vpop.f32.mrf.mxu3  ;;  %v2766_v30 = vadd.f32 %v7694_v1, %v2512_v55  ;;  %v3638_v27 = vmul.f32 0.2, %v3566_v13  ;;  %vm3602_vm14 = vcmp.ge.f32.partialorder %v3566_v13, 0.0 }
 0x406   : > { %v3273_v25 = vadd.f32 %v3199_v16, %v3019_v23  ;;  %v7907_v23 = vpop.f32.mrf.mxu1 }
 0x407   : > { %v7915_v55 = vpop.permute.xlu0 %4364 }
 0x408   : > { %v3527_v52 = vadd.f32 %v7746_v17, %v3273_v25  ;;  %2987 = vmatmul.bf16.gmra.mxu2 %v2840_v63  ;;  %v3674_v17 = vsel %vm3602_vm14, %v3566_v13, %v3638_v27  ;;  %v2513_v25 = vadd.f32 %v8858_v48, %v7629_v57  ;;  %v7911_v63 = vpop.permute.xlu1 %4388  ;;  %v7913_v1 = vpop.permute.xlu2 %4367  ;;  %8861 = vst [vmem:[#allocation38_spill] sm:$0xff] %v7915_v55  ;;  %v2821_v13 = vld [vmem:[#allocation2 + $0x11c] sm:$0xff]  ;;  %v2820_v27 = vld [vmem:[#allocation2 + $0x114] sm:$0xff] }
 0x409   : > { %3246 = vmatmul.bf16.gmra.mxu3 %v3095_v14  ;;  %8859 = vst [vmem:[#allocation37_spill] sm:$0xff] %v7911_v63  ;;  %v3077_v57 = vld [vmem:[#allocation2 + $0x12d] sm:$0xff]  ;;  %v2841_v48 = vpack.c.bf16 %v2821_v13, %v2820_v27 }
 0x40a   : > { %v3567_v39 = vadd.f32 %v7792_v37, %v3527_v52  ;;  %8860 = vst [vmem:[#allocation65_spill] sm:$0xff] %v7913_v1  ;;  %v2767_v14 = vadd.f32 %v7701_v36, %v2513_v25  ;;  %v8876_v1 = vld [vmem:[#allocation9_spill] sm:$0xff] }
 0x40b   : > { %v2948_v43 = vpop.f32.mrf.mxu2 }
 0x40c   : > { %v3020_v16 = vadd.f32 %v2948_v43, %v2766_v30  ;;  %vm3603_vm15 = vcmp.ge.f32.partialorder %v3567_v39, 0.0  ;;  %v3639_v49 = vmul.f32 0.2, %v3567_v39  ;;  %v3207_v45 = vpop.f32.mrf.mxu3  ;;  %v7919_v30 = vpop.f32.mrf.mxu0 }
 0x40e   : > { %v3274_v59 = vadd.f32 %v3202_v26, %v3020_v16  ;;  %v3675_v18 = vsel %vm3603_vm15, %v3567_v39, %v3639_v49  ;;  %v8862_v16 = vld [vmem:[#allocation50_spill] sm:$0xff]  ;;  %v7924_v63 = vpop.f32.mrf.mxu1 }
 0x40f   : > { %v3705_v61 = vpack.c.bf16 %v3675_v18, %v3674_v17  ;;  %v2514_v49 = vadd.f32 %v8862_v16, %v7640_v31 }
 0x410   : > { %v3528_v52 = vadd.f32 %v7839_v32, %v3274_v59  ;;  %v7927_v59 = vpop.permute.xlu1 %4319  ;;  %v7931_v31 = vpop.permute.xlu2 %4346 }
 0x411   : > { %3819 = vmatmul.bf16.gmra.mxu1 %v3705_v61  ;;  %v3076_v61 = vld [vmem:[#allocation2 + $0x125] sm:$0xff] }
 0x412   : > { %v3568_v17 = vadd.f32 %v7792_v37, %v3528_v52  ;;  %v3096_v32 = vpack.c.bf16 %v3077_v57, %v3076_v61 }
 0x413   : > { %v2950_v26 = vpop.f32.mrf.mxu2 }
 0x414   : > { %v3021_v39 = vadd.f32 %v2950_v26, %v2767_v14  ;;  %v3209_v43 = vpop.f32.mrf.mxu3  ;;  %v2768_v14 = vadd.f32 %v7708_v41, %v2514_v49  ;;  %v3640_v26 = vmul.f32 0.2, %v3568_v17  ;;  %vm3604_vm1 = vcmp.ge.f32.partialorder %v3568_v17, 0.0 }
 0x416   : > { %v3275_v18 = vadd.f32 %v3204_v2, %v3021_v39  ;;  %v7933_v2 = vpop.permute.xlu0 %4313  ;;  %v3676_v16 = vsel %vm3604_vm1, %v3568_v17, %v3640_v26  ;;  %v7939_v61 = vpop.f32.mrf.mxu1 }
 0x418   : > { %v3529_v36 = vadd.f32 %v7855_v11, %v3275_v18  ;;  %2992 = vmatmul.bf16.gmra.mxu2 %v2841_v48  ;;  %v7935_v11 = vpop.f32.mrf.mxu0  ;;  %v8863_v48 = vld [vmem:[#allocation53_spill] sm:$0xff]  ;;  %v7945_v15 = vpop.permute.xlu2 %4394 }
 0x419   : > { %3251 = vmatmul.bf16.gmra.mxu3 %v3096_v32  ;;  %v2515_v41 = vadd.f32 %v8863_v48, %v7649_v29  ;;  %8864 = vst [vmem:[#allocation67_spill] sm:$0xff] %v7945_v15  ;;  %v8866_v29 = vld [vmem:[#allocation54_spill] sm:$0xff] }
 0x41a   : > { %v3569_v25 = vadd.f32 %v7792_v37, %v3529_v36  ;;  %v2825_v15 = vld [vmem:[#allocation2 + $0x13c] sm:$0xff] }
 0x41b   : > { %v2953_v52 = vpop.f32.mrf.mxu2  ;;  %v2769_v32 = vadd.f32 %v7716_v58, %v2515_v41  ;;  %v6292_v58 = vmov -1e+30  }
 0x41c   : > { %v3022_v13 = vadd.f32 %v2953_v52, %v2768_v14  ;;  %vm3605_vm2 = vcmp.ge.f32.partialorder %v3569_v25, 0.0  ;;  %v3641_v39 = vmul.f32 0.2, %v3569_v25  ;;  %v3212_v27 = vpop.f32.mrf.mxu3  ;;  %v7943_v14 = vpop.permute.xlu1 %4343  ;;  %4178 = vst [vmem:[#allocation3 + $0x10] sm:$0xff] %v6292_v58 }
 0x41d   : > { %4176 = vst [vmem:[#allocation3] sm:$0xff] %v6292_v58 }
 0x41e   : > { %v3276_v57 = vadd.f32 %v3207_v45, %v3022_v13  ;;  %v3677_v18 = vsel %vm3605_vm2, %v3569_v25, %v3641_v39  ;;  %v2822_v45 = vld [vmem:[#allocation2 + $0x124] sm:$0xff]  ;;  %v7947_v26 = vpop.permute.xlu0 %4358  ;;  %v2516_v13 = vadd.f32 %v8866_v29, %v7654_v0  ;;  %4177 = vst [vmem:[#allocation3 + $0x8] sm:$0xff] %v6292_v58 }
 0x41f   : > { %v3706_v49 = vpack.c.bf16 %v3677_v18, %v3676_v16  ;;  %v3079_v25 = vld [vmem:[#allocation2 + $0x13d] sm:$0xff]  ;;  %8865 = vst [vmem:[#allocation41_spill] sm:$0xff] %v7947_v26  ;;  %v3078_v18 = vld [vmem:[#allocation2 + $0x135] sm:$0xff] }
 0x420   : > { %v3530_v36 = vadd.f32 %v7869_v44, %v3276_v57  ;;  %v2842_v57 = vpack.c.bf16 %v2823_v40, %v2822_v45  ;;  %v7952_v16 = vpop.f32.mrf.mxu0  ;;  %v3097_v41 = vpack.c.bf16 %v3079_v25, %v3078_v18  ;;  %4214 = vst [vmem:[#allocation3 + $0x130] sm:$0xff] %v6292_v58  ;;  %v2770_v0 = vadd.f32 %v7725_v54, %v2516_v13  ;;  %v7957_v40 = vpop.f32.mrf.mxu1 }
 0x421   : > { %3824 = vmatmul.bf16.gmra.mxu1 %v3706_v49  ;;  %v7963_v18 = vpop.permute.xlu2 %4310 }
 0x422   : > { %v3570_v39 = vadd.f32 %v7792_v37, %v3530_v36 }
 0x423   : > { %v2955_v52 = vpop.f32.mrf.mxu2 }
 0x424   : > { %v3023_v33 = vadd.f32 %v2955_v52, %v2769_v32  ;;  %v3214_v17 = vpop.f32.mrf.mxu3  ;;  %v3642_v36 = vmul.f32 0.2, %v3570_v39  ;;  %vm3606_vm3 = vcmp.ge.f32.partialorder %v3570_v39, 0.0  ;;  %v7959_v52 = vpop.permute.xlu1 %4391 }
 0x425   : > { %8867 = vst [vmem:[#allocation69_spill] sm:$0xff] %v7959_v52 }
 0x426   : > { %v3277_v44 = vadd.f32 %v3209_v43, %v3023_v33  ;;  %v3678_v25 = vsel %vm3606_vm3, %v3570_v39, %v3642_v36  ;;  %v7965_v13 = vpop.permute.xlu0 %4304  ;;  %v2824_v39 = vld [vmem:[#allocation2 + $0x134] sm:$0xff] }
 0x427   : > { %v8870_v36 = vld [vmem:[#allocation86_spill] sm:$0xff] }
 0x428   : > { %v3531_v48 = vadd.f32 %v7887_v56, %v3277_v44  ;;  %2997 = vmatmul.bf16.gmra.mxu2 %v2842_v57  ;;  %v8868_v44 = vld [vmem:[#allocation85_spill] sm:$0xff] }
 0x429   : > { %3256 = vmatmul.bf16.gmra.mxu3 %v3097_v41  ;;  %v8869_v57 = vld [vmem:[#allocation57_spill] sm:$0xff] }
 0x42a   : > { %v3571_v49 = vadd.f32 %v7792_v37, %v3531_v48  ;;  %v2517_v58 = vadd.f32 %v8869_v57, %v8868_v44  ;;  %v7967_v48 = vpop.f32.mrf.mxu0  ;;  %v7973_v44 = vpop.f32.mrf.mxu1  ;;  %v2843_v57 = vpack.c.bf16 %v2825_v15, %v2824_v39  ;;  %v7990_v15 = vld [vmem:[%s8718_s9] ss:$0 sm:$0xff] }
 0x42b   : > { %v2958_v33 = vpop.f32.mrf.mxu2 }
 0x42c   : > { %v3024_v43 = vadd.f32 %v2958_v33, %v2770_v0  ;;  %vm3607_vm0 = vcmp.ge.f32.partialorder %v3571_v49, 0.0  ;;  %v3643_v32 = vmul.f32 0.2, %v3571_v49  ;;  %v3217_v56 = vpop.f32.mrf.mxu3  ;;  %v2771_v0 = vadd.f32 %v7735_v12, %v2517_v58  ;;  %v7976_v52 = vpop.permute.xlu1 %4361 }
 0x42d   : > { %8872 = vst [vmem:[#allocation42_spill] sm:$0xff] %v7976_v52  ;;  %v7979_v12 = vpop.permute.xlu2 %4355 }
 0x42e   : > { %v3278_v45 = vadd.f32 %v3212_v27, %v3024_v43  ;;  %v3679_v29 = vsel %vm3607_vm0, %v3571_v49, %v3643_v32  ;;  %v8871_v43 = vld [vmem:[#allocation60_spill] sm:$0xff]  ;;  %8873 = vst [vmem:[#allocation71_spill] sm:$0xff] %v7979_v12 }
 0x42f   : > { %v3707_v54 = vpack.c.bf16 %v3679_v29, %v3678_v25  ;;  %v2518_v32 = vadd.f32 %v8871_v43, %v8870_v36 }
 0x430   : > { %v3532_v41 = vadd.f32 %v7903_v9, %v3278_v45  ;;  %v7981_v45 = vpop.permute.xlu0 %4349 }
 0x431   : > { %3829 = vmatmul.bf16.gmra.mxu1 %v3707_v54  ;;  %v2772_v54 = vadd.f32 %v7748_v22, %v2518_v32  ;;  %v8875_v22 = vld [vmem:[#allocation62_spill] sm:$0xff] }
 0x432   : > { %v3572_v25 = vadd.f32 %v7792_v37, %v3532_v41 }
 0x433   : > { %v2960_v33 = vpop.f32.mrf.mxu2 }
 0x434   : > { %v3025_v27 = vadd.f32 %v2960_v33, %v2771_v0  ;;  %v3219_v49 = vpop.f32.mrf.mxu3  ;;  %v3644_v0 = vmul.f32 0.2, %v3572_v25  ;;  %v7985_v33 = vpop.f32.mrf.mxu0  ;;  %vm3608_vm11 = vcmp.ge.f32.partialorder %v3572_v25, 0.0 }
 0x435   : > { %v7995_v50 = vpop.permute.xlu1 %4307  ;;  %v8000_v52 = vpop.permute.xlu2 %4301 }
 0x436   : > { %v3279_v29 = vadd.f32 %v3214_v17, %v3025_v27  ;;  %v3680_v43 = vsel %vm3608_vm11, %v3572_v25, %v3644_v0  ;;  %vm4405_vm3 = vcmp.eq.s32.totalorder %v8000_v52, 1  ;;  %vm4406_vm11 = vcmp.eq.s32.totalorder %v7965_v13, 1 }
 0x438   : > { %v3533_v9 = vadd.f32 %v7919_v30, %v3279_v29  ;;  %3002 = vmatmul.bf16.gmra.mxu2 %v2843_v57  ;;  %v8874_v57 = vld [vmem:[#allocation87_spill] sm:$0xff] }
 0x439   : > { %v2519_v32 = vadd.f32 %v8875_v22, %v8874_v57  ;;  %v8877_v57 = vld [vmem:[#allocation88_spill] sm:$0xff] }
 0x43a   : > { %v3573_v58 = vadd.f32 %v7792_v37, %v3533_v9 }
 0x43b   : > { %v2963_v36 = vpop.f32.mrf.mxu2 }
 0x43c   : > { %v3026_v30 = vadd.f32 %v2963_v36, %v2772_v54  ;;  %vm3609_vm4 = vcmp.ge.f32.partialorder %v3573_v58, 0.0  ;;  %v3645_v17 = vmul.f32 0.2, %v3573_v58  ;;  %v3222_v41 = vpop.f32.mrf.mxu3  ;;  %v2773_v36 = vadd.f32 %v7760_v6, %v2519_v32 }
 0x43e   : > { %v3280_v27 = vadd.f32 %v3217_v56, %v3026_v30  ;;  %v3795_v39 = vpop.f32.mrf.mxu1  ;;  %v3681_v29 = vsel %vm3609_vm4, %v3573_v58, %v3645_v17  ;;  %v4293_v58 = vpop.permute.xlu0 %4292 }
 0x43f   : > { %v3796_v9 = vadd.f32 %v7990_v15, %v3795_v39  ;;  %v3708_v38 = vpack.c.bf16 %v3681_v29, %v3680_v43  ;;  %v8002_v30 = vpop.f32.mrf.mxu0  ;;  %vm4402_vm6 = vcmp.eq.s32.totalorder %v4293_v58, 1 }
 0x440   : > { %v3534_v54 = vadd.f32 %v7935_v11, %v3280_v27  ;;  %v8878_v11 = vld [vmem:[#allocation64_spill] sm:$0xff] }
 0x441   : > { %v4032_v55 = vadd.f32 %v8876_v1, %v3796_v9  ;;  %3834 = vmatmul.bf16.gmra.mxu1 %v3708_v38  ;;  %v2520_v27 = vadd.f32 %v8878_v11, %v8877_v57  ;;  %v8879_v9 = vld [vmem:[#allocation10_spill] sm:$0xff] }
 0x442   : > { %v3574_v43 = vadd.f32 %v7792_v37, %v3534_v54 }
 0x443   : > { %vm4068_vm5 = vcmp.ge.f32.partialorder %v4032_v55, 0.0  ;;  %v4104_v56 = vmul.f32 0.2, %v4032_v55  ;;  %v2965_v25 = vpop.f32.mrf.mxu2 }
 0x444   : > { %v3027_v0 = vadd.f32 %v2965_v25, %v2773_v36  ;;  %v3224_v39 = vpop.f32.mrf.mxu3  ;;  %v3646_v54 = vmul.f32 0.2, %v3574_v43  ;;  %v8012_v25 = vpop.permute.xlu1 %4352  ;;  %vm3610_vm8 = vcmp.ge.f32.partialorder %v3574_v43, 0.0 }
 0x445   : > { %v4140_v17 = vsel %vm4068_vm5, %v4032_v55, %v4104_v56  ;;  %v2774_v56 = vadd.f32 %v7776_v4, %v2520_v27  ;;  %8880 = vst [vmem:[#allocation45_spill] sm:$0xff] %v8012_v25 }
 0x446   : > { %v4476_v29 = vrot.slane %v4140_v17, 5  ;;  %v3281_v1 = vadd.f32 %v3219_v49, %v3027_v0  ;;  %v3797_v38 = vpop.f32.mrf.mxu1  ;;  %v3682_v27 = vsel %vm3610_vm8, %v3574_v43, %v3646_v54 }
 0x447   : > { %v3798_v6 = vadd.f32 %v7990_v15, %v3797_v38  ;;  %v4296_v38 = vpop.permute.xlu2 %4295  ;;  %v8016_v26 = vpop.f32.mrf.mxu0 }
 0x448   : > { %v4584_v22 = vsel %vm4402_vm6, %v4476_v29, -1e+30  ;;  %v3535_v32 = vadd.f32 %v7952_v16, %v3281_v1  ;;  %v8881_v16 = vld [vmem:[#allocation89_spill] sm:$0xff]  ;;  %v8882_v1 = vld [vmem:[#allocation66_spill] sm:$0xff]  ;;  %vm4403_vm12 = vcmp.eq.s32.totalorder %v4296_v38, 1 }
 0x449   : > { %4621 = vst [vmem:[#allocation3 + $0x10] sm:$0xf8] %v4584_v22  ;;  %v4033_v36 = vadd.f32 %v8879_v9, %v3798_v6  ;;  %v2521_v11 = vadd.f32 %v8882_v1, %v8881_v16 }
 0x44a   : > { %v3575_v55 = vadd.f32 %v7792_v37, %v3535_v32 }
 0x44b   : > { %vm4069_vm7 = vcmp.ge.f32.partialorder %v4033_v36, 0.0  ;;  %v4105_v49 = vmul.f32 0.2, %v4033_v36  ;;  %v2968_v0 = vpop.f32.mrf.mxu2 }
 0x44c   : > { %v3028_v58 = vadd.f32 %v2968_v0, %v2774_v56  ;;  %vm3611_vm9 = vcmp.ge.f32.partialorder %v3575_v55, 0.0  ;;  %v3647_v17 = vmul.f32 0.2, %v3575_v55  ;;  %v3227_v6 = vpop.f32.mrf.mxu3 }
 0x44d   : > { %v4141_v57 = vsel %vm4069_vm7, %v4033_v36, %v4105_v49  ;;  %v8883_v36 = vld [vmem:[#allocation11_spill] sm:$0xff]  ;;  %vm4407_vm7 = vcmp.eq.s32.totalorder %v7995_v50, 1 }
 0x44e   : > { %v4477_v22 = vrot.slane %v4141_v57, 5  ;;  %v3282_v32 = vadd.f32 %v3222_v41, %v3028_v58  ;;  %v3800_v4 = vpop.f32.mrf.mxu1  ;;  %v3683_v9 = vsel %vm3611_vm9, %v3575_v55, %v3647_v17  ;;  %v2775_v41 = vadd.f32 %v7783_v21, %v2521_v11  ;;  %v4299_v58 = vpop.permute.xlu1 %4298 }
 0x44f   : > { %v3801_v12 = vadd.f32 %v7990_v15, %v3800_v4  ;;  %v3709_v25 = vpack.c.bf16 %v3683_v9, %v3682_v27  ;;  %v8884_v27 = vld [vmem:[#allocation90_spill] sm:$0xff]  ;;  %vm4404_vm14 = vcmp.eq.s32.totalorder %v4299_v58, 1  ;;  %v8029_v11 = vpop.f32.mrf.mxu0  ;;  %vm4408_vm9 = vcmp.eq.s32.totalorder %v7963_v18, 1 }
 0x450   : > { %v4478_v56 = vsel %vm4475_vm10, %v4476_v29, %v4477_v22  ;;  %v3536_v16 = vadd.f32 %v7967_v48, %v3282_v32 }
 0x451   : > { %v4585_v0 = vsel %vm4403_vm12, %v4478_v56, -1e+30  ;;  %v4034_v49 = vadd.f32 %v8883_v36, %v3801_v12  ;;  %3839 = vmatmul.bf16.gmra.mxu1 %v3709_v25  ;;  %v8885_v12 = vld [vmem:[#allocation68_spill] sm:$0xff] }
 0x452   : > { %4622 = vst [vmem:[#allocation3 + $0x18] sm:$0xff] %v4585_v0  ;;  %v3576_v38 = vadd.f32 %v7792_v37, %v3536_v16  ;;  %v2522_v25 = vadd.f32 %v8885_v12, %v8884_v27  ;;  %v8886_v56 = vld [vmem:[#allocation12_spill] sm:$0xff] }
 0x453   : > { %vm4070_vm13 = vcmp.ge.f32.partialorder %v4034_v49, 0.0  ;;  %v4106_v43 = vmul.f32 0.2, %v4034_v49  ;;  %v2970_v55 = vpop.f32.mrf.mxu2 }
 0x454   : > { %v3029_v54 = vadd.f32 %v2970_v55, %v2775_v41  ;;  %v3229_v57 = vpop.f32.mrf.mxu3  ;;  %vm3612_vm1 = vcmp.ge.f32.partialorder %v3576_v38, 0.0 }
 0x455   : > { %v4142_v17 = vsel %vm4070_vm13, %v4034_v49, %v4106_v43  ;;  %v3648_v49 = vmul.f32 0.2, %v3576_v38 }
 0x456   : > { %v4479_v1 = vrot.slane %v4142_v17, 5  ;;  %v3283_v29 = vadd.f32 %v3224_v39, %v3029_v54  ;;  %v3802_v4 = vpop.f32.mrf.mxu1  ;;  %v2776_v39 = vadd.f32 %v7795_v46, %v2522_v25  ;;  %v8888_v54 = vld [vmem:[#allocation70_spill] sm:$0xff] }
 0x457   : > { %v3803_v9 = vadd.f32 %v7990_v15, %v3802_v4  ;;  %v3684_v12 = vsel %vm3612_vm1, %v3576_v38, %v3648_v49 }
 0x458   : > { %v4480_v21 = vsel %vm4475_vm10, %v4477_v22, %v4479_v1  ;;  %v3537_v48 = vadd.f32 %v7985_v33, %v3283_v29  ;;  %v8887_v33 = vld [vmem:[#allocation91_spill] sm:$0xff] }
 0x459   : > { %v4586_v32 = vsel %vm4404_vm14, %v4480_v21, -1e+30  ;;  %v4035_v0 = vadd.f32 %v8886_v56, %v3803_v9  ;;  %v2523_v58 = vadd.f32 %v8888_v54, %v8887_v33  ;;  %v8891_v33 = vld [vmem:[#allocation72_spill] sm:$0xff] }
 0x45a   : > { %4623 = vst [vmem:[#allocation3 + $0x20] sm:$0xff] %v4586_v32  ;;  %v3577_v36 = vadd.f32 %v7792_v37, %v3537_v48  ;;  %v8889_v32 = vld [vmem:[#allocation13_spill] sm:$0xff] }
 0x45b   : > { %vm4071_vm15 = vcmp.ge.f32.partialorder %v4035_v0, 0.0  ;;  %v4107_v16 = vmul.f32 0.2, %v4035_v0  ;;  %v2973_v41 = vpop.f32.mrf.mxu2 }
 0x45c   : > { %v3030_v43 = vadd.f32 %v2973_v41, %v2776_v39  ;;  %vm3613_vm2 = vcmp.ge.f32.partialorder %v3577_v36, 0.0  ;;  %v3649_v22 = vmul.f32 0.2, %v3577_v36  ;;  %v3232_v17 = vpop.f32.mrf.mxu3  ;;  %v2777_v39 = vadd.f32 %v7803_v7, %v2523_v58 }
 0x45d   : > { %v4143_v55 = vsel %vm4071_vm15, %v4035_v0, %v4107_v16  ;;  %vm4409_vm15 = vcmp.eq.s32.totalorder %v7933_v2, 1 }
 0x45e   : > { %v4481_v29 = vrot.slane %v4143_v55, 5  ;;  %v3284_v4 = vadd.f32 %v3227_v6, %v3030_v43  ;;  %v3805_v27 = vpop.f32.mrf.mxu1  ;;  %v3685_v9 = vsel %vm3613_vm2, %v3577_v36, %v3649_v22  ;;  %v8042_v6 = vpop.f32.mrf.mxu0  ;;  %v8890_v55 = vld [vmem:[#allocation92_spill] sm:$0xff]  ;;  %vm4410_vm2 = vcmp.eq.s32.totalorder %v7900_v51, 1 }
 0x45f   : > { %v3806_v46 = vadd.f32 %v7990_v15, %v3805_v27  ;;  %v3710_v25 = vpack.c.bf16 %v3685_v9, %v3684_v12  ;;  %v2524_v54 = vadd.f32 %v8891_v33, %v8890_v55  ;;  %v8892_v27 = vld [vmem:[#allocation14_spill] sm:$0xff] }
 0x460   : > { %v4482_v21 = vsel %vm4475_vm10, %v4479_v1, %v4481_v29  ;;  %v3538_v0 = vadd.f32 %v8002_v30, %v3284_v4 }
 0x461   : > { %v4587_v48 = vsel %vm4405_vm3, %v4482_v21, -1e+30  ;;  %v4036_v56 = vadd.f32 %v8889_v32, %v3806_v46  ;;  %3844 = vmatmul.bf16.gmra.mxu1 %v3710_v25 }
 0x462   : > { %4624 = vst [vmem:[#allocation3 + $0x28] sm:$0xff] %v4587_v48  ;;  %v3578_v52 = vadd.f32 %v7792_v37, %v3538_v0 }
 0x463   : > { %vm4072_vm0 = vcmp.ge.f32.partialorder %v4036_v56, 0.0  ;;  %v4108_v38 = vmul.f32 0.2, %v4036_v56  ;;  %v2975_v36 = vpop.f32.mrf.mxu2 }
 0x464   : > { %v3031_v49 = vadd.f32 %v2975_v36, %v2777_v39  ;;  %v3234_v41 = vpop.f32.mrf.mxu3  ;;  %v3650_v46 = vmul.f32 0.2, %v3578_v52  ;;  %vm3614_vm5 = vcmp.ge.f32.partialorder %v3578_v52, 0.0 }
 0x465   : > { %v4144_v16 = vsel %vm4072_vm0, %v4036_v56, %v4108_v38  ;;  %v8894_v56 = vld [vmem:[#allocation74_spill] sm:$0xff] }
 0x466   : > { %v4483_v1 = vrot.slane %v4144_v16, 5  ;;  %v3285_v43 = vadd.f32 %v3229_v57, %v3031_v49  ;;  %v3807_v22 = vpop.f32.mrf.mxu1  ;;  %v2778_v57 = vadd.f32 %v7812_v19, %v2524_v54  ;;  %v8054_v32 = vpop.f32.mrf.mxu0  ;;  %v3686_v16 = vsel %vm3614_vm5, %v3578_v52, %v3650_v46  ;;  %v8895_v54 = vld [vmem:[#allocation15_spill] sm:$0xff]  ;;  %v8896_v46 = vld [vmem:[#allocation94_spill] sm:$0xff] }
 0x467   : > { %v3808_v30 = vadd.f32 %v7990_v15, %v3807_v22 }
 0x468   : > { %v4484_v7 = vsel %vm4475_vm10, %v4481_v29, %v4483_v1  ;;  %v3539_v58 = vadd.f32 %v8016_v26, %v3285_v43  ;;  %v8893_v26 = vld [vmem:[#allocation93_spill] sm:$0xff] }
 0x469   : > { %v4588_v4 = vsel %vm4406_vm11, %v4484_v7, -1e+30  ;;  %v4037_v12 = vadd.f32 %v8892_v27, %v3808_v30  ;;  %v2525_v0 = vadd.f32 %v8894_v56, %v8893_v26  ;;  %v8898_v26 = vld [vmem:[#allocation16_spill] sm:$0xff] }
 0x46a   : > { %4625 = vst [vmem:[#allocation3 + $0x30] sm:$0xff] %v4588_v4  ;;  %v3579_v9 = vadd.f32 %v7792_v37, %v3539_v58 }
 0x46b   : > { %vm4073_vm4 = vcmp.ge.f32.partialorder %v4037_v12, 0.0  ;;  %v4109_v25 = vmul.f32 0.2, %v4037_v12  ;;  %v2978_v21 = vpop.f32.mrf.mxu2 }
 0x46c   : > { %v3032_v48 = vadd.f32 %v2978_v21, %v2778_v57  ;;  %vm3615_vm6 = vcmp.ge.f32.partialorder %v3579_v9, 0.0  ;;  %v3651_v13 = vmul.f32 0.2, %v3579_v9  ;;  %v3237_v39 = vpop.f32.mrf.mxu3 }
 0x46d   : > { %v4145_v29 = vsel %vm4073_vm4, %v4037_v12, %v4109_v25  ;;  %v8897_v25 = vld [vmem:[#allocation75_spill] sm:$0xff]  ;;  %vm4411_vm4 = vcmp.eq.s32.totalorder %v7927_v59, 1 }
 0x46e   : > { %v4485_v38 = vrot.slane %v4145_v29, 5  ;;  %v3286_v36 = vadd.f32 %v3232_v17, %v3032_v48  ;;  %v3810_v49 = vpop.f32.mrf.mxu1  ;;  %v3687_v19 = vsel %vm3615_vm6, %v3579_v9, %v3651_v13  ;;  %v2779_v17 = vadd.f32 %v7819_v34, %v2525_v0  ;;  %v3493_v48 = vpop.f32.mrf.mxu0 }
 0x46f   : > { %v3811_v43 = vadd.f32 %v7990_v15, %v3810_v49  ;;  %v3711_v22 = vpack.c.bf16 %v3687_v19, %v3686_v16  ;;  %v2526_v21 = vadd.f32 %v8897_v25, %v8896_v46  ;;  %v8899_v19 = vld [vmem:[#allocation95_spill] sm:$0xff]  ;;  %vm4412_vm6 = vcmp.eq.s32.totalorder %v7898_v8, 1 }
 0x470   : > { %v4486_v55 = vsel %vm4475_vm10, %v4483_v1, %v4485_v38  ;;  %v3540_v7 = vadd.f32 %v8029_v11, %v3286_v36 }
 0x471   : > { %v8061_v33 = vsel %vm4407_vm7, %v4486_v55, -1e+30  ;;  %v4038_v30 = vadd.f32 %v8895_v54, %v3811_v43  ;;  %3849 = vmatmul.bf16.gmra.mxu1 %v3711_v22  ;;  %v2780_v0 = vadd.f32 %v7831_v47, %v2526_v21  ;;  %v8900_v43 = vld [vmem:[#allocation76_spill] sm:$0xff] }
 0x472   : > { %4626 = vst [vmem:[#allocation3 + $0x38] sm:$0xff] %v8061_v33  ;;  %v3580_v50 = vadd.f32 %v7792_v37, %v3540_v7  ;;  %v8081_v37 = vld [vmem:[%s8716_s7] ss:$0 sm:$0xff]  ;;  %v2527_v22 = vadd.f32 %v8900_v43, %v8899_v19 }
 0x473   : > { %vm4074_vm8 = vcmp.ge.f32.partialorder %v4038_v30, 0.0  ;;  %v4110_v52 = vmul.f32 0.2, %v4038_v30  ;;  %v2980_v58 = vpop.f32.mrf.mxu2 }
 0x474   : > { %v3033_v4 = vadd.f32 %v2980_v58, %v2779_v17  ;;  %v3239_v12 = vpop.f32.mrf.mxu3  ;;  %v3652_v18 = vmul.f32 0.2, %v3580_v50  ;;  %vm3616_vm13 = vcmp.ge.f32.partialorder %v3580_v50, 0.0 }
 0x475   : > { %v4146_v27 = vsel %vm4074_vm8, %v4038_v30, %v4110_v52 }
 0x476   : > { %v4487_v1 = vrot.slane %v4146_v27, 5  ;;  %v3287_v9 = vadd.f32 %v3234_v41, %v3033_v4  ;;  %v3812_v57 = vpop.f32.mrf.mxu1  ;;  %v3688_v7 = vsel %vm3616_vm13, %v3580_v50, %v3652_v18  ;;  %v3496_v27 = vpop.f32.mrf.mxu0  ;;  %v2781_v50 = vadd.f32 %v7843_v42, %v2527_v22 }
 0x477   : > { %v3813_v13 = vadd.f32 %v7990_v15, %v3812_v57  ;;  %v8901_v57 = vld [vmem:[#allocation17_spill] sm:$0xff] }
 0x478   : > { %v4488_v34 = vsel %vm4475_vm10, %v4485_v38, %v4487_v1  ;;  %v3541_v11 = vadd.f32 %v8042_v6, %v3287_v9 }
 0x479   : > { %v8074_v29 = vsel %vm4408_vm9, %v4488_v34, -1e+30  ;;  %v4039_v56 = vadd.f32 %v8898_v26, %v3813_v13 }
 0x47a   : > { %4627 = vst [vmem:[#allocation3 + $0x40] sm:$0xff] %v8074_v29  ;;  %v3581_v41 = vadd.f32 %v8081_v37, %v3541_v11 }
 0x47b   : > { %vm4075_vm12 = vcmp.ge.f32.partialorder %v4039_v56, 0.0  ;;  %v4111_v38 = vmul.f32 0.2, %v4039_v56  ;;  %v2983_v36 = vpop.f32.mrf.mxu2 }
 0x47c   : > { %v3034_v6 = vadd.f32 %v2983_v36, %v2780_v0  ;;  %vm3617_vm14 = vcmp.ge.f32.partialorder %v3581_v41, 0.0  ;;  %v3653_v49 = vmul.f32 0.2, %v3581_v41  ;;  %v3242_v58 = vpop.f32.mrf.mxu3  ;;  %v8904_v36 = vld [vmem:[#allocation18_spill] sm:$0xff] }
 0x47d   : > { %v4147_v16 = vsel %vm4075_vm12, %v4039_v56, %v4111_v38  ;;  %v8902_v56 = vld [vmem:[#allocation96_spill] sm:$0xff]  ;;  %vm4413_vm12 = vcmp.eq.s32.totalorder %v7865_v20, 1 }
 0x47e   : > { %v4489_v55 = vrot.slane %v4147_v16, 5  ;;  %v3288_v54 = vadd.f32 %v3237_v39, %v3034_v6  ;;  %v3815_v30 = vpop.f32.mrf.mxu1  ;;  %v3689_v17 = vsel %vm3617_vm14, %v3581_v41, %v3653_v49  ;;  %v8903_v41 = vld [vmem:[#allocation77_spill] sm:$0xff]  ;;  %v3498_v43 = vpop.f32.mrf.mxu0  ;;  %vm4414_vm14 = vcmp.eq.s32.totalorder %v7837_v24, 1 }
 0x47f   : > { %v3816_v52 = vadd.f32 %v7990_v15, %v3815_v30  ;;  %v3712_v47 = vpack.c.bf16 %v3689_v17, %v3688_v7  ;;  %v2528_v0 = vadd.f32 %v8903_v41, %v8902_v56  ;;  %v8905_v30 = vld [vmem:[#allocation97_spill] sm:$0xff]  ;;  %v8906_v7 = vld [vmem:[#allocation78_spill] sm:$0xff] }
 0x480   : > { %v4490_v4 = vsel %vm4475_vm10, %v4487_v1, %v4489_v55  ;;  %v3542_v39 = vadd.f32 %v8054_v32, %v3288_v54  ;;  %v2529_v17 = vadd.f32 %v8906_v7, %v8905_v30 }
 0x481   : > { %v8090_v9 = vsel %vm4409_vm15, %v4490_v4, -1e+30  ;;  %v4040_v46 = vadd.f32 %v8901_v57, %v3816_v52  ;;  %3854 = vmatmul.bf16.gmra.mxu1 %v3712_v47  ;;  %v2782_v16 = vadd.f32 %v7859_v53, %v2528_v0 }
 0x482   : > { %4628 = vst [vmem:[#allocation3 + $0x48] sm:$0xff] %v8090_v9  ;;  %v3582_v2 = vadd.f32 %v8081_v37, %v3542_v39 }
 0x483   : > { %vm4076_vm1 = vcmp.ge.f32.partialorder %v4040_v46, 0.0  ;;  %v4112_v25 = vmul.f32 0.2, %v4040_v46  ;;  %v2985_v21 = vpop.f32.mrf.mxu2 }
 0x484   : > { %v3035_v13 = vadd.f32 %v2985_v21, %v2781_v50  ;;  %v3244_v49 = vpop.f32.mrf.mxu3  ;;  %v3654_v19 = vmul.f32 0.2, %v3582_v2  ;;  %vm3618_vm0 = vcmp.ge.f32.partialorder %v3582_v2, 0.0  ;;  %v8907_v21 = vld [vmem:[#allocation19_spill] sm:$0xff] }
 0x485   : > { %v4148_v34 = vsel %vm4076_vm1, %v4040_v46, %v4112_v25 }
 0x486   : > { %v4491_v1 = vrot.slane %v4148_v34, 5  ;;  %v3289_v11 = vadd.f32 %v3239_v12, %v3035_v13  ;;  %v3817_v26 = vpop.f32.mrf.mxu1  ;;  %v3690_v57 = vsel %vm3618_vm0, %v3582_v2, %v3654_v19  ;;  %v3501_v41 = vpop.f32.mrf.mxu0  ;;  %v8910_v19 = vld [vmem:[#allocation20_spill] sm:$0xff] }
 0x487   : > { %v3818_v18 = vadd.f32 %v7990_v15, %v3817_v26 }
 0x488   : > { %v4492_v32 = vsel %vm4475_vm10, %v4489_v55, %v4491_v1  ;;  %v3543_v42 = vadd.f32 %v3493_v48, %v3289_v11 }
 0x489   : > { %v8102_v38 = vsel %vm4410_vm2, %v4492_v32, -1e+30  ;;  %v4041_v6 = vadd.f32 %v8904_v36, %v3818_v18  ;;  %v8909_v36 = vld [vmem:[#allocation79_spill] sm:$0xff] }
 0x48a   : > { %4629 = vst [vmem:[#allocation3 + $0x50] sm:$0xff] %v8102_v38  ;;  %v3583_v12 = vadd.f32 %v8081_v37, %v3543_v42  ;;  %v8908_v42 = vld [vmem:[#allocation98_spill] sm:$0xff] }
 0x48b   : > { %vm4077_vm3 = vcmp.ge.f32.partialorder %v4041_v6, 0.0  ;;  %v4113_v22 = vmul.f32 0.2, %v4041_v6  ;;  %v2988_v54 = vpop.f32.mrf.mxu2 }
 0x48c   : > { %v3036_v51 = vadd.f32 %v2988_v54, %v2782_v16  ;;  %vm3619_vm11 = vcmp.ge.f32.partialorder %v3583_v12, 0.0  ;;  %v3655_v48 = vmul.f32 0.2, %v3583_v12  ;;  %v3247_v26 = vpop.f32.mrf.mxu3 }
 0x48d   : > { %v4149_v55 = vsel %vm4077_vm3, %v4041_v6, %v4113_v22  ;;  %v2530_v6 = vadd.f32 %v8909_v36, %v8908_v42  ;;  %v8914_v36 = vld [vmem:[#allocation100_spill] sm:$0xff]  ;;  %vm4415_vm3 = vcmp.eq.s32.totalorder %v7835_v28, 1 }
 0x48e   : > { %v4493_v52 = vrot.slane %v4149_v55, 5  ;;  %v3290_v47 = vadd.f32 %v3242_v58, %v3036_v51  ;;  %v3820_v4 = vpop.f32.mrf.mxu1  ;;  %v3691_v46 = vsel %vm3619_vm11, %v3583_v12, %v3655_v48  ;;  %v2783_v58 = vadd.f32 %v7875_v3, %v2529_v17  ;;  %v8911_v17 = vld [vmem:[#allocation99_spill] sm:$0xff] }
 0x48f   : > { %v3821_v53 = vadd.f32 %v7990_v15, %v3820_v4  ;;  %v3713_v39 = vpack.c.bf16 %v3691_v46, %v3690_v57  ;;  %vm4416_vm11 = vcmp.eq.s32.totalorder %v7823_v35, 1 }
 0x490   : > { %v4494_v50 = vsel %vm4475_vm10, %v4491_v1, %v4493_v52  ;;  %v3544_v34 = vadd.f32 %v3496_v27, %v3290_v47 }
 0x491   : > { %v8113_v25 = vsel %vm4411_vm4, %v4494_v50, -1e+30  ;;  %v4042_v13 = vadd.f32 %v8907_v21, %v3821_v53  ;;  %3859 = vmatmul.bf16.gmra.mxu1 %v3713_v39  ;;  %v3503_v50 = vpop.f32.mrf.mxu0 }
 0x492   : > { %4630 = vst [vmem:[#allocation3 + $0x58] sm:$0xff] %v8113_v25  ;;  %v3584_v59 = vadd.f32 %v8081_v37, %v3544_v34 }
 0x493   : > { %vm4078_vm5 = vcmp.ge.f32.partialorder %v4042_v13, 0.0  ;;  %v4114_v2 = vmul.f32 0.2, %v4042_v13  ;;  %v2990_v11 = vpop.f32.mrf.mxu2 }
 0x494   : > { %v3037_v56 = vadd.f32 %v2990_v11, %v2783_v58  ;;  %v3656_v51 = vmul.f32 0.2, %v3584_v59  ;;  %vm3620_vm8 = vcmp.ge.f32.partialorder %v3584_v59, 0.0  ;;  %v8913_v58 = vld [vmem:[#allocation21_spill] sm:$0xff] }
 0x495   : > { %v4150_v0 = vsel %vm4078_vm5, %v4042_v13, %v4114_v2 }
 0x496   : > { %v4495_v1 = vrot.slane %v4150_v0, 5  ;;  %v3291_v18 = vadd.f32 %v3244_v49, %v3037_v56  ;;  %v3822_v32 = vpop.f32.mrf.mxu1  ;;  %v2784_v49 = vadd.f32 %v7891_v10, %v2530_v6  ;;  %v3692_v53 = vsel %vm3620_vm8, %v3584_v59, %v3656_v51  ;;  %v8915_v6 = vld [vmem:[#allocation81_spill] sm:$0xff] }
 0x497   : > { %v3823_v12 = vadd.f32 %v7990_v15, %v3822_v32 }
 0x498   : > { %v4496_v3 = vsel %vm4475_vm10, %v4493_v52, %v4495_v1  ;;  %v3545_v27 = vadd.f32 %v3498_v43, %v3291_v18  ;;  %v3249_v43 = vpop.f32.mrf.mxu3  ;;  %v8912_v52 = vld [vmem:[#allocation80_spill] sm:$0xff] }
 0x499   : > { %v8124_v16 = vsel %vm4412_vm6, %v4496_v3, -1e+30  ;;  %v4043_v22 = vadd.f32 %v8910_v19, %v3823_v12  ;;  %v2531_v47 = vadd.f32 %v8912_v52, %v8911_v17  ;;  %v2532_v12 = vadd.f32 %v8915_v6, %v8914_v36  ;;  %v3506_v19 = vpop.f32.mrf.mxu0  ;;  %v8917_v17 = vld [vmem:[#allocation101_spill] sm:$0xff]  ;;  %v8918_v52 = vld [vmem:[#allocation82_spill] sm:$0xff]  ;;  %v8921_v6 = vld [vmem:[#allocation83_spill] sm:$0xff] }
 0x49a   : > { %4631 = vst [vmem:[#allocation3 + $0x60] sm:$0xff] %v8124_v16  ;;  %v3585_v54 = vadd.f32 %v8081_v37, %v3545_v27  ;;  %v8920_v36 = vld [vmem:[#allocation102_spill] sm:$0xff] }
 0x49b   : > { %vm4079_vm7 = vcmp.ge.f32.partialorder %v4043_v22, 0.0  ;;  %v4115_v48 = vmul.f32 0.2, %v4043_v22  ;;  %v2993_v55 = vpop.f32.mrf.mxu2 }
 0x49c   : > { %v3038_v30 = vadd.f32 %v2993_v55, %v2784_v49  ;;  %vm3621_vm9 = vcmp.ge.f32.partialorder %v3585_v54, 0.0  ;;  %v3657_v8 = vmul.f32 0.2, %v3585_v54 }
 0x49d   : > { %v4151_v7 = vsel %vm4079_vm7, %v4043_v22, %v4115_v48  ;;  %v2786_v48 = vadd.f32 %v7924_v63, %v2532_v12  ;;  %v2534_v12 = vadd.f32 %v8921_v6, %v8920_v36  ;;  %vm4417_vm7 = vcmp.eq.s32.totalorder %v7851_v62, 1 }
 0x49e   : > { %v4497_v4 = vrot.slane %v4151_v7, 5  ;;  %v3292_v57 = vadd.f32 %v3247_v26, %v3038_v30  ;;  %v3825_v46 = vpop.f32.mrf.mxu1  ;;  %v3693_v39 = vsel %vm3621_vm9, %v3585_v54, %v3657_v8  ;;  %v2785_v26 = vadd.f32 %v7907_v23, %v2531_v47  ;;  %v8916_v54 = vld [vmem:[#allocation22_spill] sm:$0xff] }
 0x49f   : > { %v3826_v10 = vadd.f32 %v7990_v15, %v3825_v46  ;;  %v3714_v21 = vpack.c.bf16 %v3693_v39, %v3692_v53  ;;  %v2533_v47 = vadd.f32 %v8918_v52, %v8917_v17  ;;  %vm4418_vm9 = vcmp.eq.s32.totalorder %v7893_v60, 1  ;;  %v4697_v60 = vld [vmem:[#allocation3 + $0x29] sm:$0xff] }
 0x4a0   : > { %v4498_v13 = vsel %vm4475_vm10, %v4495_v1, %v4497_v4  ;;  %v3546_v11 = vadd.f32 %v3501_v41, %v3292_v57  ;;  %v3252_v3 = vpop.f32.mrf.mxu3 }
 0x4a1   : > { %v8135_v34 = vsel %vm4413_vm12, %v4498_v13, -1e+30  ;;  %v4044_v2 = vadd.f32 %v8913_v58, %v3826_v10  ;;  %3864 = vmatmul.bf16.gmra.mxu1 %v3714_v21  ;;  %v8919_v58 = vld [vmem:[#allocation23_spill] sm:$0xff] }
 0x4a2   : > { %4632 = vst [vmem:[#allocation3 + $0x68] sm:$0xff] %v8135_v34  ;;  %v3586_v32 = vadd.f32 %v8081_v37, %v3546_v11 }
 0x4a3   : > { %vm4080_vm13 = vcmp.ge.f32.partialorder %v4044_v2, 0.0  ;;  %v4116_v56 = vmul.f32 0.2, %v4044_v2  ;;  %v2995_v0 = vpop.f32.mrf.mxu2 }
 0x4a4   : > { %v3039_v59 = vadd.f32 %v2995_v0, %v2785_v26  ;;  %v3658_v55 = vmul.f32 0.2, %v3586_v32  ;;  %vm3622_vm1 = vcmp.ge.f32.partialorder %v3586_v32, 0.0  ;;  %v2787_v26 = vadd.f32 %v7939_v61, %v2533_v47 }
 0x4a5   : > { %v4152_v18 = vsel %vm4080_vm13, %v4044_v2, %v4116_v56  ;;  %v3508_v56 = vpop.f32.mrf.mxu0 }
 0x4a6   : > { %v4499_v20 = vrot.slane %v4152_v18, 5  ;;  %v3293_v42 = vadd.f32 %v3249_v43, %v3039_v59  ;;  %v3827_v1 = vpop.f32.mrf.mxu1  ;;  %v3694_v53 = vsel %vm3622_vm1, %v3586_v32, %v3658_v55  ;;  %vm4420_vm1 = vcmp.eq.s32.totalorder %v7931_v31, 1 }
 0x4a7   : > { %v3828_v27 = vadd.f32 %v7990_v15, %v3827_v1 }
 0x4a8   : > { %v4500_v23 = vsel %vm4475_vm10, %v4497_v4, %v4499_v20  ;;  %v3547_v41 = vadd.f32 %v3503_v50, %v3293_v42  ;;  %v3254_v13 = vpop.f32.mrf.mxu3 }
 0x4a9   : > { %v8146_v22 = vsel %vm4414_vm14, %v4500_v23, -1e+30  ;;  %v4045_v49 = vadd.f32 %v8916_v54, %v3828_v27 }
 0x4aa   : > { %4633 = vst [vmem:[#allocation3 + $0x70] sm:$0xff] %v8146_v22  ;;  %v3587_v51 = vadd.f32 %v8081_v37, %v3547_v41  ;;  %v8922_v41 = vld [vmem:[#allocation24_spill] sm:$0xff] }
 0x4ab   : > { %vm4081_vm15 = vcmp.ge.f32.partialorder %v4045_v49, 0.0  ;;  %v4117_v30 = vmul.f32 0.2, %v4045_v49  ;;  %v2998_v8 = vpop.f32.mrf.mxu2 }
 0x4ac   : > { %v3040_v24 = vadd.f32 %v2998_v8, %v2786_v48  ;;  %vm3623_vm2 = vcmp.ge.f32.partialorder %v3587_v51, 0.0  ;;  %v3659_v7 = vmul.f32 0.2, %v3587_v51 }
 0x4ad   : > { %v4153_v43 = vsel %vm4081_vm15, %v4045_v49, %v4117_v30  ;;  %v2788_v49 = vadd.f32 %v7957_v40, %v2534_v12  ;;  %v8925_v12 = vld [vmem:[#allocation27_spill] sm:$0xff]  ;;  %vm4419_vm15 = vcmp.eq.s32.totalorder %v7943_v14, 1 }
 0x4ae   : > { %v4501_v4 = vrot.slane %v4153_v43, 5  ;;  %v3294_v57 = vadd.f32 %v3252_v3, %v3040_v24  ;;  %v3830_v46 = vpop.f32.mrf.mxu1  ;;  %v3695_v39 = vsel %vm3623_vm2, %v3587_v51, %v3659_v7  ;;  %v3511_v24 = vpop.f32.mrf.mxu0  ;;  %v8923_v43 = vld [vmem:[#allocation84_spill] sm:$0xff] }
 0x4af   : > { %v3831_v50 = vadd.f32 %v7990_v15, %v3830_v46  ;;  %v3715_v63 = vpack.c.bf16 %v3695_v39, %v3694_v53  ;;  %v2535_v17 = vadd.f32 %v8923_v43, %v7779_v5 }
 0x4b0   : > { %v4502_v10 = vsel %vm4475_vm10, %v4499_v20, %v4501_v4  ;;  %v3548_v11 = vadd.f32 %v3506_v19, %v3294_v57  ;;  %v3257_v48 = vpop.f32.mrf.mxu3 }
 0x4b1   : > { %v8157_v21 = vsel %vm4415_vm3, %v4502_v10, -1e+30  ;;  %v4046_v2 = vadd.f32 %v8919_v58, %v3831_v50  ;;  %3869 = vmatmul.bf16.gmra.mxu1 %v3715_v63  ;;  %v8924_v63 = vld [vmem:[#allocation26_spill] sm:$0xff]  ;;  %v2789_v5 = vadd.f32 %v7973_v44, %v2535_v17  ;;  %vm4421_vm3 = vcmp.eq.s32.totalorder %v7981_v45, 1 }
 0x4b2   : > { %4634 = vst [vmem:[#allocation3 + $0x78] sm:$0xff] %v8157_v21  ;;  %v3588_v28 = vadd.f32 %v8081_v37, %v3548_v11  ;;  %v4698_v17 = vld [vmem:[#allocation3 + $0x31] sm:$0xff] }
 0x4b3   : > { %vm4082_vm0 = vcmp.ge.f32.partialorder %v4046_v2, 0.0  ;;  %v4118_v0 = vmul.f32 0.2, %v4046_v2  ;;  %v3000_v59 = vpop.f32.mrf.mxu2 }
 0x4b4   : > { %v3041_v18 = vadd.f32 %v3000_v59, %v2787_v26  ;;  %v3660_v51 = vmul.f32 0.2, %v3588_v28  ;;  %vm3624_vm5 = vcmp.ge.f32.partialorder %v3588_v28, 0.0 }
 0x4b5   : > { %v4154_v32 = vsel %vm4082_vm0, %v4046_v2, %v4118_v0  ;;  %v4692_v0 = vld [vmem:[#allocation3 + $0x1] sm:$0xff] }
 0x4b6   : > { %v4503_v20 = vrot.slane %v4154_v32, 5  ;;  %v3295_v42 = vadd.f32 %v3254_v13, %v3041_v18  ;;  %v3832_v1 = vpop.f32.mrf.mxu1  ;;  %v3696_v57 = vsel %vm3624_vm5, %v3588_v28, %v3660_v51  ;;  %v3513_v28 = vpop.f32.mrf.mxu0  ;;  %v4726_v36 = vmax.f32 %v4692_v0, -1e+30  ;;  %v4699_v0 = vld [vmem:[#allocation3 + $0x39] sm:$0xff] }
 0x4b7   : > { %v3833_v3 = vadd.f32 %v7990_v15, %v3832_v1  ;;  %v4693_v1 = vld [vmem:[#allocation3 + $0x9] sm:$0xff] }
 0x4b8   : > { %v4504_v61 = vsel %vm4475_vm10, %v4501_v4, %v4503_v20  ;;  %v3549_v27 = vadd.f32 %v3508_v56, %v3295_v42  ;;  %v3259_v26 = vpop.f32.mrf.mxu3 }
 0x4b9   : > { %v4598_v23 = vsel %vm4416_vm11, %v4504_v61, -1e+30  ;;  %v4047_v19 = vadd.f32 %v8922_v41, %v3833_v3  ;;  %v4760_v61 = vld [vmem:[#allocation3 + $0x2] sm:$0xff]  ;;  %v4706_v43 = vld [vmem:[#allocation3 + $0x71] sm:$0xff] }
 0x4ba   : > { %4635 = vst [vmem:[#allocation3 + $0x80] sm:$0xff] %v4598_v23  ;;  %v3589_v54 = vadd.f32 %v8081_v37, %v3549_v27  ;;  %v4696_v41 = vld [vmem:[#allocation3 + $0x21] sm:$0xff] }
 0x4bb   : > { %vm4083_vm4 = vcmp.ge.f32.partialorder %v4047_v19, 0.0  ;;  %v4119_v55 = vmul.f32 0.2, %v4047_v19  ;;  %v3003_v30 = vpop.f32.mrf.mxu2 }
 0x4bc   : > { %v3042_v8 = vadd.f32 %v3003_v30, %v2788_v49  ;;  %vm3625_vm6 = vcmp.ge.f32.partialorder %v3589_v54, 0.0  ;;  %v3661_v35 = vmul.f32 0.2, %v3589_v54  ;;  %v4761_v49 = vld [vmem:[#allocation3 + $0xa] sm:$0xff] }
 0x4bd   : > { %v4155_v7 = vsel %vm4083_vm4, %v4047_v19, %v4119_v55  ;;  %v4695_v19 = vld [vmem:[#allocation3 + $0x19] sm:$0xff]  ;;  %v4727_v55 = vmax.f32 %v4693_v1, -1e+30  ;;  %v4704_v1 = vld [vmem:[#allocation3 + $0x61] sm:$0xff] }
 0x4be   : > { %v4505_v52 = vrot.slane %v4155_v7, 5  ;;  %v3296_v47 = vadd.f32 %v3257_v48, %v3042_v8  ;;  %v3835_v4 = vpop.f32.mrf.mxu1  ;;  %v3697_v46 = vsel %vm3625_vm6, %v3589_v54, %v3661_v35  ;;  %v4694_v54 = vld [vmem:[#allocation3 + $0x11] sm:$0xff]  ;;  %v4662_v8 = vld [vmem:[#allocation3 + $0x20] sm:$0xff]  ;;  %v8186_v7 = vmax.f32 %v4726_v36, %v4760_v61 }
 0x4bf   : > { %v3836_v40 = vadd.f32 %v7990_v15, %v3835_v4  ;;  %v3716_v53 = vpack.c.bf16 %v3697_v46, %v3696_v57  ;;  %v4660_v48 = vld [vmem:[#allocation3 + $0x10] sm:$0xff]  ;;  %v4661_v35 = vld [vmem:[#allocation3 + $0x18] sm:$0xff] }
 0x4c0   : > { %v4506_v39 = vsel %vm4475_vm10, %v4503_v20, %v4505_v52  ;;  %v3550_v13 = vadd.f32 %v3511_v24, %v3296_v47  ;;  %v8184_v24 = vld [vmem:[#allocation3 + $0x12] sm:$0xff]  ;;  %v4730_v47 = vmax.f32 %v4662_v8, %v4696_v41  ;;  %v4729_v4 = vmax.f32 %v4661_v35, %v4695_v19  ;;  %v8213_v36 = vld [vmem:[#allocation3 + $0x3a] sm:$0xff] }
 0x4c1   : > { %v4599_v50 = vsel %vm4417_vm7, %v4506_v39, -1e+30  ;;  %v4048_v10 = vadd.f32 %v8924_v63, %v3836_v40  ;;  %3874 = vmatmul.bf16.gmra.mxu1 %v3716_v53  ;;  %v4728_v57 = vmax.f32 %v4660_v48, %v4694_v54  ;;  %v4702_v61 = vld [vmem:[#allocation3 + $0x51] sm:$0xff]  ;;  %v4701_v48 = vld [vmem:[#allocation3 + $0x49] sm:$0xff]  ;;  %v4674_v35 = vld [vmem:[#allocation3 + $0x80] sm:$0xff] }
 0x4c2   : > { %4636 = vst [vmem:[#allocation3 + $0x88] sm:$0xff] %v4599_v50  ;;  %v3590_v59 = vadd.f32 %v8081_v37, %v3550_v13  ;;  %v4707_v13 = vld [vmem:[#allocation3 + $0x79] sm:$0xff] }
 0x4c3   : > { %vm4084_vm8 = vcmp.ge.f32.partialorder %v4048_v10, 0.0  ;;  %v4120_v58 = vmul.f32 0.2, %v4048_v10  ;;  %v3005_v2 = vpop.f32.mrf.mxu2  ;;  %v8231_v54 = vld [vmem:[#allocation3 + $0x72] sm:$0xff] }
 0x4c4   : > { %v3043_v11 = vadd.f32 %v3005_v2, %v2789_v5  ;;  %v3662_v23 = vmul.f32 0.2, %v3590_v59  ;;  %vm3626_vm13 = vcmp.ge.f32.partialorder %v3590_v59, 0.0  ;;  %v4705_v5 = vld [vmem:[#allocation3 + $0x69] sm:$0xff]  ;;  %v8195_v2 = vld [vmem:[#allocation3 + $0x1a] sm:$0xff] }
 0x4c5   : > { %v4156_v56 = vsel %vm4084_vm8, %v4048_v10, %v4120_v58  ;;  %v4664_v58 = vld [vmem:[#allocation3 + $0x30] sm:$0xff]  ;;  %v4739_v14 = vmax.f32 %v8135_v34, %v4705_v5 }
 0x4c6   : > { %v4507_v62 = vrot.slane %v4156_v56, 5  ;;  %v3297_v18 = vadd.f32 %v3259_v26, %v3043_v11  ;;  %v3837_v32 = vpop.f32.mrf.mxu1  ;;  %v3698_v53 = vsel %vm3626_vm13, %v3590_v59, %v3662_v23  ;;  %v8197_v11 = vmax.f32 %v4727_v55, %v4761_v49  ;;  %v4700_v55 = vld [vmem:[#allocation3 + $0x41] sm:$0xff] }
 0x4c7   : > { %v3838_v20 = vadd.f32 %v7990_v15, %v3837_v32  ;;  %v4740_v56 = vmax.f32 %v8146_v22, %v4706_v43  ;;  %v4732_v59 = vmax.f32 %v4664_v58, %v4698_v17  ;;  %v8206_v32 = vld [vmem:[#allocation3 + $0x22] sm:$0xff]  ;;  %v8229_v23 = vmax.f32 %v4729_v4, %v8195_v2  ;;  %v4775_v17 = vld [vmem:[#allocation3 + $0x7a] sm:$0xff] }
 0x4c8   : > { %v4508_v42 = vsel %vm4475_vm10, %v4505_v52, %v4507_v62  ;;  %v3551_v44 = vadd.f32 %v3513_v28, %v3297_v18  ;;  %v4663_v52 = vld [vmem:[#allocation3 + $0x28] sm:$0xff]  ;;  %v8204_v18 = vld [vmem:[#allocation3 + $0x32] sm:$0xff]  ;;  %v4831_v28 = vmax.f32 %v8186_v7, %v8184_v24  ;;  %v8218_v22 = vmax.f32 %v4730_v47, %v8206_v32 }
 0x4c9   : > { %v4600_v6 = vsel %vm4418_vm9, %v4508_v42, -1e+30  ;;  %v4049_v3 = vadd.f32 %v8925_v12, %v3838_v20  ;;  %v4731_v50 = vmax.f32 %v4663_v52, %v4697_v60  ;;  %v8926_v42 = vld [vmem:[#allocation28_spill] sm:$0xff]  ;;  %v4741_v12 = vmax.f32 %v8157_v21, %v4707_v13  ;;  %v8247_v52 = vld [vmem:[#allocation3 + $0x6a] sm:$0xff] }
 0x4ca   : > { %4637 = vst [vmem:[#allocation3 + $0x90] sm:$0xff] %v4600_v6  ;;  %v3591_v27 = vadd.f32 %v8081_v37, %v3551_v44  ;;  %v8221_v6 = vmax.f32 %v4728_v57, %v8184_v24  ;;  %v4708_v41 = vld [vmem:[#allocation3 + $0x81] sm:$0xff]  ;;  %v4835_v21 = vmax.f32 %v8218_v22, %v8204_v18  ;;  %v4808_v34 = vmax.f32 %v4740_v56, %v8231_v54 }
 0x4cb   : > { %vm4085_vm12 = vcmp.ge.f32.partialorder %v4049_v3, 0.0  ;;  %v4121_v51 = vmul.f32 0.2, %v4049_v3  ;;  %v4776_v49 = vld [vmem:[#allocation3 + $0x82] sm:$0xff]  ;;  %v4738_v60 = vmax.f32 %v8124_v16, %v4704_v1  ;;  %v4736_v16 = vmax.f32 %v8102_v38, %v4702_v61  ;;  %v8271_v56 = vld [vmem:[#allocation3 + $0x5a] sm:$0xff] }
 0x4cc   : > { %vm3627_vm14 = vcmp.ge.f32.partialorder %v3591_v27, 0.0  ;;  %v3663_v30 = vmul.f32 0.2, %v3591_v27  ;;  %v4742_v4 = vmax.f32 %v4674_v35, %v4708_v41  ;;  %v4735_v13 = vmax.f32 %v8090_v9, %v4701_v48  ;;  %v8258_v58 = vld [vmem:[#allocation3 + $0x42] sm:$0xff] }
 0x4cd   : > { %v8188_v37 = vsel %vm4085_vm12, %v4049_v3, %v4121_v51  ;;  %v4703_v3 = vld [vmem:[#allocation3 + $0x59] sm:$0xff]  ;;  %v4733_v51 = vmax.f32 %v8061_v33, %v4699_v0  ;;  %v4734_v5 = vmax.f32 %v8074_v29, %v4700_v55  ;;  %v8927_v0 = vld [vmem:[#allocation29_spill] sm:$0xff] }
 0x4ce   : > { %v4509_v46 = vrot.slane %v8188_v37, 5  ;;  %v3840_v40 = vpop.f32.mrf.mxu1  ;;  %v3699_v39 = vsel %vm3627_vm14, %v3591_v27, %v3663_v30  ;;  %v8239_v30 = vmax.f32 %v4732_v59, %v8204_v18  ;;  %v4737_v47 = vmax.f32 %v8113_v25, %v4703_v3  ;;  %v4675_v35 = vld [vmem:[#allocation3 + $0x88] sm:$0xff] }
 0x4cf   : > { %v3841_v63 = vadd.f32 %v7990_v15, %v3840_v40  ;;  %v3717_v10 = vpack.c.bf16 %v3699_v39, %v3698_v53  ;;  %v4809_v53 = vmax.f32 %v4741_v12, %v4775_v17  ;;  %v4845_v39 = vmax.f32 %v4808_v34, %v4776_v49  ;;  %v8286_v34 = vld [vmem:[#allocation3 + $0x4a] sm:$0xff] }
 0x4d0   : > { %v4510_v26 = vsel %vm4475_vm10, %v4507_v62, %v4509_v46  ;;  %v8215_v62 = vld [vmem:[#allocation3 + $0x2a] sm:$0xff]  ;;  %v8261_v38 = vmax.f32 %v4733_v51, %v8213_v36  ;;  %v4810_v37 = vmax.f32 %v4742_v4, %v4776_v49  ;;  %v4803_v48 = vmax.f32 %v4735_v13, %v8286_v34 }
 0x4d1   : > { %v4601_v20 = vsel %vm4419_vm15, %v4510_v26, -1e+30  ;;  %v4050_v44 = vadd.f32 %v8926_v42, %v3841_v63  ;;  %3879 = vmatmul.bf16.gmra.mxu1 %v3717_v10  ;;  %v8226_v27 = vmax.f32 %v4731_v50, %v8215_v62  ;;  %v8245_v33 = vld [vmem:[#allocation3 + $0x8a] sm:$0xff]  ;;  %v4807_v50 = vmax.f32 %v4739_v14, %v8247_v52  ;;  %v8254_v10 = vld [vmem:[#allocation3 + $0x62] sm:$0xff] }
 0x4d2   : > { %4638 = vst [vmem:[#allocation3 + $0x98] sm:$0xff] %v4601_v20  ;;  %v4806_v9 = vmax.f32 %v4738_v60, %v8254_v10  ;;  %v4879_v20 = vld [vmem:[#allocation3 + $0x83] sm:$0xff]  ;;  %v4805_v42 = vmax.f32 %v4737_v47, %v8271_v56  ;;  %v4837_v14 = vmax.f32 %v8239_v30, %v8258_v58  ;;  %v4880_v41 = vld [vmem:[#allocation3 + $0x8b] sm:$0xff]  ;;  %v4802_v55 = vmax.f32 %v4734_v5, %v8258_v58 }
 0x4d3   : > { %vm4086_vm2 = vcmp.ge.f32.partialorder %v4050_v44, 0.0  ;;  %v4122_v19 = vmul.f32 0.2, %v4050_v44  ;;  %v4836_v8 = vmax.f32 %v8226_v27, %v8213_v36  ;;  %v4844_v26 = vmax.f32 %v4807_v50, %v4775_v17  ;;  %v4709_v31 = vld [vmem:[#allocation3 + $0x89] sm:$0xff] }
 0x4d4   : > { %v4843_v1 = vmax.f32 %v4806_v9, %v8231_v54  ;;  %v4842_v51 = vmax.f32 %v4805_v42, %v8247_v52  ;;  %v8928_v42 = vld [vmem:[#allocation45_spill] sm:$0xff]  ;;  %v4834_v30 = vmax.f32 %v8229_v23, %v8215_v62  ;;  %v4833_v27 = vmax.f32 %v8221_v6, %v8206_v32 }
 0x4d5   : > { %v8243_v43 = vsel %vm4086_vm2, %v4050_v44, %v4122_v19  ;;  %v8277_v44 = vld [vmem:[#allocation3 + $0x52] sm:$0xff]  ;;  %v4878_v19 = vld [vmem:[#allocation3 + $0x7b] sm:$0xff]  ;;  %vm4422_vm11 = vcmp.eq.s32.totalorder %v8928_v42, 1  ;;  %v4832_v18 = vmax.f32 %v8197_v11, %v8195_v2 }
 0x4d6   : > { %v4511_v57 = vrot.slane %v8243_v43, 5  ;;  %v3842_v40 = vpop.f32.mrf.mxu1  ;;  %v4804_v12 = vmax.f32 %v4736_v16, %v8277_v44  ;;  %v4912_v54 = vmax.f32 %v4844_v26, %v4878_v19  ;;  %v4947_v16 = vld [vmem:[#allocation3 + $0x84] sm:$0xff]  ;;  %v4839_v5 = vmax.f32 %v4802_v55, %v8277_v44  ;;  %v8303_v26 = vld [vmem:[%s8718_s9] ss:$0 sm:$0xff] }
 0x4d7   : > { %v3843_v63 = vadd.f32 %v7990_v15, %v3842_v40  ;;  %v4846_v15 = vmax.f32 %v4809_v53, %v8245_v33  ;;  %v4877_v40 = vld [vmem:[#allocation3 + $0x73] sm:$0xff]  ;;  %v4743_v53 = vmax.f32 %v4675_v35, %v4709_v31 }
 0x4d8   : > { %v4512_v25 = vsel %vm4475_vm10, %v4509_v46, %v4511_v57  ;;  %v4913_v46 = vmax.f32 %v4845_v39, %v4879_v20  ;;  %v4841_v52 = vmax.f32 %v4804_v12, %v8254_v10  ;;  %v4911_v13 = vmax.f32 %v4843_v1, %v4877_v40  ;;  %v4946_v10 = vld [vmem:[#allocation3 + $0x7c] sm:$0xff]  ;;  %v4945_v19 = vld [vmem:[#allocation3 + $0x74] sm:$0xff]  ;;  %v4944_v40 = vld [vmem:[#allocation3 + $0x6c] sm:$0xff] }
 0x4d9   : > { %v4602_v29 = vsel %vm4420_vm1, %v4512_v25, -1e+30  ;;  %v4051_v59 = vadd.f32 %v8927_v0, %v3843_v63  ;;  %v8283_v3 = vld [vmem:[#allocation3 + $0x92] sm:$0xff]  ;;  %v4914_v60 = vmax.f32 %v4846_v15, %v4880_v41  ;;  %v4980_v1 = vmax.f32 %v4912_v54, %v4946_v10  ;;  %v4875_v12 = vld [vmem:[#allocation3 + $0x63] sm:$0xff] }
 0x4da   : > { %4639 = vst [vmem:[#allocation3 + $0xa0] sm:$0xff] %v4602_v29  ;;  %v4847_v49 = vmax.f32 %v4810_v37, %v8283_v3  ;;  %v4881_v17 = vld [vmem:[#allocation3 + $0x93] sm:$0xff]  ;;  %v4981_v25 = vmax.f32 %v4913_v46, %v4947_v16  ;;  %v4876_v15 = vld [vmem:[#allocation3 + $0x6b] sm:$0xff]  ;;  %v4838_v54 = vmax.f32 %v8261_v38, %v8286_v34 }
 0x4db   : > { %vm4087_vm0 = vcmp.ge.f32.partialorder %v4051_v59, 0.0  ;;  %v4123_v61 = vmul.f32 0.2, %v4051_v59  ;;  %v8293_v4 = vld [vmem:[#allocation3 + $0x94] sm:$0xff]  ;;  %v4948_v29 = vld [vmem:[#allocation3 + $0x8c] sm:$0xff]  ;;  %v4910_v0 = vmax.f32 %v4842_v51, %v4876_v15  ;;  %v4909_v51 = vmax.f32 %v4841_v52, %v4875_v12 }
 0x4dc   : > { %v8296_v39 = vmax.f32 %v4847_v49, %v4881_v17  ;;  %v4982_v37 = vmax.f32 %v4914_v60, %v4948_v29  ;;  %v5018_v46 = vmax.f32 %v4981_v25, %v8293_v4  ;;  %v4811_v49 = vmax.f32 %v4743_v53, %v8245_v33  ;;  %v5052_v17 = vld [vmem:[#allocation3 + $0x95] sm:$0xff]  ;;  %v5051_v34 = vld [vmem:[#allocation3 + $0x8d] sm:$0xff] }
 0x4dd   : > { %v8291_v47 = vsel %vm4087_vm0, %v4051_v59, %v4123_v61  ;;  %v4840_v59 = vmax.f32 %v4803_v48, %v8271_v56  ;;  %v8929_v56 = vld [vmem:[#allocation31_spill] sm:$0xff]  ;;  %v4979_v60 = vmax.f32 %v4911_v13, %v4945_v19  ;;  %v4978_v15 = vmax.f32 %v4910_v0, %v4944_v40 }
 0x4de   : > { %v4513_v50 = vrot.slane %v8291_v47, 5  ;;  %v3845_v63 = vpop.f32.mrf.mxu1  ;;  %v4983_v20 = vmax.f32 %v8296_v39, %v8293_v4  ;;  %v4874_v48 = vld [vmem:[#allocation3 + $0x5b] sm:$0xff]  ;;  %v5086_v53 = vmax.f32 %v5018_v46, %v5052_v17  ;;  %v4873_v13 = vld [vmem:[#allocation3 + $0x53] sm:$0xff] }
 0x4df   : > { %v3846_v9 = vadd.f32 %v8303_v26, %v3845_v63  ;;  %v4908_v63 = vmax.f32 %v4840_v59, %v4874_v48  ;;  %v5016_v25 = vmax.f32 %v4979_v60, %v4947_v16  ;;  %v4942_v46 = vld [vmem:[#allocation3 + $0x5c] sm:$0xff]  ;;  %v4872_v16 = vld [vmem:[#allocation3 + $0x4b] sm:$0xff]  ;;  %v4941_v17 = vld [vmem:[#allocation3 + $0x54] sm:$0xff] }
 0x4e0   : > { %v4514_v44 = vsel %vm4475_vm10, %v4511_v57, %v4513_v50  ;;  %v5017_v57 = vmax.f32 %v4980_v1, %v4948_v29  ;;  %v4907_v1 = vmax.f32 %v4839_v5, %v4873_v13  ;;  %v5120_v60 = vld [vmem:[#allocation3 + $0x96] sm:$0xff]  ;;  %v5050_v48 = vld [vmem:[#allocation3 + $0x85] sm:$0xff] }
 0x4e1   : > { %v4603_v31 = vsel %vm4421_vm3, %v4514_v44, -1e+30  ;;  %v4052_v61 = vadd.f32 %v8929_v56, %v3846_v9  ;;  %v8319_v41 = vld [vmem:[#allocation3 + $0x9c] sm:$0xff]  ;;  %v4943_v9 = vld [vmem:[#allocation3 + $0x64] sm:$0xff] }
 0x4e2   : > { %4640 = vst [vmem:[#allocation3 + $0xa8] sm:$0xff] %v4603_v31  ;;  %v5019_v43 = vmax.f32 %v4982_v37, %v8319_v41  ;;  %v8325_v55 = vld [vmem:[#allocation3 + $0x9a] sm:$0xff]  ;;  %v4977_v37 = vmax.f32 %v4909_v51, %v4943_v9 }
 0x4e3   : > { %vm4088_vm4 = vcmp.ge.f32.partialorder %v4052_v61, 0.0  ;;  %v4124_v45 = vmul.f32 0.2, %v4052_v61  ;;  %v5053_v35 = vld [vmem:[#allocation3 + $0x9d] sm:$0xff]  ;;  %v4848_v52 = vmax.f32 %v4811_v49, %v8325_v55  ;;  %v5085_v49 = vmax.f32 %v5017_v57, %v5051_v34  ;;  %v5118_v34 = vld [vmem:[#allocation3 + $0x86] sm:$0xff] }
 0x4e4   : > { %v5087_v33 = vmax.f32 %v5019_v43, %v5053_v35  ;;  %v4882_v29 = vld [vmem:[#allocation3 + $0x9b] sm:$0xff]  ;;  %v5015_v43 = vmax.f32 %v4978_v15, %v4946_v10  ;;  %v5154_v57 = vmax.f32 %v5086_v53, %v5120_v60  ;;  %v5084_v10 = vmax.f32 %v5016_v25, %v5050_v48  ;;  %v5119_v15 = vld [vmem:[#allocation3 + $0x8e] sm:$0xff] }
 0x4e5   : > { %v8328_v44 = vsel %vm4088_vm4, %v4052_v61, %v4124_v45  ;;  %v5121_v38 = vld [vmem:[#allocation3 + $0x9e] sm:$0xff]  ;;  %v8330_v12 = vmax.f32 %v4848_v52, %v4882_v29  ;;  %v4976_v61 = vmax.f32 %v4908_v63, %v4942_v46  ;;  %v4906_v45 = vmax.f32 %v4838_v54, %v4872_v16  ;;  %v5047_v60 = vld [vmem:[#allocation3 + $0x6d] sm:$0xff] }
 0x4e6   : > { %v4515_v31 = vrot.slane %v8328_v44, 5  ;;  %v3847_v59 = vpop.f32.mrf.mxu1  ;;  %v5155_v56 = vmax.f32 %v5087_v33, %v5121_v38  ;;  %v5014_v35 = vmax.f32 %v4977_v37, %v4945_v19  ;;  %v4871_v52 = vld [vmem:[#allocation3 + $0x43] sm:$0xff]  ;;  %v4975_v29 = vmax.f32 %v4907_v1, %v4941_v17  ;;  %v8931_v38 = vld [vmem:[#allocation71_spill] sm:$0xff] }
 0x4e7   : > { %v3848_v0 = vadd.f32 %v8303_v26, %v3847_v59  ;;  %v4984_v51 = vmax.f32 %v8330_v12, %v8319_v41  ;;  %v8930_v63 = vld [vmem:[#allocation32_spill] sm:$0xff]  ;;  %v4905_v47 = vmax.f32 %v4837_v14, %v4871_v52  ;;  %vm4423_vm5 = vcmp.eq.s32.totalorder %v8931_v38, 1  ;;  %v5048_v37 = vld [vmem:[#allocation3 + $0x75] sm:$0xff]  ;;  %v4940_v59 = vld [vmem:[#allocation3 + $0x4c] sm:$0xff] }
 0x4e8   : > { %v4516_v5 = vsel %vm4475_vm10, %v4513_v50, %v4515_v31  ;;  %5227 = vmatpush.msrb.mxu2 %v5155_v56  ;;  %v5049_v13 = vld [vmem:[#allocation3 + $0x7d] sm:$0xff]  ;;  %v5153_v50 = vmax.f32 %v5085_v49, %v5119_v15  ;;  %v5013_v53 = vmax.f32 %v4976_v61, %v4944_v40  ;;  %v5152_v58 = vmax.f32 %v5084_v10, %v5118_v34  ;;  %v4869_v40 = vld [vmem:[#allocation3 + $0x33] sm:$0xff] }
 0x4e9   : > { %v4604_v33 = vsel %vm4422_vm11, %v4516_v5, -1e+30  ;;  %v4053_v54 = vadd.f32 %v8930_v63, %v3848_v0  ;;  %v5083_v19 = vmax.f32 %v5015_v43, %v5049_v13  ;;  %v4870_v25 = vld [vmem:[#allocation3 + $0x3b] sm:$0xff]  ;;  %v5082_v14 = vmax.f32 %v5014_v35, %v5048_v37  ;;  %v4939_v43 = vld [vmem:[#allocation3 + $0x44] sm:$0xff] }
 0x4ea   : > { %4641 = vst [vmem:[#allocation3 + $0xb0] sm:$0xff] %v4604_v33  ;;  %5228 = vmatpush.msrb.mxu2 %v5154_v57  ;;  %v4904_v1 = vmax.f32 %v4836_v8, %v4870_v25  ;;  %v5012_v56 = vmax.f32 %v4975_v29, %v4943_v9  ;;  %v4974_v49 = vmax.f32 %v4906_v45, %v4940_v59  ;;  %v5117_v0 = vld [vmem:[#allocation3 + $0x7e] sm:$0xff]  ;;  %v4868_v5 = vld [vmem:[#allocation3 + $0x2b] sm:$0xff]  ;;  %v5116_v10 = vld [vmem:[#allocation3 + $0x76] sm:$0xff] }
 0x4eb   : > { %vm4089_vm6 = vcmp.ge.f32.partialorder %v4053_v54, 0.0  ;;  %v4125_v42 = vmul.f32 0.2, %v4053_v54  ;;  %v4973_v48 = vmax.f32 %v4905_v47, %v4939_v43  ;;  %v4903_v36 = vmax.f32 %v4835_v21, %v4869_v40  ;;  %v4938_v45 = vld [vmem:[#allocation3 + $0x3c] sm:$0xff]  ;;  %v5046_v35 = vld [vmem:[#allocation3 + $0x65] sm:$0xff]  ;;  %v5115_v29 = vld [vmem:[#allocation3 + $0x6e] sm:$0xff] }
 0x4ec   : > { %5229 = vmatpush.msrb.mxu2 %v5153_v50  ;;  %v5151_v8 = vmax.f32 %v5083_v19, %v5117_v0  ;;  %v5081_v9 = vmax.f32 %v5013_v53, %v5047_v60  ;;  %v5011_v61 = vmax.f32 %v4974_v49, %v4942_v46  ;;  %v4972_v52 = vmax.f32 %v4904_v1, %v4938_v45  ;;  %v4937_v46 = vld [vmem:[#allocation3 + $0x34] sm:$0xff]  ;;  %v4867_v63 = vld [vmem:[#allocation3 + $0x23] sm:$0xff] }
 0x4ed   : > { %v8353_v16 = vsel %vm4089_vm6, %v4053_v54, %v4125_v42  ;;  %v4902_v33 = vmax.f32 %v4834_v30, %v4868_v5  ;;  %v5150_v22 = vmax.f32 %v5082_v14, %v5116_v10  ;;  %v5080_v6 = vmax.f32 %v5012_v56, %v5046_v35  ;;  %v8932_v15 = vld [vmem:[#allocation35_spill] sm:$0xff]  ;;  %v4936_v42 = vld [vmem:[#allocation3 + $0x2c] sm:$0xff] }
 0x4ee   : > { %v4517_v62 = vrot.slane %v8353_v16, 5  ;;  %v3850_v23 = vpop.f32.mrf.mxu1  ;;  %5230 = vmatpush.msrb.mxu2 %v5152_v58  ;;  %v5010_v21 = vmax.f32 %v4973_v48, %v4941_v17  ;;  %v5045_v47 = vld [vmem:[#allocation3 + $0x5d] sm:$0xff]  ;;  %v4971_v2 = vmax.f32 %v4903_v36, %v4937_v46  ;;  %v4901_v11 = vmax.f32 %v4833_v27, %v4867_v63  ;;  %v5114_v17 = vld [vmem:[#allocation3 + $0x66] sm:$0xff]  ;;  %v5044_v25 = vld [vmem:[#allocation3 + $0x55] sm:$0xff] }
 0x4ef   : > { %v3851_v57 = vadd.f32 %v8303_v26, %v3850_v23  ;;  %v5149_v44 = vmax.f32 %v5081_v9, %v5115_v29  ;;  %v5079_v50 = vmax.f32 %v5011_v61, %v5045_v47  ;;  %v4866_v19 = vld [vmem:[#allocation3 + $0x1b] sm:$0xff]  ;;  %v5148_v38 = vmax.f32 %v5080_v6, %v5114_v17  ;;  %v4935_v58 = vld [vmem:[#allocation3 + $0x24] sm:$0xff]  ;;  %v4865_v14 = vld [vmem:[#allocation3 + $0x13] sm:$0xff] }
 0x4f0   : > { %v4518_v32 = vsel %vm4475_vm10, %v4515_v31, %v4517_v62  ;;  %5231 = vmatpush.msrb.mxu2 %v5151_v8  ;;  %v5009_v31 = vmax.f32 %v4972_v52, %v4940_v59  ;;  %v4900_v34 = vmax.f32 %v4832_v18, %v4866_v19  ;;  %v5078_v37 = vmax.f32 %v5010_v21, %v5044_v25  ;;  %v5113_v49 = vld [vmem:[#allocation3 + $0x5e] sm:$0xff]  ;;  %v5043_v40 = vld [vmem:[#allocation3 + $0x4d] sm:$0xff]  ;;  %v5112_v61 = vld [vmem:[#allocation3 + $0x56] sm:$0xff] }
 0x4f1   : > { %v4605_v54 = vsel %vm4423_vm5, %v4518_v32, -1e+30  ;;  %v4054_v13 = vadd.f32 %v8932_v15, %v3851_v57  ;;  %v5008_v1 = vmax.f32 %v4971_v2, %v4939_v43  ;;  %v4970_v30 = vmax.f32 %v4902_v33, %v4936_v42  ;;  %v4934_v8 = vld [vmem:[#allocation3 + $0x1c] sm:$0xff]  ;;  %v8933_v9 = vld [vmem:[#allocation41_spill] sm:$0xff]  ;;  %v4933_v35 = vld [vmem:[#allocation3 + $0x14] sm:$0xff] }
 0x4f2   : > { %4642 = vst [vmem:[#allocation3 + $0xb8] sm:$0xff] %v4605_v54  ;;  %5232 = vmatpush.msrb.mxu2 %v5150_v22  ;;  %v4969_v0 = vmax.f32 %v4901_v11, %v4935_v58  ;;  %v4899_v59 = vmax.f32 %v4831_v28, %v4865_v14  ;;  %v5147_v36 = vmax.f32 %v5079_v50, %v5113_v49  ;;  %vm4424_vm8 = vcmp.eq.s32.totalorder %v8933_v9, 1  ;;  %v5042_v5 = vld [vmem:[#allocation3 + $0x45] sm:$0xff]  ;;  %v5111_v18 = vld [vmem:[#allocation3 + $0x4e] sm:$0xff]  ;;  %v5041_v32 = vld [vmem:[#allocation3 + $0x3d] sm:$0xff] }
 0x4f3   : > { %vm4090_vm7 = vcmp.ge.f32.partialorder %v4054_v13, 0.0  ;;  %v4126_v53 = vmul.f32 0.2, %v4054_v13  ;;  %v5077_v27 = vmax.f32 %v5009_v31, %v5043_v40  ;;  %v5007_v23 = vmax.f32 %v4970_v30, %v4938_v45  ;;  %v8934_v45 = vld [vmem:[#allocation36_spill] sm:$0xff]  ;;  %v5040_v54 = vld [vmem:[#allocation3 + $0x35] sm:$0xff]  ;;  %v5039_v2 = vld [vmem:[#allocation3 + $0x2d] sm:$0xff] }
 0x4f4   : > { %5233 = vmatpush.msrb.mxu2 %v5149_v44  ;;  %v4968_v57 = vmax.f32 %v4900_v34, %v4934_v8  ;;  %v5146_v24 = vmax.f32 %v5078_v37, %v5112_v61  ;;  %v5076_v7 = vmax.f32 %v5008_v1, %v5042_v5  ;;  %v5006_v28 = vmax.f32 %v4969_v0, %v4937_v46  ;;  %v5110_v63 = vld [vmem:[#allocation3 + $0x46] sm:$0xff]  ;;  %v5109_v47 = vld [vmem:[#allocation3 + $0x3e] sm:$0xff]  ;;  %v8935_v25 = vld [vmem:[#allocation42_spill] sm:$0xff] }
 0x4f5   : > { %v4162_v56 = vsel %vm4090_vm7, %v4054_v13, %v4126_v53  ;;  %v4967_v22 = vmax.f32 %v4899_v59, %v4933_v35  ;;  %v5145_v6 = vmax.f32 %v5077_v27, %v5111_v18  ;;  %v5075_v21 = vmax.f32 %v5007_v23, %v5041_v32  ;;  %v5108_v53 = vld [vmem:[#allocation3 + $0x36] sm:$0xff]  ;;  %v5038_v17 = vld [vmem:[#allocation3 + $0x25] sm:$0xff]  ;;  %v5123_v39 = vld [vmem:[#allocation3 + $0xae] sm:$0xff] }
 0x4f6   : > { %v4519_v60 = vrot.slane %v4162_v56, 5  ;;  %v3852_v48 = vpop.f32.mrf.mxu1  ;;  %5234 = vmatpush.msrb.mxu2 %v5148_v38  ;;  %v5005_v16 = vmax.f32 %v4968_v57, %v4936_v42  ;;  %v5144_v46 = vmax.f32 %v5076_v7, %v5110_v63  ;;  %v5074_v15 = vmax.f32 %v5006_v28, %v5040_v54  ;;  %v8936_v1 = vld [vmem:[#allocation39_spill] sm:$0xff]  ;;  %v5106_v49 = vld [vmem:[#allocation3 + $0x26] sm:$0xff] }
 0x4f7   : > { %v3853_v43 = vadd.f32 %v8303_v26, %v3852_v48  ;;  %v5004_v13 = vmax.f32 %v4967_v22, %v4935_v58  ;;  %v5143_v50 = vmax.f32 %v5075_v21, %v5109_v47  ;;  %vm4425_vm12 = vcmp.eq.s32.totalorder %v8935_v25, 1  ;;  %v5107_v58 = vld [vmem:[#allocation3 + $0x2e] sm:$0xff]  ;;  %v8938_v8 = vld [vmem:[#allocation40_spill] sm:$0xff]  ;;  %v8940_v35 = vld [vmem:[#allocation43_spill] sm:$0xff] }
 0x4f8   : > { %v4520_v10 = vsel %vm4475_vm10, %v4517_v62, %v4519_v60  ;;  %5235 = vmatpush.msrb.mxu2 %v5147_v36  ;;  %v5073_v31 = vmax.f32 %v5005_v16, %v5039_v2  ;;  %v5142_v34 = vmax.f32 %v5074_v15, %v5108_v53  ;;  %v8937_v36 = vld [vmem:[#allocation38_spill] sm:$0xff]  ;;  %v8941_v21 = vld [vmem:[#allocation63_spill] sm:$0xff]  ;;  %v8942_v63 = vld [vmem:[#allocation44_spill] sm:$0xff] }
 0x4f9   : > { %v8380_v52 = vsel %vm4424_vm8, %v4520_v10, -1e+30  ;;  %v4055_v33 = vadd.f32 %v8934_v45, %v3853_v43  ;;  %v5072_v38 = vmax.f32 %v5004_v13, %v5038_v17  ;;  %vm4426_vm14 = vcmp.eq.s32.totalorder %v8937_v36, 1  ;;  %v8943_v2 = vld [vmem:[#allocation34_spill] sm:$0xff]  ;;  %v8948_v36 = vld [vmem:[#allocation51_spill] sm:$0xff] }
 0x4fa   : > { %4643 = vst [vmem:[#allocation3 + $0xc0] sm:$0xff] %v8380_v52  ;;  %5236 = vmatpush.msrb.mxu2 %v5146_v24  ;;  %v5141_v14 = vmax.f32 %v5073_v31, %v5107_v58  ;;  %v8939_v24 = vld [vmem:[#allocation65_spill] sm:$0xff]  ;;  %vm4428_vm3 = vcmp.eq.s32.totalorder %v8941_v21, 1  ;;  %vm4429_vm11 = vcmp.eq.s32.totalorder %v8943_v2, 1  ;;  %v5182_v4 = vld [vmem:[%s8719_s10 + $0x40] sm:$0xff] }
 0x4fb   : > { %vm4091_vm9 = vcmp.ge.f32.partialorder %v4055_v33, 0.0  ;;  %v4127_v62 = vmul.f32 0.2, %v4055_v33  ;;  %v5140_v40 = vmax.f32 %v5072_v38, %v5106_v49  ;;  %vm4427_vm1 = vcmp.eq.s32.totalorder %v8939_v24, 1  ;;  %v8953_v2 = vld [vmem:[#allocation37_spill] sm:$0xff] }
 0x4fc   : > { %5237 = vmatpush.msrb.mxu2 %v5145_v6 }
 0x4fd   : > { %v4163_v29 = vsel %vm4091_vm9, %v4055_v33, %v4127_v62 }
 0x4fe   : > { %v4521_v11 = vrot.slane %v4163_v29, 5  ;;  %v3855_v44 = vpop.f32.mrf.mxu1  ;;  %5238 = vmatpush.msrb.mxu2 %v5144_v46 }
 0x4ff   : > { %v3856_v19 = vadd.f32 %v8303_v26, %v3855_v44 }
 0x500   : > { %v4522_v42 = vsel %vm4475_vm10, %v4519_v60, %v4521_v11  ;;  %5239 = vmatpush.msrb.mxu2 %v5143_v50  ;;  %v8944_v50 = vld [vmem:[#allocation47_spill] sm:$0xff] }
 0x501   : > { %v8387_v37 = vsel %vm4425_vm12, %v4522_v42, -1e+30  ;;  %v4056_v30 = vadd.f32 %v8936_v1, %v3856_v19 }
 0x502   : > { %4644 = vst [vmem:[#allocation3 + $0xc8] sm:$0xff] %v8387_v37  ;;  %5240 = vmatpush.msrb.mxu2 %v5142_v34  ;;  %v8945_v34 = vld [vmem:[#allocation61_spill] sm:$0xff] }
 0x503   : > { %vm4092_vm13 = vcmp.ge.f32.partialorder %v4056_v30, 0.0  ;;  %v4128_v56 = vmul.f32 0.2, %v4056_v30  ;;  %vm4430_vm5 = vcmp.eq.s32.totalorder %v8945_v34, 1 }
 0x504   : > { %5241 = vmatpush.msrb.mxu2 %v5141_v14 }
 0x505   : > { %v4164_v0 = vsel %vm4092_vm13, %v4056_v30, %v4128_v56  ;;  %v8946_v30 = vld [vmem:[#allocation48_spill] sm:$0xff] }
 0x506   : > { %v4523_v59 = vrot.slane %v4164_v0, 5  ;;  %v3857_v60 = vpop.f32.mrf.mxu1  ;;  %5242 = vmatpush.msrb.mxu2 %v5140_v40 }
 0x507   : > { %v3858_v48 = vadd.f32 %v8303_v26, %v3857_v60 }
 0x508   : > { %v4524_v27 = vsel %vm4475_vm10, %v4521_v11, %v4523_v59 }
 0x509   : > { %v8394_v23 = vsel %vm4426_vm14, %v4524_v27, -1e+30  ;;  %v4057_v9 = vadd.f32 %v8938_v8, %v3858_v48 }
 0x50a   : > { %4645 = vst [vmem:[#allocation3 + $0xd0] sm:$0xff] %v8394_v23 }
 0x50b   : > { %vm4093_vm15 = vcmp.ge.f32.partialorder %v4057_v9, 0.0  ;;  %v4129_v43 = vmul.f32 0.2, %v4057_v9 }
 0x50d   : > { %v4165_v61 = vsel %vm4093_vm15, %v4057_v9, %v4129_v43  ;;  %vm4434_vm15 = vcmp.eq.s32.totalorder %v8953_v2, 1 }
 0x50e   : > { %v4525_v5 = vrot.slane %v4165_v61, 5  ;;  %v3860_v57 = vpop.f32.mrf.mxu1 }
 0x50f   : > { %v3861_v10 = vadd.f32 %v8303_v26, %v3860_v57  ;;  %v8949_v57 = vld [vmem:[#allocation30_spill] sm:$0xff] }
 0x510   : > { %v4526_v7 = vsel %vm4475_vm10, %v4523_v59, %v4525_v5  ;;  %v8947_v59 = vld [vmem:[#allocation58_spill] sm:$0xff]  ;;  %vm4432_vm9 = vcmp.eq.s32.totalorder %v8949_v57, 1 }
 0x511   : > { %v8401_v28 = vsel %vm4427_vm1, %v4526_v7, -1e+30  ;;  %v4058_v45 = vadd.f32 %v8940_v35, %v3861_v10  ;;  %vm4431_vm7 = vcmp.eq.s32.totalorder %v8947_v59, 1  ;;  %v8950_v7 = vld [vmem:[#allocation52_spill] sm:$0xff] }
 0x512   : > { %4646 = vst [vmem:[#allocation3 + $0xd8] sm:$0xff] %v8401_v28 }
 0x513   : > { %vm4094_vm2 = vcmp.ge.f32.partialorder %v4058_v45, 0.0  ;;  %v4130_v33 = vmul.f32 0.2, %v4058_v45 }
 0x515   : > { %v4166_v18 = vsel %vm4094_vm2, %v4058_v45, %v4130_v33 }
 0x516   : > { %v4527_v32 = vrot.slane %v4166_v18, 5  ;;  %v3862_v22 = vpop.f32.mrf.mxu1 }
 0x517   : > { %v3863_v6 = vadd.f32 %v8303_v26, %v3862_v22 }
 0x518   : > { %v4528_v16 = vsel %vm4475_vm10, %v4525_v5, %v4527_v32 }
 0x519   : > { %v8408_v62 = vsel %vm4428_vm3, %v4528_v16, -1e+30  ;;  %v4059_v54 = vadd.f32 %v8942_v63, %v3863_v6  ;;  %v8951_v6 = vld [vmem:[#allocation33_spill] sm:$0xff]  ;;  %v8952_v63 = vld [vmem:[#allocation55_spill] sm:$0xff] }
 0x51a   : > { %4647 = vst [vmem:[#allocation3 + $0xe0] sm:$0xff] %v8408_v62  ;;  %vm4433_vm13 = vcmp.eq.s32.totalorder %v8951_v6, 1 }
 0x51b   : > { %vm4095_vm0 = vcmp.ge.f32.partialorder %v4059_v54, 0.0  ;;  %v4131_v46 = vmul.f32 0.2, %v4059_v54 }
 0x51d   : > { %v4167_v15 = vsel %vm4095_vm0, %v4059_v54, %v4131_v46 }
 0x51e   : > { %v4529_v13 = vrot.slane %v4167_v15, 5  ;;  %v3865_v29 = vpop.f32.mrf.mxu1 }
 0x51f   : > { %v3866_v47 = vadd.f32 %v8303_v26, %v3865_v29 }
 0x520   : > { %v4530_v11 = vsel %vm4475_vm10, %v4527_v32, %v4529_v13 }
 0x521   : > { %v8415_v44 = vsel %vm4429_vm11, %v4530_v11, -1e+30  ;;  %v4060_v31 = vadd.f32 %v8944_v50, %v3866_v47 }
 0x522   : > { %4648 = vst [vmem:[#allocation3 + $0xe8] sm:$0xff] %v8415_v44 }
 0x523   : > { %vm4096_vm4 = vcmp.ge.f32.partialorder %v4060_v31, 0.0  ;;  %v4132_v19 = vmul.f32 0.2, %v4060_v31 }
 0x525   : > { %v4168_v53 = vsel %vm4096_vm4, %v4060_v31, %v4132_v19  ;;  %v8954_v31 = vld [vmem:[#allocation56_spill] sm:$0xff] }
 0x526   : > { %v4531_v17 = vrot.slane %v4168_v53, 5  ;;  %v3867_v25 = vpop.f32.mrf.mxu1 }
 0x527   : > { %v3868_v42 = vadd.f32 %v8303_v26, %v3867_v25 }
 0x528   : > { %v4532_v38 = vsel %vm4475_vm10, %v4529_v13, %v4531_v17 }
 0x529   : > { %v8422_v1 = vsel %vm4430_vm5, %v4532_v38, -1e+30  ;;  %v4061_v58 = vadd.f32 %v8946_v30, %v3868_v42 }
 0x52a   : > { %4649 = vst [vmem:[#allocation3 + $0xf0] sm:$0xff] %v8422_v1 }
 0x52b   : > { %vm4097_vm6 = vcmp.ge.f32.partialorder %v4061_v58, 0.0  ;;  %v4133_v14 = vmul.f32 0.2, %v4061_v58 }
 0x52d   : > { %v4169_v56 = vsel %vm4097_vm6, %v4061_v58, %v4133_v14  ;;  %v4711_v58 = vld [vmem:[#allocation3 + $0x99] sm:$0xff]  ;;  %v4676_v14 = vld [vmem:[#allocation3 + $0x90] sm:$0xff]  ;;  %vm5198_vm6 = vcmask 113664  }
 0x52e   : > { %v4533_v49 = vrot.slane %v4169_v56, 5  ;;  %v3870_v40 = vpop.f32.mrf.mxu1 }
 0x52f   : > { %v3871_v0 = vadd.f32 %v8303_v26, %v3870_v40 }
 0x530   : > { %v4534_v60 = vsel %vm4475_vm10, %v4531_v17, %v4533_v49  ;;  %v4710_v17 = vld [vmem:[#allocation3 + $0x91] sm:$0xff] }
 0x531   : > { %v8429_v48 = vsel %vm4431_vm7, %v4534_v60, -1e+30  ;;  %v4062_v27 = vadd.f32 %v8948_v36, %v3871_v0  ;;  %v4721_v34 = vld [vmem:[#allocation3 + $0xe9] sm:$0xff]  ;;  %v4744_v40 = vmax.f32 %v4676_v14, %v4710_v17  ;;  %v4716_v17 = vld [vmem:[#allocation3 + $0xc1] sm:$0xff] }
 0x532   : > { %4650 = vst [vmem:[#allocation3 + $0xf8] sm:$0xff] %v8429_v48  ;;  %v8955_v0 = vld [vmem:[#allocation69_spill] sm:$0xff]  ;;  %v4755_v36 = vmax.f32 %v8415_v44, %v4721_v34  ;;  %v8498_v34 = vld [vmem:[#allocation3 + $0xda] sm:$0xff] }
 0x533   : > { %vm4098_vm8 = vcmp.ge.f32.partialorder %v4062_v27, 0.0  ;;  %v4134_v8 = vmul.f32 0.2, %v4062_v27  ;;  %vm4435_vm2 = vcmp.eq.s32.totalorder %v8955_v0, 1  ;;  %v8470_v6 = vmax.f32 %v4744_v40, %v8283_v3  ;;  %v8504_v14 = vld [vmem:[#allocation3 + $0xa9] sm:$0xff] }
 0x535   : > { %v4170_v9 = vsel %vm4098_vm8, %v4062_v27, %v4134_v8  ;;  %v4677_v27 = vld [vmem:[#allocation3 + $0x98] sm:$0xff] }
 0x536   : > { %v4535_v43 = vrot.slane %v4170_v9, 5  ;;  %v3872_v61 = vpop.f32.mrf.mxu1  ;;  %v8956_v9 = vld [vmem:[#allocation59_spill] sm:$0xff]  ;;  %v4745_v57 = vmax.f32 %v4677_v27, %v4711_v58  ;;  %v8958_v27 = vld [vmem:[#allocation25_spill] sm:$0xff] }
 0x537   : > { %v3873_v5 = vadd.f32 %v8303_v26, %v3872_v61  ;;  %v4720_v61 = vld [vmem:[#allocation3 + $0xe1] sm:$0xff] }
 0x538   : > { %v4536_v10 = vsel %vm4475_vm10, %v4533_v49, %v4535_v43 }
 0x539   : > { %v8436_v24 = vsel %vm4432_vm9, %v4536_v10, -1e+30  ;;  %v4063_v35 = vadd.f32 %v8950_v7, %v3873_v5  ;;  %v4722_v42 = vld [vmem:[#allocation3 + $0xf1] sm:$0xff]  ;;  %v4719_v5 = vld [vmem:[#allocation3 + $0xd9] sm:$0xff] }
 0x53a   : > { %4651 = vst [vmem:[#allocation3 + $0x100] sm:$0xff] %v8436_v24  ;;  %v4756_v60 = vmax.f32 %v8422_v1, %v4722_v42  ;;  %v8957_v10 = vld [vmem:[#allocation67_spill] sm:$0xff]  ;;  %v8463_v1 = vld [vmem:[#allocation3 + $0xa1] sm:$0xff] }
 0x53b   : > { %vm4099_vm12 = vcmp.ge.f32.partialorder %v4063_v35, 0.0  ;;  %v4135_v45 = vmul.f32 0.2, %v4063_v35  ;;  %vm4436_vm3 = vcmp.eq.s32.totalorder %v8957_v10, 1 }
 0x53d   : > { %v4171_v33 = vsel %vm4099_vm12, %v4063_v35, %v4135_v45  ;;  %v8459_v35 = vld [vmem:[#allocation3 + $0xea] sm:$0xff] }
 0x53e   : > { %v4537_v18 = vrot.slane %v4171_v33, 5  ;;  %v3875_v32 = vpop.f32.mrf.mxu1  ;;  %v4718_v45 = vld [vmem:[#allocation3 + $0xd1] sm:$0xff]  ;;  %v8461_v33 = vld [vmem:[#allocation3 + $0xa0] sm:$0xff] }
 0x53f   : > { %v3876_v22 = vadd.f32 %v8303_v26, %v3875_v32  ;;  %v8465_v32 = vld [vmem:[#allocation3 + $0xf2] sm:$0xff]  ;;  %v4752_v2 = vmax.f32 %v8394_v23, %v4718_v45  ;;  %v8496_v23 = vld [vmem:[#allocation3 + $0xe2] sm:$0xff] }
 0x540   : > { %v4538_v21 = vsel %vm4475_vm10, %v4535_v43, %v4537_v18 }
 0x541   : > { %v4615_v16 = vsel %vm4433_vm13, %v4538_v21, -1e+30  ;;  %v4064_v54 = vadd.f32 %v8952_v63, %v3876_v22  ;;  %v4723_v49 = vld [vmem:[#allocation3 + $0xf9] sm:$0xff]  ;;  %v8472_v21 = vpop.permute.xlu2 %4400  ;;  %v4754_v63 = vmax.f32 %v8408_v62, %v4720_v61 }
 0x542   : > { %4652 = vst [vmem:[#allocation3 + $0x108] sm:$0xff] %v4615_v16  ;;  %v4757_v7 = vmax.f32 %v8429_v48, %v4723_v49  ;;  %v4824_v48 = vmax.f32 %v4756_v60, %v8465_v32  ;;  %v4823_v16 = vmax.f32 %v4755_v36, %v8459_v35  ;;  %vm4438_vm11 = vcmp.eq.s32.totalorder %v8472_v21, 1 }
 0x543   : > { %vm4100_vm14 = vcmp.ge.f32.partialorder %v4064_v54, 0.0  ;;  %v4136_v46 = vmul.f32 0.2, %v4064_v54  ;;  %v4822_v40 = vmax.f32 %v4754_v63, %v8496_v23 }
 0x545   : > { %v4172_v15 = vsel %vm4100_vm14, %v4064_v54, %v4136_v46  ;;  %v4753_v54 = vmax.f32 %v8401_v28, %v4719_v5  ;;  %v4717_v46 = vld [vmem:[#allocation3 + $0xc9] sm:$0xff]  ;;  %v4750_v5 = vmax.f32 %v8380_v52, %v4716_v17  ;;  %v4859_v45 = vmax.f32 %v4822_v40, %v8465_v32  ;;  %v8531_v32 = vld [vmem:[#allocation3 + $0xba] sm:$0xff] }
 0x546   : > { %v4539_v13 = vrot.slane %v4172_v15, 5  ;;  %v3877_v29 = vpop.f32.mrf.mxu1  ;;  %v8478_v15 = vld [vmem:[#allocation3 + $0xb9] sm:$0xff]  ;;  %v4680_v52 = vld [vmem:[#allocation3 + $0xb0] sm:$0xff] }
 0x547   : > { %v3878_v47 = vadd.f32 %v8303_v26, %v3877_v29  ;;  %v8482_v29 = vpop.permute.xlu1 %4397  ;;  %v4821_v0 = vmax.f32 %v4753_v54, %v8498_v34  ;;  %v8526_v54 = vld [vmem:[#allocation3 + $0xca] sm:$0xff] }
 0x548   : > { %v4540_v11 = vsel %vm4475_vm10, %v4537_v18, %v4539_v13  ;;  %v4791_v18 = vld [vmem:[#allocation3 + $0xfa] sm:$0xff]  ;;  %vm4437_vm4 = vcmp.eq.s32.totalorder %v8482_v29, 1 }
 0x549   : > { %v4616_v50 = vsel %vm4434_vm15, %v4540_v11, -1e+30  ;;  %v4065_v19 = vadd.f32 %v8954_v31, %v3878_v47  ;;  %v8467_v22 = vld [vmem:[#allocation3 + $0x102] sm:$0xff]  ;;  %v4746_v11 = vmax.f32 %v8461_v33, %v8463_v1  ;;  %v4825_v31 = vmax.f32 %v4757_v7, %v4791_v18 }
 0x54a   : > { %4653 = vst [vmem:[#allocation3 + $0x110] sm:$0xff] %v4616_v50  ;;  %v8490_v50 = vmax.f32 %v4745_v57, %v8325_v55  ;;  %v4751_v55 = vmax.f32 %v8387_v37, %v4717_v46  ;;  %v4725_v37 = vld [vmem:[#allocation3 + $0x109] sm:$0x3f]  ;;  %v4724_v60 = vld [vmem:[#allocation3 + $0x101] sm:$0xff] }
 0x54b   : > { %vm4101_vm1 = vcmp.ge.f32.partialorder %v4065_v19, 0.0  ;;  %v4137_v53 = vmul.f32 0.2, %v4065_v19  ;;  %v4758_v63 = vmax.f32 %v8436_v24, %v4724_v60  ;;  %v4893_v24 = vld [vmem:[#allocation3 + $0xf3] sm:$0xff] }
 0x54c   : > { %v4927_v40 = vmax.f32 %v4859_v45, %v4893_v24 }
 0x54d   : > { %v8448_v25 = vsel %vm4101_vm1, %v4065_v19, %v4137_v53  ;;  %v4861_v19 = vmax.f32 %v4824_v48, %v8467_v22  ;;  %v4860_v53 = vmax.f32 %v4823_v16, %v4791_v18  ;;  %v8523_v18 = vld [vmem:[#allocation3 + $0xa8] sm:$0xff] }
 0x54e   : > { %v4541_v38 = vrot.slane %v8448_v25, 5  ;;  %v3880_v30 = vpop.f32.mrf.mxu1  ;;  %v4681_v25 = vld [vmem:[#allocation3 + $0xb8] sm:$0xff] }
 0x54f   : > { %v3881_v56 = vadd.f32 %v8303_v26, %v3880_v30  ;;  %v8500_v30 = vld [vmem:[#allocation3 + $0xd2] sm:$0xff]  ;;  %v4749_v58 = vmax.f32 %v4681_v25, %v8478_v15 }
 0x550   : > { %v4542_v59 = vsel %vm4475_vm10, %v4539_v13, %v4541_v38  ;;  %v8480_v13 = vld [vmem:[#allocation3 + $0xa2] sm:$0xff]  ;;  %v4820_v61 = vmax.f32 %v4752_v2, %v8500_v30  ;;  %v4892_v15 = vld [vmem:[#allocation3 + $0xeb] sm:$0xff] }
 0x551   : > { %v4617_v8 = vsel %vm4435_vm2, %v4542_v59, -1e+30  ;;  %v4066_v43 = vadd.f32 %v8956_v9, %v3881_v56  ;;  %v4828_v3 = vld [vmem:[#allocation3 + $0x10a] sm:$0xff]  ;;  %v4849_v56 = vmax.f32 %v8470_v6, %v8480_v13  ;;  %v8529_v2 = vld [vmem:[#allocation3 + $0xc2] sm:$0xff] }
 0x552   : > { %4654 = vst [vmem:[#allocation3 + $0x118] sm:$0xff] %v4617_v8  ;;  %v4862_v49 = vmax.f32 %v4825_v31, %v4828_v3  ;;  %v4691_v59 = vld [vmem:[#allocation3 + $0x108] sm:$0x3f]  ;;  %v4819_v3 = vmax.f32 %v4751_v55, %v8526_v54  ;;  %v4857_v17 = vmax.f32 %v4820_v61, %v8496_v23  ;;  %v4818_v25 = vmax.f32 %v4750_v5, %v8529_v2 }
 0x553   : > { %vm4102_vm0 = vcmp.ge.f32.partialorder %v4066_v43, 0.0  ;;  %v4138_v44 = vmul.f32 0.2, %v4066_v43  ;;  %v4895_v9 = vld [vmem:[#allocation3 + $0x103] sm:$0xff]  ;;  %v4896_v48 = vld [vmem:[#allocation3 + $0x10b] sm:$0xff]  ;;  %v4759_v16 = vmax.f32 %v4691_v59, %v4725_v37  ;;  %v4826_v23 = vmax.f32 %v4758_v63, %v8467_v22 }
 0x554   : > { %v4929_v57 = vmax.f32 %v4861_v19, %v4895_v9  ;;  %v4930_v46 = vmax.f32 %v4862_v49, %v4896_v48  ;;  %v4963_v19 = vld [vmem:[#allocation3 + $0x104] sm:$0xff]  ;;  %v4962_v49 = vld [vmem:[#allocation3 + $0xfc] sm:$0xff]  ;;  %v4964_v37 = vld [vmem:[#allocation3 + $0x10c] sm:$0xff] }
 0x555   : > { %v8484_v47 = vsel %vm4102_vm0, %v4066_v43, %v4138_v44  ;;  %v4894_v43 = vld [vmem:[#allocation3 + $0xfb] sm:$0xff]  ;;  %v4858_v44 = vmax.f32 %v4821_v0, %v8459_v35  ;;  %v4793_v0 = vld [vmem:[#allocation3 + $0x10a] sm:$0x3f] }
 0x556   : > { %v4543_v28 = vrot.slane %v8484_v47, 5  ;;  %v3882_v62 = vpop.f32.mrf.mxu1  ;;  %v4928_v7 = vmax.f32 %v4860_v53, %v4894_v43  ;;  %v4998_v43 = vmax.f32 %v4930_v46, %v4964_v37  ;;  %v4891_v5 = vld [vmem:[#allocation3 + $0xe3] sm:$0xff]  ;;  %v4855_v47 = vmax.f32 %v4818_v25, %v8500_v30 }
 0x557   : > { %v3883_v42 = vadd.f32 %v8303_v26, %v3882_v62  ;;  %v4747_v62 = vmax.f32 %v8523_v18, %v8504_v14  ;;  %v4856_v14 = vmax.f32 %v4819_v3, %v8498_v34  ;;  %v4925_v22 = vmax.f32 %v4857_v17, %v4891_v5  ;;  %v4960_v18 = vld [vmem:[#allocation3 + $0xec] sm:$0xff] }
 0x558   : > { %v4544_v26 = vsel %vm4475_vm10, %v4541_v38, %v4543_v28  ;;  %v8519_v38 = vld [vmem:[#allocation3 + $0xb1] sm:$0xff]  ;;  %v4996_v60 = vmax.f32 %v4928_v7, %v4962_v49  ;;  %v5180_v6 = vld [vmem:[%s8719_s10 + $0x30] sm:$0xff] }
 0x559   : > { %v4618_v36 = vsel %vm4436_vm3, %v4544_v26, -1e+30  ;;  %v4067_v8 = vadd.f32 %v8958_v27, %v3883_v42  ;;  %v4748_v35 = vmax.f32 %v4680_v52, %v8519_v38  ;;  %v8536_v53 = vld [vmem:[#allocation3 + $0x114] sm:$0xff]  ;;  %v8541_v42 = vmax.f32 %v4749_v58, %v8531_v32 }
 0x55a   : > { %4655 = vst [vmem:[#allocation3 + $0x120] sm:$0xff] %v4618_v36  ;;  %v4997_v26 = vmax.f32 %v4929_v57, %v4963_v19  ;;  %v4829_v59 = vld [vmem:[#allocation3 + $0x112] sm:$0xff]  ;;  %v4926_v36 = vmax.f32 %v4858_v44, %v4892_v15  ;;  %v4827_v27 = vmax.f32 %v4759_v16, %v4793_v0  ;;  %v5033_v21 = vmax.f32 %v4996_v60, %v4964_v37  ;;  %v4890_v16 = vld [vmem:[#allocation3 + $0xdb] sm:$0xff] }
 0x55b   : > { %vm4103_vm5 = vcmp.ge.f32.partialorder %v4067_v8, 0.0  ;;  %v4139_v10 = vmul.f32 0.2, %v4067_v8  ;;  %v8551_v38 = vld [vmem:[#allocation3 + $0xb2] sm:$0xff]  ;;  %v4863_v45 = vmax.f32 %v4826_v23, %v4829_v59  ;;  %v4924_v29 = vmax.f32 %v4856_v14, %v4890_v16  ;;  %v4959_v59 = vld [vmem:[#allocation3 + $0xe4] sm:$0xff] }
 0x55c   : > { %v5034_v61 = vmax.f32 %v4997_v26, %v8536_v53  ;;  %v4961_v7 = vld [vmem:[#allocation3 + $0xf4] sm:$0xff]  ;;  %v4994_v46 = vmax.f32 %v4926_v36, %v4960_v18  ;;  %v4854_v15 = vmax.f32 %v8541_v42, %v8526_v54  ;;  %v4816_v3 = vmax.f32 %v4748_v35, %v8551_v38  ;;  %v8559_v26 = vld [vmem:[#allocation3 + $0xaa] sm:$0xff] }
 0x55d   : > { %v4175_v31 = vsel %vm4103_vm5, %v4067_v8, %v4139_v10  ;;  %v4830_v8 = vld [vmem:[#allocation3 + $0x11a] sm:$0x3f]  ;;  %v4995_v44 = vmax.f32 %v4927_v40, %v4961_v7  ;;  %v5067_v0 = vld [vmem:[#allocation3 + $0x10d] sm:$0xff]  ;;  %v4815_v36 = vmax.f32 %v4747_v62, %v8559_v26 }
 0x55e   : > { %v4545_v55 = vrot.slane %v4175_v31, 5  ;;  %v4864_v10 = vmax.f32 %v4827_v27, %v4830_v8  ;;  %v5068_v52 = vld [vmem:[#allocation3 + $0x115] sm:$0xff]  ;;  %v4853_v14 = vmax.f32 %v4816_v3, %v8529_v2  ;;  %v5101_v42 = vmax.f32 %v5033_v21, %v5067_v0  ;;  %v5065_v21 = vld [vmem:[#allocation3 + $0xfd] sm:$0xff] }
 0x55f   : > { %v5102_v24 = vmax.f32 %v5034_v61, %v5068_v52  ;;  %v5032_v30 = vmax.f32 %v4995_v44, %v4963_v19  ;;  %v4897_v25 = vld [vmem:[#allocation3 + $0x113] sm:$0xff]  ;;  %v5031_v35 = vmax.f32 %v4994_v46, %v4962_v49  ;;  %v4993_v27 = vmax.f32 %v4925_v22, %v4959_v59  ;;  %v4958_v8 = vld [vmem:[#allocation3 + $0xdc] sm:$0xff]  ;;  %v4888_v19 = vld [vmem:[#allocation3 + $0xcb] sm:$0xff] }
 0x560   : > { %v4546_v58 = vsel %vm4475_vm10, %v4543_v28, %v4545_v55  ;;  %v4620_v9 = vsel %vm4438_vm11, %v4545_v55, -1e+30  ;;  %v4889_v55 = vld [vmem:[#allocation3 + $0xd3] sm:$0xff]  ;;  %v4931_v37 = vmax.f32 %v4863_v45, %v4897_v25  ;;  %v4992_v61 = vmax.f32 %v4924_v29, %v4958_v8  ;;  %v4886_v29 = vld [vmem:[#allocation3 + $0xbb] sm:$0xff] }
 0x561   : > { %v4619_v34 = vsel %vm4437_vm4, %v4546_v58, -1e+30  ;;  %4657 = vst [vmem:[#allocation3 + $0x130] sm:$0x7] %v4620_v9  ;;  %v5001_v57 = vld [vmem:[#allocation3 + $0x11c] sm:$0xff]  ;;  %v4923_v60 = vmax.f32 %v4855_v47, %v4889_v55  ;;  %v5066_v9 = vld [vmem:[#allocation3 + $0x105] sm:$0xff]  ;;  %v4922_v5 = vmax.f32 %v4854_v15, %v4888_v19  ;;  %v4814_v2 = vmax.f32 %v4746_v11, %v8480_v13 }
 0x562   : > { %4656 = vst [vmem:[#allocation3 + $0x128] sm:$0xff] %v4619_v34  ;;  %v5035_v28 = vmax.f32 %v4998_v43, %v5001_v57  ;;  %v4898_v48 = vld [vmem:[#allocation3 + $0x11b] sm:$0x3f]  ;;  %v4852_v34 = vmax.f32 %v4815_v36, %v8531_v32  ;;  %v5100_v49 = vmax.f32 %v5032_v30, %v5066_v9  ;;  %v5030_v22 = vmax.f32 %v4993_v27, %v4961_v7  ;;  %v4887_v47 = vld [vmem:[#allocation3 + $0xc3] sm:$0xff]  ;;  %v4956_v46 = vld [vmem:[#allocation3 + $0xcc] sm:$0xff] }
 0x563   : > { %v5069_v63 = vld [vmem:[#allocation3 + $0x11d] sm:$0xff]  ;;  %v4932_v17 = vmax.f32 %v4864_v10, %v4898_v48  ;;  %v4957_v45 = vld [vmem:[#allocation3 + $0xd4] sm:$0xff]  ;;  %v4999_v10 = vmax.f32 %v4931_v37, %v8536_v53  ;;  %v4921_v32 = vmax.f32 %v4853_v14, %v4887_v47  ;;  %v4851_v16 = vmax.f32 %v4814_v2, %v8551_v38  ;;  %v5134_v15 = vld [vmem:[#allocation3 + $0x106] sm:$0xff] }
 0x564   : > { %v5103_v31 = vmax.f32 %v5035_v28, %v5069_v63  ;;  %v5137_v40 = vld [vmem:[#allocation3 + $0x11e] sm:$0xff]  ;;  %v5136_v58 = vld [vmem:[#allocation3 + $0x116] sm:$0xff]  ;;  %v5135_v28 = vld [vmem:[#allocation3 + $0x10e] sm:$0xff]  ;;  %v4991_v48 = vmax.f32 %v4923_v60, %v4957_v45  ;;  %v5099_v1 = vmax.f32 %v5031_v35, %v5065_v21  ;;  %v5029_v52 = vmax.f32 %v4992_v61, %v4960_v18 }
 0x565   : > { %v5174_v23 = vld [vmem:[%s8719_s10] sm:$0xff]  ;;  %v5170_v62 = vmax.f32 %v5102_v24, %v5136_v58  ;;  %v5169_v33 = vmax.f32 %v5101_v42, %v5135_v28  ;;  %v4990_v30 = vmax.f32 %v4922_v5, %v4956_v46  ;;  %v4850_v53 = vmax.f32 %v8490_v50, %v8559_v26  ;;  %v4955_v37 = vld [vmem:[#allocation3 + $0xc4] sm:$0xff]  ;;  %v5177_v18 = vld [vmem:[%s8719_s10 + $0x18] sm:$0xff] }
 0x566   : > { %v5171_v54 = vmax.f32 %v5103_v31, %v5137_v40  ;;  %v4966_v43 = vld [vmem:[#allocation3 + $0x11c] sm:$0x3f]  ;;  %5243 = vmatmul.f32.vlgmr.msrb.gmra.mxu2 %v5174_v23  ;;  %v4885_v7 = vld [vmem:[#allocation3 + $0xb3] sm:$0xff]  ;;  %v5168_v38 = vmax.f32 %v5100_v49, %v5134_v15  ;;  %v5028_v0 = vmax.f32 %v4991_v48, %v4959_v59  ;;  %vm5223_vm10 = vcmask 1045504   ;;  %v4884_v58 = vld [vmem:[#allocation3 + $0xab] sm:$0xff] }
 0x567   : > { %v5000_v57 = vmax.f32 %v4932_v17, %v4966_v43  ;;  %v5064_v31 = vld [vmem:[#allocation3 + $0xf5] sm:$0xff]  ;;  %v4920_v17 = vmax.f32 %v4852_v34, %v4886_v29  ;;  %v5133_v60 = vld [vmem:[#allocation3 + $0xfe] sm:$0xff]  ;;  %v4989_v42 = vmax.f32 %v4921_v32, %v4955_v37  ;;  %v4919_v35 = vmax.f32 %v4851_v16, %v4885_v7  ;;  %v5130_v32 = vld [vmem:[#allocation3 + $0xe6] sm:$0xff] }
 0x568   : > { %5268 = vmatpush.msrb.mxu3 %v5171_v54  ;;  %v5098_v55 = vmax.f32 %v5030_v22, %v5064_v31  ;;  %v5063_v54 = vld [vmem:[#allocation3 + $0xed] sm:$0xff]  ;;  %v5167_v50 = vmax.f32 %v5099_v1, %v5133_v60  ;;  %v5027_v19 = vmax.f32 %v4990_v30, %v4958_v8  ;;  %v4954_v23 = vld [vmem:[#allocation3 + $0xbc] sm:$0xff]  ;;  %v5062_v43 = vld [vmem:[#allocation3 + $0xe5] sm:$0xff]  ;;  %v4918_v34 = vmax.f32 %v4850_v53, %v4884_v58 }
 0x569   : > { %v5003_v44 = vld [vmem:[#allocation3 + $0x12c] sm:$0x3f]  ;;  %v5002_v63 = vld [vmem:[#allocation3 + $0x124] sm:$0xff]  ;;  %v5097_v27 = vmax.f32 %v5029_v52, %v5063_v54  ;;  %v5132_v59 = vld [vmem:[#allocation3 + $0xf6] sm:$0xff]  ;;  %v5026_v61 = vmax.f32 %v4989_v42, %v4957_v45  ;;  %v4988_v5 = vmax.f32 %v4920_v17, %v4954_v23  ;;  %v5096_v49 = vmax.f32 %v5028_v0, %v5062_v43 }
 0x56a   : > { %5269 = vmatpush.msrb.mxu3 %v5170_v62  ;;  %v5037_v11 = vmax.f32 %v5000_v57, %v5003_v44  ;;  %v5071_v3 = vld [vmem:[#allocation3 + $0x12d] sm:$0x3f]  ;;  %v5036_v24 = vmax.f32 %v4999_v10, %v5002_v63  ;;  %v5070_v40 = vld [vmem:[#allocation3 + $0x125] sm:$0xff]  ;;  %v5166_v2 = vmax.f32 %v5098_v55, %v5132_v59  ;;  %v4953_v57 = vld [vmem:[#allocation3 + $0xb4] sm:$0xff] }
 0x56b   : > { %v5139_v14 = vld [vmem:[#allocation3 + $0x12e] sm:$0x3f]  ;;  %v5138_v9 = vld [vmem:[#allocation3 + $0x126] sm:$0xff]  ;;  %v5061_v28 = vld [vmem:[#allocation3 + $0xdd] sm:$0xff]  ;;  %v4987_v21 = vmax.f32 %v4919_v35, %v4953_v57  ;;  %v5025_v48 = vmax.f32 %v4988_v5, %v4956_v46  ;;  %v5164_v1 = vmax.f32 %v5096_v49, %v5130_v32 }
 0x56c   : > { %5270 = vmatpush.msrb.mxu3 %v5169_v33  ;;  %v5105_v25 = vmax.f32 %v5037_v11, %v5071_v3  ;;  %v5104_v36 = vmax.f32 %v5036_v24, %v5070_v40  ;;  %v4883_v22 = vld [vmem:[#allocation3 + $0xa3] sm:$0xff]  ;;  %v5131_v47 = vld [vmem:[#allocation3 + $0xee] sm:$0xff]  ;;  %v5095_v10 = vmax.f32 %v5027_v19, %v5061_v28  ;;  %v5128_v31 = vld [vmem:[#allocation3 + $0xd6] sm:$0xff] }
 0x56d   : > { %v5176_v8 = vld [vmem:[%s8719_s10 + $0x10] sm:$0xff]  ;;  %v4917_v45 = vmax.f32 %v4849_v56, %v4883_v22  ;;  %v5165_v44 = vmax.f32 %v5097_v27, %v5131_v47  ;;  %v5060_v16 = vld [vmem:[#allocation3 + $0xd5] sm:$0xff]  ;;  %v5024_v63 = vmax.f32 %v4987_v21, %v4955_v37  ;;  %v5129_v13 = vld [vmem:[#allocation3 + $0xde] sm:$0xff] }
 0x56e   : > { %5271 = vmatpush.msrb.mxu3 %v5168_v38  ;;  %v5173_v26 = vmax.f32 %v5105_v25, %v5139_v14  ;;  %5246 = vmatmul.f32.gmra.mxu2 %v5177_v18  ;;  %v5172_v62 = vmax.f32 %v5104_v36, %v5138_v9  ;;  %v4952_v33 = vld [vmem:[#allocation3 + $0xac] sm:$0xff]  ;;  %v5094_v11 = vmax.f32 %v5026_v61, %v5060_v16  ;;  %v4951_v29 = vld [vmem:[#allocation3 + $0xa4] sm:$0xff]  ;;  %v5056_v60 = vld [vmem:[#allocation3 + $0xb5] sm:$0xff] }
 0x56f   : > { %v4986_v52 = vmax.f32 %v4918_v34, %v4952_v33  ;;  %v5059_v56 = vld [vmem:[#allocation3 + $0xcd] sm:$0xff]  ;;  %v5163_v7 = vmax.f32 %v5095_v10, %v5129_v13  ;;  %v4985_v3 = vmax.f32 %v4917_v45, %v4951_v29  ;;  %v5058_v24 = vld [vmem:[#allocation3 + $0xc5] sm:$0xff]  ;;  %v5057_v55 = vld [vmem:[#allocation3 + $0xbd] sm:$0xff]  ;;  %v5021_v37 = vmax.f32 %v4984_v51, %v4952_v33 }
 0x570   : > { %5272 = vmatpush.msrb.mxu3 %v5167_v50  ;;  %6044 = vmatpush.msk.msrb.mxu0 %vm5223_vm10, %v5173_v26  ;;  %v5093_v46 = vmax.f32 %v5025_v48, %v5059_v56  ;;  %v5162_v30 = vmax.f32 %v5094_v11, %v5128_v31  ;;  %v5092_v17 = vmax.f32 %v5024_v63, %v5058_v24  ;;  %v5179_v38 = vld [vmem:[%s8719_s10 + $0x28] sm:$0xff]  ;;  %v5127_v25 = vld [vmem:[#allocation3 + $0xce] sm:$0xff]  ;;  %v5124_v51 = vld [vmem:[#allocation3 + $0xb6] sm:$0xff] }
 0x571   : > { %v5023_v15 = vmax.f32 %v4986_v52, %v4954_v23  ;;  %v5022_v53 = vmax.f32 %v4985_v3, %v4953_v57  ;;  %v5126_v18 = vld [vmem:[#allocation3 + $0xc6] sm:$0xff]  ;;  %v5020_v54 = vmax.f32 %v4983_v20, %v4951_v29  ;;  %v5125_v35 = vld [vmem:[#allocation3 + $0xbe] sm:$0xff]  ;;  %v5185_v43 = vld [vmem:[%s8719_s10 + $0x58] sm:$0xff] }
 0x572   : > { %5273 = vmatpush.msrb.mxu3 %v5166_v2  ;;  %5324 = vmatpush.msrb.mxu0 %v5172_v62  ;;  %v5161_v40 = vmax.f32 %v5093_v46, %v5127_v25  ;;  %v5160_v14 = vmax.f32 %v5092_v17, %v5126_v18  ;;  %v5183_v42 = vld [vmem:[%s8719_s10 + $0x48] sm:$0xff]  ;;  %v5055_v50 = vld [vmem:[#allocation3 + $0xad] sm:$0xff]  ;;  %v5186_v9 = vld [vmem:[%s8719_s10 + $0x60] sm:$0xff] }
 0x573   : > { %6045 = vmatmul.msk.f32.vlgmr.msrb.gmra.mxu0 %vm5198_vm6, %v5176_v8  ;;  %v5091_v0 = vmax.f32 %v5023_v15, %v5057_v55  ;;  %v5090_v36 = vmax.f32 %v5022_v53, %v5056_v60  ;;  %v5089_v12 = vmax.f32 %v5021_v37, %v5055_v50  ;;  %v5054_v26 = vld [vmem:[#allocation3 + $0xa5] sm:$0xff]  ;;  %v5178_v61 = vld [vmem:[%s8719_s10 + $0x20] sm:$0xff]  ;;  %v5189_v5 = vld [vmem:[%s8719_s10 + $0x78] sm:$0xff] }
 0x574   : > { %5274 = vmatpush.msrb.mxu3 %v5165_v44  ;;  %v5088_v19 = vmax.f32 %v5020_v54, %v5054_v26  ;;  %v5122_v23 = vld [vmem:[#allocation3 + $0xa6] sm:$0xff]  ;;  %v5181_v2 = vld [vmem:[%s8719_s10 + $0x38] sm:$0xff]  ;;  %v5194_v8 = vld [vmem:[%s8719_s10 + $0xa0] sm:$0xff] }
 0x575   : > { %v5159_v41 = vmax.f32 %v5091_v0, %v5125_v35  ;;  %v5158_v27 = vmax.f32 %v5090_v36, %v5124_v51  ;;  %v5157_v20 = vmax.f32 %v5089_v12, %v5123_v39  ;;  %v5175_v59 = vld [vmem:[%s8719_s10 + $0x8] sm:$0xff]  ;;  %v5188_v34 = vld [vmem:[%s8719_s10 + $0x70] sm:$0xff]  ;;  %v5197_v28 = vld [vmem:[%s8719_s10 + $0xb8] sm:$0xff] }
 0x576   : > { %5275 = vmatpush.msrb.mxu3 %v5164_v1  ;;  %5249 = vmatmul.f32.gmra.mxu2 %v5180_v6  ;;  %v5156_v58 = vmax.f32 %v5088_v19, %v5122_v23  ;;  %v5192_v62 = vld [vmem:[%s8719_s10 + $0x90] sm:$0xff]  ;;  %v5191_v49 = vld [vmem:[%s8719_s10 + $0x88] sm:$0xff]  ;;  %v5190_v21 = vld [vmem:[%s8719_s10 + $0x80] sm:$0xff] }
 0x577   : > { %v5184_v57 = vld [vmem:[%s8719_s10 + $0x50] sm:$0xff]  ;;  %v5195_v22 = vld [vmem:[%s8719_s10 + $0xa8] sm:$0xff]  ;;  %v5193_v45 = vld [vmem:[%s8719_s10 + $0x98] sm:$0xff] }
 0x578   : > { %5276 = vmatpush.msrb.mxu3 %v5163_v7  ;;  %v5187_v47 = vld [vmem:[%s8719_s10 + $0x68] sm:$0xff]  ;;  %v5196_v44 = vld [vmem:[%s8719_s10 + $0xb0] sm:$0xff] }
 0x57a   : > { %5277 = vmatpush.msrb.mxu3 %v5162_v30 }
 0x57b   : > { %6046 = vmatmul.msk.f32.gmra.mxu0 %vm5198_vm6, %v5179_v38 }
 0x57c   : > { %5278 = vmatpush.msrb.mxu3 %v5161_v40 }
 0x57e   : > { %5279 = vmatpush.msrb.mxu3 %v5160_v14  ;;  %5252 = vmatmul.f32.gmra.mxu2 %v5183_v42 }
 0x580   : > { %5280 = vmatpush.msrb.mxu3 %v5159_v41 }
 0x582   : > { %5281 = vmatpush.msrb.mxu3 %v5158_v27 }
 0x583   : > { %6047 = vmatmul.msk.f32.gmra.mxu0 %vm5198_vm6, %v5182_v4 }
 0x584   : > { %5282 = vmatpush.msrb.mxu3 %v5157_v20 }
 0x586   : > { %5283 = vmatpush.msrb.mxu3 %v5156_v58  ;;  %5255 = vmatmul.f32.gmra.mxu2 %v5186_v9 }
 0x587   : > { %5284 = vmatmul.f32.vlgmr.msrb.gmra.mxu3 %v5175_v59 }
 0x58b   : > { %6048 = vmatmul.msk.f32.gmra.mxu0 %vm5198_vm6, %v5185_v43 }
 0x58e   : > { %5258 = vmatmul.f32.gmra.mxu2 %v5189_v5 }
 0x58f   : > { %5287 = vmatmul.f32.gmra.mxu3 %v5178_v61 }
 0x593   : > { %6049 = vmatmul.msk.f32.gmra.mxu0 %vm5198_vm6, %v5188_v34 }
 0x596   : > { %5261 = vmatmul.f32.gmra.mxu2 %v5192_v62 }
 0x597   : > { %5290 = vmatmul.f32.gmra.mxu3 %v5181_v2 }
 0x59b   : > { %6050 = vmatmul.msk.f32.gmra.mxu0 %vm5198_vm6, %v5191_v49 }
 0x59e   : > { %5264 = vmatmul.f32.gmra.mxu2 %v5195_v22 }
 0x59f   : > { %5293 = vmatmul.f32.gmra.mxu3 %v5184_v57 }
 0x5a3   : > { %6051 = vmatmul.msk.f32.gmra.mxu0 %vm5198_vm6, %v5194_v8 }
 0x5a7   : > { %5296 = vmatmul.f32.gmra.mxu3 %v5187_v47 }
 0x5ab   : > { %6052 = vmatmul.msk.f32.gmra.mxu0 %vm5198_vm6, %v5197_v28 }
 0x5af   : > { %5299 = vmatmul.f32.gmra.mxu3 %v5190_v21 }
 0x5b7   : > { %5302 = vmatmul.f32.gmra.mxu3 %v5193_v45 }
 0x5bf   : > { %5305 = vmatmul.f32.gmra.mxu3 %v5196_v44 }
 0x5e9   : > { %v5244_v10 = vpop.f32.mrf.mxu2 }
 0x5f0   : > { %v5326_v48 = vpop.f32.mrf.mxu0 }
 0x5f1   : > { %v5247_v32 = vpop.f32.mrf.mxu2 }
 0x5f8   : > { %v5329_v16 = vpop.f32.mrf.mxu0 }
 0x5f9   : > { %v5250_v63 = vpop.f32.mrf.mxu2 }
 0x600   : > { %v5332_v52 = vpop.f32.mrf.mxu0 }
 0x601   : > { %v5253_v29 = vpop.f32.mrf.mxu2 }
 0x608   : > { %v5335_v46 = vpop.f32.mrf.mxu0 }
 0x609   : > { %v5256_v24 = vpop.f32.mrf.mxu2 }
 0x60a   : > { %v5285_v33 = vpop.f32.mrf.mxu3 }
 0x60b   : > { %v5286_v1 = vadd.f32 %v5285_v33, %v5244_v10 }
 0x60d   : > { %v5327_v11 = vadd.f32 %v5326_v48, %v5286_v1 }
 0x60f   : > { %5350 = vst [vmem:[%s8665_s29] sm:$0xff] %v5327_v11 }
 0x610   : > { %v5338_v17 = vpop.f32.mrf.mxu0 }
 0x611   : > { %v5259_v55 = vpop.f32.mrf.mxu2 }
 0x612   : > { %v5288_v6 = vpop.f32.mrf.mxu3 }
 0x613   : > { %v5289_v13 = vadd.f32 %v5288_v6, %v5247_v32 }
 0x615   : > { %v5330_v56 = vadd.f32 %v5329_v16, %v5289_v13 }
 0x617   : > { %5351 = vst [vmem:[%s8665_s29 + $0x8] sm:$0xff] %v5330_v56 }
 0x618   : > { %v5341_v0 = vpop.f32.mrf.mxu0 }
 0x619   : > { %v5262_v14 = vpop.f32.mrf.mxu2 }
 0x61a   : > { %v5291_v7 = vpop.f32.mrf.mxu3 }
 0x61b   : > { %v5292_v15 = vadd.f32 %v5291_v7, %v5250_v63 }
 0x61d   : > { %v5333_v3 = vadd.f32 %v5332_v52, %v5292_v15 }
 0x61f   : > { %5352 = vst [vmem:[%s8665_s29 + $0x10] sm:$0xff] %v5333_v3 }
 0x620   : > { %v5344_v36 = vpop.f32.mrf.mxu0 }
 0x621   : > { %v5265_v50 = vpop.f32.mrf.mxu2 }
 0x622   : > { %v5294_v31 = vpop.f32.mrf.mxu3 }
 0x623   : > { %v5295_v30 = vadd.f32 %v5294_v31, %v5253_v29 }
 0x625   : > { %v5336_v53 = vadd.f32 %v5335_v46, %v5295_v30 }
 0x627   : > { %5353 = vst [vmem:[%s8665_s29 + $0x18] sm:$0xff] %v5336_v53 }
 0x628   : > { %v5347_v12 = vpop.f32.mrf.mxu0 }
 0x62a   : > { %v5297_v38 = vpop.f32.mrf.mxu3 }
 0x62b   : > { %v5298_v25 = vadd.f32 %v5297_v38, %v5256_v24 }
 0x62d   : > { %v5339_v40 = vadd.f32 %v5338_v17, %v5298_v25 }
 0x62f   : > { %5354 = vst [vmem:[%s8665_s29 + $0x20] sm:$0xff] %v5339_v40 }
 0x632   : > { %v5300_v37 = vpop.f32.mrf.mxu3 }
 0x633   : > { %v5301_v18 = vadd.f32 %v5300_v37, %v5259_v55 }
 0x635   : > { %v5342_v60 = vadd.f32 %v5341_v0, %v5301_v18 }
 0x637   : > { %5355 = vst [vmem:[%s8665_s29 + $0x28] sm:$0xff] %v5342_v60 }
 0x63a   : > { %v5303_v54 = vpop.f32.mrf.mxu3 }
 0x63b   : > { %v5304_v42 = vadd.f32 %v5303_v54, %v5262_v14 }
 0x63d   : > { %v5345_v35 = vadd.f32 %v5344_v36, %v5304_v42 }
 0x63f   : > { %5356 = vst [vmem:[%s8665_s29 + $0x30] sm:$0xff] %v5345_v35 }
 0x642   : > { %v5306_v41 = vpop.f32.mrf.mxu3 }
 0x643   : > { %v5307_v51 = vadd.f32 %v5306_v41, %v5265_v50 }
 0x645   : > { %v5348_v26 = vadd.f32 %v5347_v12, %v5307_v51 }
 0x647   : > { %5357 = vst [vmem:[%s8665_s29 + $0x38] sm:$0xff] %v5348_v26 }
 0x648   : > { %6254 = shalt.err (!%p6251_p3)
}
 0x649   : > { %s6293_s15 = smov 128   ;;  %s6294_s29 = smov 8  }
 0x64a   : > { %6172 = dma.vmem_to_hbm [thread:$0]  (%p6393_p5), %s5372_s13, 1024, %s5374_s19, %s5359_s26, %s6293_s15, %s6293_s15, %s6294_s29  }
 0x64b PF: > { %p6178_p4 = scmp.ge.s32.totalorder %s6289_s20, 2  ;;  %s5388_s12 = sand.u32 1, %s6277_s17  }
 0x64c   : > { %s5389_s16 = scalar_lea.sflag [#allocation5], %s5388_s12 }
 0x64d   : > { %p6175_p7 = pnand %p6178_p4, %p6397_p6 }
 0x64f   : > { %p6176_p8 = pneg %p6175_p7 }
 0x651   : > { %6272 = dma.done.wait (%p6176_p8), %s5389_s16, 1024  }
 0x652   : > { %6274 = vsyncadd (%p6176_p8), %s5389_s16, 4294966272  ;;  %s8959_s21 = sld [smem:[#allocation7_spill]]  ;;  %p21_p9 = scmp.ge.s32.totalorder %s6380_s23, 4  }
 0x653   : > { %s8960_s19 = sld [smem:[#allocation8_spill]]  ;;  %s8961_s17 = smov %s6281_s18 }
 0x654   : > { %s8963_s20 = smov %s6380_s23  ;;  %23 = sbr.rel (!%p21_p9) target bundleno = 3 (0x3), region = 107 }
 0x658   : > { %s8962_s18 = smov %s8959_s21 }
 0x659   :  { %5395 = vsyncpa [#allocation5], 1 }
 0x65a   :  { %5397 = vsyncpa [#allocation5 + $0x1], 1 }

</bundles_post_ra>
